<compile_context>
chip_gen: v7x
topology: tpu7x:2x2x1
jax: 0.10.0
libtpu: 0.0.40
codegen_flags: <defaults>
</compile_context>

<pallas_src>
import functools

import jax
import jax.numpy as jnp
from jax.experimental import pallas as pl
from jax.experimental.pallas import tpu as pltpu


def _round_up(n: int, m: int) -> int:
    return ((n + m - 1) // m) * m


def _actor_kernel(x_ref,
                  w1_ref, b1_ref,
                  w2_ref, b2_ref,
                  w3_ref, b3_ref,
                  w4_ref, b4_ref,
                  w5_ref, b5_ref,
                  scale_ref, bias_ref,
                  o_ref):
    """Fused 5-layer MLP: relu x4 -> tanh -> affine (action scale/bias)."""
    cdt = w1_ref.dtype  # matmul input dtype (bf16 or f32); accumulation is f32.

    h = x_ref[...].astype(cdt)

    h = jnp.dot(h, w1_ref[...], preferred_element_type=jnp.float32) + b1_ref[...]
    h = jnp.maximum(h, 0.0).astype(cdt)

    h = jnp.dot(h, w2_ref[...], preferred_element_type=jnp.float32) + b2_ref[...]
    h = jnp.maximum(h, 0.0).astype(cdt)

    h = jnp.dot(h, w3_ref[...], preferred_element_type=jnp.float32) + b3_ref[...]
    h = jnp.maximum(h, 0.0).astype(cdt)

    h = jnp.dot(h, w4_ref[...], preferred_element_type=jnp.float32) + b4_ref[...]
    h = jnp.maximum(h, 0.0).astype(cdt)

    mu = jnp.tanh(jnp.dot(h, w5_ref[...], preferred_element_type=jnp.float32)
                  + b5_ref[...])

    o_ref[...] = (mu * scale_ref[...] + bias_ref[...]).astype(o_ref.dtype)


def prepare_actor_params(params, action_scale, action_bias, *,
                         weight_dtype=jnp.bfloat16):
    """One-time host-side layout prep (hoisted out of the per-call path).

    Casts weights to `weight_dtype` and pads the final-layer output dim
    (and action scale/bias) to a multiple of 128 lanes.  Returns
    (prepared_dict, act_dim); pass `prepared_dict` to actor_forward.
    """
    wdt = jnp.dtype(weight_dtype)
    act_dim = params["w5"].shape[1]
    act_p = _round_up(act_dim, 128)
    pad_a = ((0, 0), (0, act_p - act_dim))

    prepared = {
        "w1": jnp.asarray(params["w1"], wdt),            # (obs_dim, 256), unpadded K
        "b1": jnp.asarray(params["b1"], jnp.float32),
        "w2": jnp.asarray(params["w2"], wdt),
        "b2": jnp.asarray(params["b2"], jnp.float32),
        "w3": jnp.asarray(params["w3"], wdt),
        "b3": jnp.asarray(params["b3"], jnp.float32),
        "w4": jnp.asarray(params["w4"], wdt),
        "b4": jnp.asarray(params["b4"], jnp.float32),
        "w5": jnp.pad(params["w5"], pad_a).astype(wdt),   # (256, act_p)
        "b5": jnp.pad(params["b5"], pad_a).astype(jnp.float32),
        "scale": jnp.pad(action_scale, pad_a).astype(jnp.float32),
        "bias": jnp.pad(action_bias, pad_a).astype(jnp.float32),
    }
    return prepared, act_dim


@functools.partial(jax.jit, static_argnames=("act_dim", "batch_tile"))
def actor_forward(x, prepared, *, act_dim, batch_tile=None):
    """Run the Actor forward pass via a single fused Pallas kernel.

    x:         [B, obs_dim] float32
    prepared:  dict from prepare_actor_params() (kernel-layout weights)
    act_dim:   original (unpadded) action dimension (static)
    batch_tile: optional override for rows per grid step (static)
    returns:   [B, act_dim] float32
    """
    B, obs_dim = x.shape
    assert prepared["w1"].shape[0] == obs_dim, "obs_dim mismatch with prepared w1"
    wdt = prepared["w1"].dtype
    for k in ("w2", "w3", "w4", "w5"):
        assert prepared[k].dtype == wdt, "all weights must share one dtype"

    h1 = prepared["w1"].shape[1]
    h2 = prepared["w2"].shape[1]
    h3 = prepared["w3"].shape[1]
    h4 = prepared["w4"].shape[1]
    act_p = prepared["w5"].shape[1]

    # Batch tile: multiple of 16 rows; for B > 32 aim for >= 2 grid steps so
    # ("parallel",) can split across v7x's two TensorCores, capped at 512 rows
    # to keep the f32 intermediates well inside VMEM.
    if batch_tile is not None:
        bt = max(16, _round_up(int(batch_tile), 16))
    elif B <= 32:
        bt = _round_up(max(B, 1), 16)
    else:
        bt = min(512, _round_up((B + 1) // 2, 16))
    b_p = _round_up(B, bt)
    n_tiles = b_p // bt

    # Only the batch dim is ever padded (feature dim stays the full last dim).
    xp = jnp.pad(x, ((0, b_p - B), (0, 0))) if b_p != B else x

    # Grid-invariant operands (weights/biases/action buffers): full-array
    # blocks with a constant block index -> resident in VMEM across steps.
    def const(arr):
        return pl.BlockSpec(arr.shape, lambda i: (0, 0))

    in_specs = [
        pl.BlockSpec((bt, obs_dim), lambda i: (i, 0)),   # x tile (unpadded lanes)
        const(prepared["w1"]), const(prepared["b1"]),
        const(prepared["w2"]), const(prepared["b2"]),
        const(prepared["w3"]), const(prepared["b3"]),
        const(prepared["w4"]), const(prepared["b4"]),
        const(prepared["w5"]), const(prepared["b5"]),
        const(prepared["scale"]), const(prepared["bias"]),
    ]
    out_spec = pl.BlockSpec((bt, act_p), lambda i: (i, 0))  # lane-dense output

    # Advisory cost estimate so XLA can schedule around the call.
    layer_dots = obs_dim * h1 + h1 * h2 + h2 * h3 + h3 * h4 + h4 * act_p
    cost = pl.CostEstimate(
        flops=2 * b_p * layer_dots,
        transcendentals=b_p * act_p,
        bytes_accessed=(layer_dots * wdt.itemsize
                        + (h1 + h2 + h3 + h4 + 3 * act_p) * 4
                        + b_p * (obs_dim + act_p) * 4))

    out_padded = pl.pallas_call(
        _actor_kernel,
        out_shape=jax.ShapeDtypeStruct((b_p, act_p), jnp.float32),
        grid_spec=pltpu.PrefetchScalarGridSpec(
            num_scalar_prefetch=0,
            grid=(n_tiles,),
            in_specs=in_specs,
            out_specs=out_spec,
        ),
        compiler_params=pltpu.CompilerParams(
            # Independent batch tiles -> can split across v7x's 2 TensorCores.
            dimension_semantics=("parallel",),
            # Above v5e's 16 MiB default scoped limit, comfortable headroom
            # vs. v7x's 64 MiB/TC physical VMEM with bt capped at 512.
            vmem_limit_bytes=32 * 1024 * 1024,
        ),
        cost_estimate=cost,
    )(xp,
      prepared["w1"], prepared["b1"],
      prepared["w2"], prepared["b2"],
      prepared["w3"], prepared["b3"],
      prepared["w4"], prepared["b4"],
      prepared["w5"], prepared["b5"],
      prepared["scale"], prepared["bias"])

    return out_padded[:B, :act_dim]


def init_actor_params(key, obs_dim, act_dim):
    """Deterministic init mimicking PyTorch Linear default U[-1/sqrt(fan_in), +].

    Weights are stored as [in, out] (transposed vs. PyTorch's [out, in]) so the
    kernel computes x @ W directly.
    """
    sizes = [(obs_dim, 256), (256, 1024), (1024, 1024), (1024, 256), (256, act_dim)]
    params = {}
    for idx, (fan_in, fan_out) in enumerate(sizes, start=1):
        key, kw, kb = jax.random.split(key, 3)
        bound = 1.0 / jnp.sqrt(jnp.float32(fan_in))
        params[f"w{idx}"] = jax.random.uniform(
            kw, (fan_in, fan_out), jnp.float32, minval=-bound, maxval=bound)
        params[f"b{idx}"] = jax.random.uniform(
            kb, (1, fan_out), jnp.float32, minval=-bound, maxval=bound)
    return params


def actor_forward_ref(x, params, action_scale, action_bias,
                      compute_dtype=jnp.float32):
    """Pure-JAX reference (mirrors the kernel's matmul-input dtype)."""
    cdt = jnp.dtype(compute_dtype)

    def lin(h, w, b):
        return jnp.dot(h.astype(cdt), w.astype(cdt),
                       preferred_element_type=jnp.float32) + b

    h = jax.nn.relu(lin(x, params["w1"], params["b1"]))
    h = jax.nn.relu(lin(h, params["w2"], params["b2"]))
    h = jax.nn.relu(lin(h, params["w3"], params["b3"]))
    h = jax.nn.relu(lin(h, params["w4"], params["b4"]))
    mu = jnp.tanh(lin(h, params["w5"], params["b5"]))
    return mu * action_scale + action_bias


if __name__ == "__main__":
    key = jax.random.PRNGKey(0)

    # Small synthetic env: obs_dim=16, act_dim=8, batch=8.
    B, obs_dim, act_dim = 8, 16, 8

    key, k_params, k_x, k_lo, k_span, k_x2 = jax.random.split(key, 6)
    params = init_actor_params(k_params, obs_dim, act_dim)

    # Synthetic action-space bounds -> scale / bias buffers.
    low = jax.random.uniform(k_lo, (1, act_dim), jnp.float32, minval=-2.0, maxval=0.0)
    high = low + jax.random.uniform(k_span, (1, act_dim), jnp.float32,
                                    minval=0.5, maxval=2.0)
    action_scale = (high - low) / 2.0
    action_bias = (high + low) / 2.0

    x = jax.random.normal(k_x, (B, obs_dim), jnp.float32)

    # Exact path: f32 weights must match the pure-JAX f32 reference tightly.
    prep_f32, ad = prepare_actor_params(params, action_scale, action_bias,
                                        weight_dtype=jnp.float32)
    out_f32 = jax.block_until_ready(actor_forward(x, prep_f32, act_dim=ad))
    ref_f32 = actor_forward_ref(x, params, action_scale, action_bias)
    assert out_f32.shape == (B, act_dim)
    assert jnp.allclose(out_f32, ref_f32, atol=1e-5, rtol=1e-5), \
        "f32 mismatch vs. JAX reference"

    # Fast path (default): bf16 weights/activations with f32 accumulation.
    prep_bf16, ad = prepare_actor_params(params, action_scale, action_bias)
    out_bf16 = jax.block_until_ready(actor_forward(x, prep_bf16, act_dim=ad))
    ref_bf16 = actor_forward_ref(x, params, action_scale, action_bias,
                                 compute_dtype=jnp.bfloat16)
    assert out_bf16.shape == (B, act_dim)
    assert jnp.allclose(out_bf16, ref_bf16, atol=5e-3, rtol=5e-3), \
        "bf16 mismatch vs. JAX reference"

    # Ragged multi-tile batch: exercises batch padding + a 2-step parallel grid.
    B2 = 200
    x2 = jax.random.normal(k_x2, (B2, obs_dim), jnp.float32)
    out2 = jax.block_until_ready(actor_forward(x2, prep_bf16, act_dim=ad))
    ref2 = actor_forward_ref(x2, params, action_scale, action_bias,
                             compute_dtype=jnp.bfloat16)
    assert out2.shape == (B2, act_dim)
    assert jnp.allclose(out2, ref2, atol=5e-3, rtol=5e-3), \
        "bf16 multi-tile mismatch vs. JAX reference"

    print("KERNEL_OK")
</pallas_src>

<mosaic_0001>
module attributes {stable_mosaic.version = 11 : i64} {
  func.func @_actor_kernel(%arg0: i32, %arg1: memref<16x16xf32, #tpu.memory_space<vmem>>, %arg2: memref<16x256xf32, #tpu.memory_space<vmem>>, %arg3: memref<1x256xf32, #tpu.memory_space<vmem>>, %arg4: memref<256x1024xf32, #tpu.memory_space<vmem>>, %arg5: memref<1x1024xf32, #tpu.memory_space<vmem>>, %arg6: memref<1024x1024xf32, #tpu.memory_space<vmem>>, %arg7: memref<1x1024xf32, #tpu.memory_space<vmem>>, %arg8: memref<1024x256xf32, #tpu.memory_space<vmem>>, %arg9: memref<1x256xf32, #tpu.memory_space<vmem>>, %arg10: memref<256x128xf32, #tpu.memory_space<vmem>>, %arg11: memref<1x128xf32, #tpu.memory_space<vmem>>, %arg12: memref<1x128xf32, #tpu.memory_space<vmem>>, %arg13: memref<1x128xf32, #tpu.memory_space<vmem>>, %arg14: memref<16x128xf32, #tpu.memory_space<vmem>>) attributes {dimension_semantics = [#tpu.dimension_semantics<parallel>], iteration_bounds = array<i64: 1>, scalar_prefetch = 0 : i64, scratch_operands = 0 : i64, tpu.core_type = #tpu.core_type<tc>, window_params = [{transform_indices = @transform_0, window_bounds = array<i64: 16, 16>}, {pipeline_mode = #tpu.pipeline_mode<synchronous>, transform_indices = @transform_1, window_bounds = array<i64: 16, 256>}, {pipeline_mode = #tpu.pipeline_mode<synchronous>, transform_indices = @transform_2, window_bounds = array<i64: 1, 256>}, {pipeline_mode = #tpu.pipeline_mode<synchronous>, transform_indices = @transform_3, window_bounds = array<i64: 256, 1024>}, {pipeline_mode = #tpu.pipeline_mode<synchronous>, transform_indices = @transform_4, window_bounds = array<i64: 1, 1024>}, {pipeline_mode = #tpu.pipeline_mode<synchronous>, transform_indices = @transform_5, window_bounds = array<i64: 1024, 1024>}, {pipeline_mode = #tpu.pipeline_mode<synchronous>, transform_indices = @transform_6, window_bounds = array<i64: 1, 1024>}, {pipeline_mode = #tpu.pipeline_mode<synchronous>, transform_indices = @transform_7, window_bounds = array<i64: 1024, 256>}, {pipeline_mode = #tpu.pipeline_mode<synchronous>, transform_indices = @transform_8, window_bounds = array<i64: 1, 256>}, {pipeline_mode = #tpu.pipeline_mode<synchronous>, transform_indices = @transform_9, window_bounds = array<i64: 256, 128>}, {pipeline_mode = #tpu.pipeline_mode<synchronous>, transform_indices = @transform_10, window_bounds = array<i64: 1, 128>}, {pipeline_mode = #tpu.pipeline_mode<synchronous>, transform_indices = @transform_11, window_bounds = array<i64: 1, 128>}, {pipeline_mode = #tpu.pipeline_mode<synchronous>, transform_indices = @transform_12, window_bounds = array<i64: 1, 128>}, {transform_indices = @transform_13, window_bounds = array<i64: 16, 128>}]} {
    %c0 = arith.constant 0 : index
    %c0_0 = arith.constant 0 : index
    %0 = vector.load %arg1[%c0, %c0_0] : memref<16x16xf32, #tpu.memory_space<vmem>>, vector<16x16xf32>
    %c0_1 = arith.constant 0 : index
    %c0_2 = arith.constant 0 : index
    %1 = vector.load %arg2[%c0_1, %c0_2] : memref<16x256xf32, #tpu.memory_space<vmem>>, vector<16x256xf32>
    %cst = arith.constant dense<0.000000e+00> : vector<16x256xf32>
    %2 = tpu.matmul %0, %1, %cst {dimension_numbers = #tpu.dot_dimension_numbers<[1], [0], [0], [1], [0, 0, 1, 1], [], []>} : vector<16x16xf32>, vector<16x256xf32>, vector<16x256xf32> -> vector<16x256xf32>
    %c0_3 = arith.constant 0 : index
    %c0_4 = arith.constant 0 : index
    %3 = vector.load %arg3[%c0_3, %c0_4] : memref<1x256xf32, #tpu.memory_space<vmem>>, vector<1x256xf32>
    %4 = vector.broadcast %3 : vector<1x256xf32> to vector<16x256xf32>
    %5 = arith.addf %2, %4 : vector<16x256xf32>
    %cst_5 = arith.constant 0.000000e+00 : f32
    %6 = vector.broadcast %cst_5 : f32 to vector<16x256xf32>
    %7 = arith.maximumf %5, %6 : vector<16x256xf32>
    %c0_6 = arith.constant 0 : index
    %c0_7 = arith.constant 0 : index
    %8 = vector.load %arg4[%c0_6, %c0_7] : memref<256x1024xf32, #tpu.memory_space<vmem>>, vector<256x1024xf32>
    %cst_8 = arith.constant dense<0.000000e+00> : vector<16x1024xf32>
    %9 = tpu.matmul %7, %8, %cst_8 {dimension_numbers = #tpu.dot_dimension_numbers<[1], [0], [0], [1], [0, 0, 1, 1], [], []>} : vector<16x256xf32>, vector<256x1024xf32>, vector<16x1024xf32> -> vector<16x1024xf32>
    %c0_9 = arith.constant 0 : index
    %c0_10 = arith.constant 0 : index
    %10 = vector.load %arg5[%c0_9, %c0_10] : memref<1x1024xf32, #tpu.memory_space<vmem>>, vector<1x1024xf32>
    %11 = vector.broadcast %10 : vector<1x1024xf32> to vector<16x1024xf32>
    %12 = arith.addf %9, %11 : vector<16x1024xf32>
    %cst_11 = arith.constant 0.000000e+00 : f32
    %13 = vector.broadcast %cst_11 : f32 to vector<16x1024xf32>
    %14 = arith.maximumf %12, %13 : vector<16x1024xf32>
    %c0_12 = arith.constant 0 : index
    %c0_13 = arith.constant 0 : index
    %15 = vector.load %arg6[%c0_12, %c0_13] : memref<1024x1024xf32, #tpu.memory_space<vmem>>, vector<1024x1024xf32>
    %cst_14 = arith.constant dense<0.000000e+00> : vector<16x1024xf32>
    %16 = tpu.matmul %14, %15, %cst_14 {dimension_numbers = #tpu.dot_dimension_numbers<[1], [0], [0], [1], [0, 0, 1, 1], [], []>} : vector<16x1024xf32>, vector<1024x1024xf32>, vector<16x1024xf32> -> vector<16x1024xf32>
    %c0_15 = arith.constant 0 : index
    %c0_16 = arith.constant 0 : index
    %17 = vector.load %arg7[%c0_15, %c0_16] : memref<1x1024xf32, #tpu.memory_space<vmem>>, vector<1x1024xf32>
    %18 = vector.broadcast %17 : vector<1x1024xf32> to vector<16x1024xf32>
    %19 = arith.addf %16, %18 : vector<16x1024xf32>
    %cst_17 = arith.constant 0.000000e+00 : f32
    %20 = vector.broadcast %cst_17 : f32 to vector<16x1024xf32>
    %21 = arith.maximumf %19, %20 : vector<16x1024xf32>
    %c0_18 = arith.constant 0 : index
    %c0_19 = arith.constant 0 : index
    %22 = vector.load %arg8[%c0_18, %c0_19] : memref<1024x256xf32, #tpu.memory_space<vmem>>, vector<1024x256xf32>
    %cst_20 = arith.constant dense<0.000000e+00> : vector<16x256xf32>
    %23 = tpu.matmul %21, %22, %cst_20 {dimension_numbers = #tpu.dot_dimension_numbers<[1], [0], [0], [1], [0, 0, 1, 1], [], []>} : vector<16x1024xf32>, vector<1024x256xf32>, vector<16x256xf32> -> vector<16x256xf32>
    %c0_21 = arith.constant 0 : index
    %c0_22 = arith.constant 0 : index
    %24 = vector.load %arg9[%c0_21, %c0_22] : memref<1x256xf32, #tpu.memory_space<vmem>>, vector<1x256xf32>
    %25 = vector.broadcast %24 : vector<1x256xf32> to vector<16x256xf32>
    %26 = arith.addf %23, %25 : vector<16x256xf32>
    %cst_23 = arith.constant 0.000000e+00 : f32
    %27 = vector.broadcast %cst_23 : f32 to vector<16x256xf32>
    %28 = arith.maximumf %26, %27 : vector<16x256xf32>
    %c0_24 = arith.constant 0 : index
    %c0_25 = arith.constant 0 : index
    %29 = vector.load %arg10[%c0_24, %c0_25] : memref<256x128xf32, #tpu.memory_space<vmem>>, vector<256x128xf32>
    %cst_26 = arith.constant dense<0.000000e+00> : vector<16x128xf32>
    %30 = tpu.matmul %28, %29, %cst_26 {dimension_numbers = #tpu.dot_dimension_numbers<[1], [0], [0], [1], [0, 0, 1, 1], [], []>} : vector<16x256xf32>, vector<256x128xf32>, vector<16x128xf32> -> vector<16x128xf32>
    %c0_27 = arith.constant 0 : index
    %c0_28 = arith.constant 0 : index
    %31 = vector.load %arg11[%c0_27, %c0_28] : memref<1x128xf32, #tpu.memory_space<vmem>>, vector<1x128xf32>
    %32 = vector.broadcast %31 : vector<1x128xf32> to vector<16x128xf32>
    %33 = arith.addf %30, %32 : vector<16x128xf32>
    %34 = math.tanh %33 : vector<16x128xf32>
    %c0_29 = arith.constant 0 : index
    %c0_30 = arith.constant 0 : index
    %35 = vector.load %arg12[%c0_29, %c0_30] : memref<1x128xf32, #tpu.memory_space<vmem>>, vector<1x128xf32>
    %36 = vector.broadcast %35 : vector<1x128xf32> to vector<16x128xf32>
    %37 = arith.mulf %34, %36 : vector<16x128xf32>
    %c0_31 = arith.constant 0 : index
    %c0_32 = arith.constant 0 : index
    %38 = vector.load %arg13[%c0_31, %c0_32] : memref<1x128xf32, #tpu.memory_space<vmem>>, vector<1x128xf32>
    %39 = vector.broadcast %38 : vector<1x128xf32> to vector<16x128xf32>
    %40 = arith.addf %37, %39 : vector<16x128xf32>
    %c0_33 = arith.constant 0 : index
    %c0_34 = arith.constant 0 : index
    %41 = vector.load %arg14[%c0_33, %c0_34] : memref<16x128xf32, #tpu.memory_space<vmem>>, vector<16x128xf32>
    tpu.vector_store %arg14[%c0_33, %c0_34], %40 {strides = array<i32>} : memref<16x128xf32, #tpu.memory_space<vmem>>, vector<16x128xf32>,
    return
  }
  func.func @transform_0(%arg0: i32) -> (i32, i32) {
    %c0_i32 = arith.constant 0 : i32
    %c0_i32_0 = arith.constant 0 : i32
    return %arg0, %c0_i32 : i32, i32
  }
  func.func @transform_1(%arg0: i32) -> (i32, i32) {
    %c0_i32 = arith.constant 0 : i32
    %c0_i32_0 = arith.constant 0 : i32
    %c0_i32_1 = arith.constant 0 : i32
    return %c0_i32, %c0_i32_0 : i32, i32
  }
  func.func @transform_2(%arg0: i32) -> (i32, i32) {
    %c0_i32 = arith.constant 0 : i32
    %c0_i32_0 = arith.constant 0 : i32
    %c0_i32_1 = arith.constant 0 : i32
    return %c0_i32, %c0_i32_0 : i32, i32
  }
  func.func @transform_3(%arg0: i32) -> (i32, i32) {
    %c0_i32 = arith.constant 0 : i32
    %c0_i32_0 = arith.constant 0 : i32
    %c0_i32_1 = arith.constant 0 : i32
    return %c0_i32, %c0_i32_0 : i32, i32
  }
  func.func @transform_4(%arg0: i32) -> (i32, i32) {
    %c0_i32 = arith.constant 0 : i32
    %c0_i32_0 = arith.constant 0 : i32
    %c0_i32_1 = arith.constant 0 : i32
    return %c0_i32, %c0_i32_0 : i32, i32
  }
  func.func @transform_5(%arg0: i32) -> (i32, i32) {
    %c0_i32 = arith.constant 0 : i32
    %c0_i32_0 = arith.constant 0 : i32
    %c0_i32_1 = arith.constant 0 : i32
    return %c0_i32, %c0_i32_0 : i32, i32
  }
  func.func @transform_6(%arg0: i32) -> (i32, i32) {
    %c0_i32 = arith.constant 0 : i32
    %c0_i32_0 = arith.constant 0 : i32
    %c0_i32_1 = arith.constant 0 : i32
    return %c0_i32, %c0_i32_0 : i32, i32
  }
  func.func @transform_7(%arg0: i32) -> (i32, i32) {
    %c0_i32 = arith.constant 0 : i32
    %c0_i32_0 = arith.constant 0 : i32
    %c0_i32_1 = arith.constant 0 : i32
    return %c0_i32, %c0_i32_0 : i32, i32
  }
  func.func @transform_8(%arg0: i32) -> (i32, i32) {
    %c0_i32 = arith.constant 0 : i32
    %c0_i32_0 = arith.constant 0 : i32
    %c0_i32_1 = arith.constant 0 : i32
    return %c0_i32, %c0_i32_0 : i32, i32
  }
  func.func @transform_9(%arg0: i32) -> (i32, i32) {
    %c0_i32 = arith.constant 0 : i32
    %c0_i32_0 = arith.constant 0 : i32
    %c0_i32_1 = arith.constant 0 : i32
    return %c0_i32, %c0_i32_0 : i32, i32
  }
  func.func @transform_10(%arg0: i32) -> (i32, i32) {
    %c0_i32 = arith.constant 0 : i32
    %c0_i32_0 = arith.constant 0 : i32
    %c0_i32_1 = arith.constant 0 : i32
    return %c0_i32, %c0_i32_0 : i32, i32
  }
  func.func @transform_11(%arg0: i32) -> (i32, i32) {
    %c0_i32 = arith.constant 0 : i32
    %c0_i32_0 = arith.constant 0 : i32
    %c0_i32_1 = arith.constant 0 : i32
    return %c0_i32, %c0_i32_0 : i32, i32
  }
  func.func @transform_12(%arg0: i32) -> (i32, i32) {
    %c0_i32 = arith.constant 0 : i32
    %c0_i32_0 = arith.constant 0 : i32
    %c0_i32_1 = arith.constant 0 : i32
    return %c0_i32, %c0_i32_0 : i32, i32
  }
  func.func @transform_13(%arg0: i32) -> (i32, i32) {
    %c0_i32 = arith.constant 0 : i32
    %c0_i32_0 = arith.constant 0 : i32
    return %arg0, %c0_i32 : i32, i32
  }
}

</mosaic_0001>

<bundles_post_ra>
// kernel: actor_forward.1
= control target key start
LH: loop header
LB: loop body
LE: loop exit
PB: predicated region body
PF: predicated region fallthrough
CT: control target
= control target key end

     0   :  { %18 = vsyncpa [#allocation3], 0  ;;  %s6446_s0 = inlined_call_operand.vmem [shape: f32[16,16], index: 0, kind: input, shape index: {}]   ;;  %s6447_s1 = inlined_call_operand.hbm [shape: f32[16,256], index: 1, kind: input, shape index: {}]   ;;  %s6448_s2 = inlined_call_operand.hbm [shape: f32[1,256], index: 2, kind: input, shape index: {}]   ;;  %s6449_s3 = inlined_call_operand.hbm [shape: f32[256,1024], index: 3, kind: input, shape index: {}]   ;;  %s6450_s4 = inlined_call_operand.hbm [shape: f32[1,1024], index: 4, kind: input, shape index: {}]   ;;  %s6451_s5 = inlined_call_operand.hbm [shape: f32[1024,1024], index: 5, kind: input, shape index: {}]   ;;  %s6452_s6 = inlined_call_operand.hbm [shape: f32[1,1024], index: 6, kind: input, shape index: {}]   ;;  %s6453_s7 = inlined_call_operand.hbm [shape: f32[1024,256], index: 7, kind: input, shape index: {}]   ;;  %s6454_s8 = inlined_call_operand.hbm [shape: f32[1,256], index: 8, kind: input, shape index: {}]   ;;  %s6455_s9 = inlined_call_operand.hbm [shape: f32[256,128], index: 9, kind: input, shape index: {}]   ;;  %s6456_s10 = inlined_call_operand.hbm [shape: f32[1,128], index: 10, kind: input, shape index: {}]   ;;  %s6457_s11 = inlined_call_operand.hbm [shape: f32[1,128], index: 11, kind: input, shape index: {}]   ;;  %s6458_s12 = inlined_call_operand.hbm [shape: f32[1,128], index: 12, kind: input, shape index: {}]   ;;  %s6459_s13 = inlined_call_operand.vmem [shape: f32[16,128], index: 13, kind: output, shape index: {}]  }
   0x1   :  { %19 = vsyncpa [#allocation5], 0 }
   0x2   :  { %20 = vsyncpa [#allocation8], 0 }
   0x3   :  { %21 = vsyncpa [#allocation11], 0 }
   0x4   :  { %22 = vsyncpa [#allocation14], 0 }
   0x5   :  { %23 = vsyncpa [#allocation17], 0 }
   0x6   :  { %24 = vsyncpa [#allocation20], 0  ;;  %s5960_s25 = smov [#allocation4]   ;;  %s5961_s27 = smov [#allocation7]  }
   0x7   :  { %s45_s26 = sshll.u32 %s5960_s25, 4  ;;  %s67_s28 = sshll.u32 %s5961_s27, 4  ;;  %s46_s26 = int_to_ptr.vmem [resolvable:$true] %s45_s26  ;;  %s68_s28 = int_to_ptr.vmem [resolvable:$true] %s67_s28 }
   0x8   :  { %s5682_s14 = scalar_lea.hbm %s6448_s2, 32 }
   0x9   :  { %p5683_p0 = scmp.ne.s32.totalorder %s6448_s2, %s5682_s14  ;;  %p5686_p1 = scmp.lt.u32.totalorder %s5682_s14, %s6448_s2 }
   0xb   :  { %p5688_p2 = pnand %p5686_p1, %p5683_p0 }
   0xd   :  { %5691 = shalt.err (!%p5688_p2)
}
   0xe   :  { %s5692_s19 = scalar_lea.vmem %s46_s26, 32  ;;  %p5697_p4 = scmp.lt.s32.totalorder %s46_s26, %s46_s26 }
   0xf   :  { %p5693_p3 = scmp.ne.s32.totalorder %s46_s26, %s5692_s19  ;;  %p5698_p5 = scmp.lt.s32.totalorder %s5692_s19, %s5692_s19 }
  0x11   :  { %p5699_p6 = por %p5698_p5, %p5697_p4 }
  0x13   :  { %p5700_p7 = pnand %p5699_p6, %p5693_p3 }
  0x15   :  { %5703 = shalt.err (!%p5700_p7)
}
  0x16   :  { %48 = dma.hbm_to_vmem [thread:$0]  %s6448_s2, 32, %s46_s26, [#allocation5]  }
  0x17   :  { %s5704_s24 = scalar_lea.hbm %s6450_s4, 128 }
  0x18   :  { %p5705_p8 = scmp.ne.s32.totalorder %s6450_s4, %s5704_s24  ;;  %p5708_p9 = scmp.lt.u32.totalorder %s5704_s24, %s6450_s4 }
  0x1a   :  { %p5710_p10 = pnand %p5708_p9, %p5705_p8 }
  0x1c   :  { %5713 = shalt.err (!%p5710_p10)
}
  0x1d   :  { %s5714_s14 = scalar_lea.vmem %s68_s28, 128  ;;  %p5719_p12 = scmp.lt.s32.totalorder %s68_s28, %s68_s28 }
  0x1e   :  { %p5715_p11 = scmp.ne.s32.totalorder %s68_s28, %s5714_s14  ;;  %p5720_p13 = scmp.lt.s32.totalorder %s5714_s14, %s5714_s14 }
  0x20   :  { %p5721_p0 = por %p5720_p13, %p5719_p12 }
  0x22   :  { %p5722_p1 = pnand %p5721_p0, %p5715_p11 }
  0x24   :  { %5725 = shalt.err (!%p5722_p1)
}
  0x25   :  { %70 = dma.hbm_to_vmem [thread:$0]  %s6450_s4, 128, %s68_s28, [#allocation8]  }
  0x26   :  { %s5962_s15 = smov [#allocation10]   ;;  %s5963_s17 = smov [#allocation13]  }
  0x27   :  { %s89_s16 = sshll.u32 %s5962_s15, 4  ;;  %s111_s18 = sshll.u32 %s5963_s17, 4  ;;  %s90_s16 = int_to_ptr.vmem [resolvable:$true] %s89_s16  ;;  %s112_s18 = int_to_ptr.vmem [resolvable:$true] %s111_s18 }
  0x28   :  { %s5726_s21 = scalar_lea.hbm %s6452_s6, 128 }
  0x29   :  { %p5727_p2 = scmp.ne.s32.totalorder %s6452_s6, %s5726_s21  ;;  %p5730_p3 = scmp.lt.u32.totalorder %s5726_s21, %s6452_s6 }
  0x2b   :  { %p5732_p4 = pnand %p5730_p3, %p5727_p2 }
  0x2d   :  { %5735 = shalt.err (!%p5732_p4)
}
  0x2e   :  { %s5736_s4 = scalar_lea.vmem %s90_s16, 128  ;;  %p5741_p6 = scmp.lt.s32.totalorder %s90_s16, %s90_s16 }
  0x2f   :  { %p5737_p5 = scmp.ne.s32.totalorder %s90_s16, %s5736_s4  ;;  %p5742_p7 = scmp.lt.s32.totalorder %s5736_s4, %s5736_s4 }
  0x31   :  { %p5743_p8 = por %p5742_p7, %p5741_p6 }
  0x33   :  { %p5744_p9 = pnand %p5743_p8, %p5737_p5 }
  0x35   :  { %5747 = shalt.err (!%p5744_p9)
}
  0x36   :  { %92 = dma.hbm_to_vmem [thread:$0]  %s6452_s6, 128, %s90_s16, [#allocation11]  }
  0x37   :  { %s5748_s14 = scalar_lea.hbm %s6454_s8, 32 }
  0x38   :  { %p5749_p10 = scmp.ne.s32.totalorder %s6454_s8, %s5748_s14  ;;  %p5752_p11 = scmp.lt.u32.totalorder %s5748_s14, %s6454_s8 }
  0x3a   :  { %p5754_p12 = pnand %p5752_p11, %p5749_p10 }
  0x3c   :  { %5757 = shalt.err (!%p5754_p12)
}
  0x3d   :  { %s5758_s19 = scalar_lea.vmem %s112_s18, 32  ;;  %p5763_p0 = scmp.lt.s32.totalorder %s112_s18, %s112_s18 }
  0x3e   :  { %p5759_p13 = scmp.ne.s32.totalorder %s112_s18, %s5758_s19  ;;  %p5764_p1 = scmp.lt.s32.totalorder %s5758_s19, %s5758_s19 }
  0x40   :  { %p5765_p2 = por %p5764_p1, %p5763_p0 }
  0x42   :  { %p5766_p3 = pnand %p5765_p2, %p5759_p13 }
  0x44   :  { %5769 = shalt.err (!%p5766_p3)
}
  0x45   :  { %114 = dma.hbm_to_vmem [thread:$0]  %s6454_s8, 32, %s112_s18, [#allocation14]  }
  0x46   :  { %s5964_s20 = smov [#allocation16]   ;;  %s5965_s22 = smov [#allocation2]  }
  0x47   :  { %s133_s21 = sshll.u32 %s5964_s20, 4  ;;  %s32_s23 = sshll.u32 %s5965_s22, 4  ;;  %s134_s21 = int_to_ptr.vmem [resolvable:$true] %s133_s21  ;;  %s6097_s23 = int_to_ptr.vmem [resolvable:$true] %s32_s23 }
  0x48   :  { %s5770_s4 = scalar_lea.hbm %s6456_s10, 16 }
  0x49   :  { %p5771_p4 = scmp.ne.s32.totalorder %s6456_s10, %s5770_s4  ;;  %p5774_p5 = scmp.lt.u32.totalorder %s5770_s4, %s6456_s10 }
  0x4b   :  { %p5776_p6 = pnand %p5774_p5, %p5771_p4 }
  0x4d   :  { %5779 = shalt.err (!%p5776_p6)
}
  0x4e   :  { %s5780_s8 = scalar_lea.vmem %s134_s21, 16  ;;  %s5784_s18 = scalar_lea.vmem %s134_s21, 32 }
  0x4f   :  { %p5781_p7 = scmp.ne.s32.totalorder %s134_s21, %s5780_s8  ;;  %p5785_p8 = scmp.lt.s32.totalorder %s134_s21, %s134_s21 }
  0x50   :  { %p5786_p9 = scmp.lt.s32.totalorder %s5784_s18, %s5780_s8 }
  0x52   :  { %p5787_p10 = por %p5786_p9, %p5785_p8 }
  0x54   :  { %p5788_p11 = pnand %p5787_p10, %p5781_p7 }
  0x56   :  { %5791 = shalt.err (!%p5788_p11)
}
  0x57   :  { %136 = dma.hbm_to_vmem [thread:$0]  %s6456_s10, 16, %s134_s21, [#allocation17]  }
  0x58   :  { %s5792_s17 = scalar_lea.hbm %s6447_s1, 512 }
  0x59   :  { %p5793_p12 = scmp.ne.s32.totalorder %s6447_s1, %s5792_s17  ;;  %p5796_p13 = scmp.lt.u32.totalorder %s5792_s17, %s6447_s1 }
  0x5b   :  { %p5798_p0 = pnand %p5796_p13, %p5793_p12 }
  0x5d   :  { %5801 = shalt.err (!%p5798_p0)
}
  0x5e   :  { %s5802_s22 = scalar_lea.vmem %s6097_s23, 512  ;;  %p5807_p2 = scmp.lt.s32.totalorder %s6097_s23, %s6097_s23 }
  0x5f   :  { %p5803_p1 = scmp.ne.s32.totalorder %s6097_s23, %s5802_s22  ;;  %p5808_p3 = scmp.lt.s32.totalorder %s5802_s22, %s5802_s22 }
  0x61   :  { %p5809_p4 = por %p5808_p3, %p5807_p2 }
  0x63   :  { %p5810_p5 = pnand %p5809_p4, %p5803_p1 }
  0x65   :  { %5813 = shalt.err (!%p5810_p5)
}
  0x66   :  { %s5966_s10 = smov 256   ;;  %s5967_s21 = smov 16  }
  0x67   :  { %38 = dma.hbm_to_vmem [thread:$0]  %s6447_s1, 512, %s6097_s23, [#allocation3], %s5966_s10, %s5966_s10, %s5967_s21  }
  0x68   :  { %s5968_s4 = smov [#allocation6]   ;;  %s5814_s30 = scalar_lea.hbm %s6449_s3, 32768 }
  0x69   :  { %s54_s28 = sshll.u32 %s5968_s4, 4  ;;  %p5815_p6 = scmp.ne.s32.totalorder %s6449_s3, %s5814_s30  ;;  %s55_s28 = int_to_ptr.vmem [resolvable:$true] %s54_s28 }
  0x6a   :  { %p5818_p7 = scmp.lt.u32.totalorder %s5814_s30, %s6449_s3 }
  0x6c   :  { %p5820_p8 = pnand %p5818_p7, %p5815_p6 }
  0x6e   :  { %5823 = shalt.err (!%p5820_p8)
}
  0x6f   :  { %s5824_s26 = scalar_lea.vmem %s55_s28, 32768  ;;  %p5829_p10 = scmp.lt.s32.totalorder %s55_s28, %s55_s28 }
  0x70   :  { %p5825_p9 = scmp.ne.s32.totalorder %s55_s28, %s5824_s26  ;;  %p5830_p11 = scmp.lt.s32.totalorder %s5824_s26, %s5824_s26 }
  0x72   :  { %p5831_p12 = por %p5830_p11, %p5829_p10 }
  0x74   :  { %p5832_p13 = pnand %p5831_p12, %p5825_p9 }
  0x76   :  { %5835 = shalt.err (!%p5832_p13)
}
  0x77   :  { %s5969_s1 = smov 1024   ;;  %s5970_s23 = smov 64  }
  0x78   :  { %60 = dma.hbm_to_vmem [thread:$0]  %s6449_s3, 32768, %s55_s28, [#allocation5], %s5969_s1, %s5969_s1, %s5970_s23  }
  0x79   :  { %s5971_s19 = smov [#allocation9]   ;;  %s5972_s16 = smov [#allocation12]  }
  0x7a   :  { %s76_s6 = sshll.u32 %s5971_s19, 4  ;;  %s98_s20 = sshll.u32 %s5972_s16, 4  ;;  %s77_s6 = int_to_ptr.vmem [resolvable:$true] %s76_s6  ;;  %s99_s20 = int_to_ptr.vmem [resolvable:$true] %s98_s20 }
  0x7b   :  { %s5836_s25 = scalar_lea.hbm %s6451_s5, 131072 }
  0x7c   :  { %p5837_p0 = scmp.ne.s32.totalorder %s6451_s5, %s5836_s25  ;;  %p5840_p1 = scmp.lt.u32.totalorder %s5836_s25, %s6451_s5 }
  0x7e   :  { %p5842_p2 = pnand %p5840_p1, %p5837_p0 }
  0x80   :  { %5845 = shalt.err (!%p5842_p2)
}
  0x81   :  { %s5846_s3 = scalar_lea.vmem %s77_s6, 131072  ;;  %p5851_p4 = scmp.lt.s32.totalorder %s77_s6, %s77_s6 }
  0x82   :  { %p5847_p3 = scmp.ne.s32.totalorder %s77_s6, %s5846_s3  ;;  %p5852_p5 = scmp.lt.s32.totalorder %s5846_s3, %s5846_s3 }
  0x84   :  { %p5853_p6 = por %p5852_p5, %p5851_p4 }
  0x86   :  { %p5854_p7 = pnand %p5853_p6, %p5847_p3 }
  0x88   :  { %5857 = shalt.err (!%p5854_p7)
}
  0x89   :  { %82 = dma.hbm_to_vmem [thread:$0]  %s6451_s5, 131072, %s77_s6, [#allocation8], %s5969_s1, %s5969_s1, %s5970_s23  }
  0x8a   :  { %s5858_s2 = scalar_lea.hbm %s6453_s7, 32768 }
  0x8b   :  { %p5859_p8 = scmp.ne.s32.totalorder %s6453_s7, %s5858_s2  ;;  %p5862_p9 = scmp.lt.u32.totalorder %s5858_s2, %s6453_s7 }
  0x8d   :  { %p5864_p10 = pnand %p5862_p9, %p5859_p8 }
  0x8f   :  { %5867 = shalt.err (!%p5864_p10)
}
  0x90   :  { %s5868_s16 = scalar_lea.vmem %s99_s20, 32768  ;;  %p5873_p12 = scmp.lt.s32.totalorder %s99_s20, %s99_s20 }
  0x91   :  { %p5869_p11 = scmp.ne.s32.totalorder %s99_s20, %s5868_s16  ;;  %p5874_p13 = scmp.lt.s32.totalorder %s5868_s16, %s5868_s16 }
  0x93   :  { %p5875_p0 = por %p5874_p13, %p5873_p12 }
  0x95   :  { %p5876_p1 = pnand %p5875_p0, %p5869_p11 }
  0x97   :  { %5879 = shalt.err (!%p5876_p1)
}
  0x98   :  { %104 = dma.hbm_to_vmem [thread:$0]  %s6453_s7, 32768, %s99_s20, [#allocation11], %s5966_s10, %s5966_s10, %s5967_s21  }
  0x99   :  { %s5973_s23 = smov [#allocation15]   ;;  %s5880_s25 = scalar_lea.hbm %s6455_s9, 4096 }
  0x9a   :  { %s120_s6 = sshll.u32 %s5973_s23, 4  ;;  %p5881_p2 = scmp.ne.s32.totalorder %s6455_s9, %s5880_s25  ;;  %s121_s6 = int_to_ptr.vmem [resolvable:$true] %s120_s6 }
  0x9b   :  { %p5884_p3 = scmp.lt.u32.totalorder %s5880_s25, %s6455_s9 }
  0x9d   :  { %p5886_p4 = pnand %p5884_p3, %p5881_p2 }
  0x9f   :  { %5889 = shalt.err (!%p5886_p4)
}
  0xa0   :  { %s5890_s3 = scalar_lea.vmem %s121_s6, 4096  ;;  %p5895_p6 = scmp.lt.s32.totalorder %s121_s6, %s121_s6 }
  0xa1   :  { %p5891_p5 = scmp.ne.s32.totalorder %s121_s6, %s5890_s3  ;;  %p5896_p7 = scmp.lt.s32.totalorder %s5890_s3, %s5890_s3 }
  0xa3   :  { %p5897_p8 = por %p5896_p7, %p5895_p6 }
  0xa5   :  { %p5898_p9 = pnand %p5897_p8, %p5891_p5 }
  0xa7   :  { %5901 = shalt.err (!%p5898_p9)
}
  0xa8   :  { %s5974_s7 = smov 128   ;;  %s5975_s10 = smov 8  }
  0xa9   :  { %126 = dma.hbm_to_vmem [thread:$0]  %s6455_s9, 4096, %s121_s6, [#allocation14], %s5974_s7, %s5974_s7, %s5975_s10  }
  0xaa   :  { %s5976_s28 = smov [#allocation18]   ;;  %s5977_s18 = smov [#allocation19]  }
  0xab   :  { %s143_s8 = sshll.u32 %s5976_s28, 4  ;;  %s153_s14 = sshll.u32 %s5977_s18, 4  ;;  %s144_s8 = int_to_ptr.vmem [resolvable:$true] %s143_s8  ;;  %s154_s14 = int_to_ptr.vmem [resolvable:$true] %s153_s14 }
  0xac   :  { %s5902_s15 = scalar_lea.hbm %s6457_s11, 16 }
  0xad   :  { %p5903_p10 = scmp.ne.s32.totalorder %s6457_s11, %s5902_s15  ;;  %p5906_p11 = scmp.lt.u32.totalorder %s5902_s15, %s6457_s11 }
  0xaf   :  { %p5908_p12 = pnand %p5906_p11, %p5903_p10 }
  0xb1   :  { %5911 = shalt.err (!%p5908_p12)
}
  0xb2   :  { %s5912_s9 = scalar_lea.vmem %s144_s8, 16  ;;  %s5916_s1 = scalar_lea.vmem %s144_s8, 32 }
  0xb3   :  { %p5913_p13 = scmp.ne.s32.totalorder %s144_s8, %s5912_s9  ;;  %p5917_p0 = scmp.lt.s32.totalorder %s144_s8, %s144_s8 }
  0xb4   :  { %p5918_p1 = scmp.lt.s32.totalorder %s5916_s1, %s5912_s9 }
  0xb6   :  { %p5919_p2 = por %p5918_p1, %p5917_p0 }
  0xb8   :  { %p5920_p3 = pnand %p5919_p2, %p5913_p13 }
  0xba   :  { %5923 = shalt.err (!%p5920_p3)
}
  0xbb   :  { %146 = dma.hbm_to_vmem [thread:$0]  %s6457_s11, 16, %s144_s8, [#allocation17]  }
  0xbc   :  { %s5924_s25 = scalar_lea.hbm %s6458_s12, 16 }
  0xbd   :  { %p5925_p4 = scmp.ne.s32.totalorder %s6458_s12, %s5924_s25  ;;  %p5928_p5 = scmp.lt.u32.totalorder %s5924_s25, %s6458_s12 }
  0xbf   :  { %p5930_p6 = pnand %p5928_p5, %p5925_p4 }
  0xc1   :  { %5933 = shalt.err (!%p5930_p6)
}
  0xc2   :  { %s5934_s3 = scalar_lea.vmem %s154_s14, 16  ;;  %s5938_s7 = scalar_lea.vmem %s154_s14, 32 }
  0xc3   :  { %p5935_p7 = scmp.ne.s32.totalorder %s154_s14, %s5934_s3  ;;  %p5939_p8 = scmp.lt.s32.totalorder %s154_s14, %s154_s14 }
  0xc4   :  { %p5940_p9 = scmp.lt.s32.totalorder %s5938_s7, %s5934_s3 }
  0xc6   :  { %p5941_p10 = por %p5940_p9, %p5939_p8 }
  0xc8   :  { %p5942_p11 = pnand %p5941_p10, %p5935_p7 }
  0xca   :  { %5945 = shalt.err (!%p5942_p11)
}
  0xcb   :  { %156 = dma.hbm_to_vmem [thread:$0]  %s6458_s12, 16, %s154_s14, [#allocation20]  }
  0xcc   :  { %5946 = dma.done.wait [#allocation3], 512  }
  0xcd   :  { %5947 = vsyncadd [#allocation3], 4294966784 }
  0xce   :  { %5948 = dma.done.wait [#allocation5], 32800  }
  0xcf   :  { %5949 = vsyncadd [#allocation5], 4294934496 }
  0xd0   :  { %5950 = dma.done.wait [#allocation8], 131200  }
  0xd1   :  { %5951 = vsyncadd [#allocation8], 4294836096 }
  0xd2   :  { %5952 = dma.done.wait [#allocation11], 32896  }
  0xd3   :  { %5953 = vsyncadd [#allocation11], 4294934400 }
  0xd4   :  { %5954 = dma.done.wait [#allocation14], 4128  }
  0xd5   :  { %5955 = vsyncadd [#allocation14], 4294963168 }
  0xd6   :  { %5956 = dma.done.wait [#allocation17], 32  }
  0xd7   :  { %5957 = vsyncadd [#allocation17], 4294967264 }
  0xd8   :  { %5958 = dma.done.wait [#allocation20], 16  }
  0xd9   :  { %5959 = vsyncadd [#allocation20], 4294967280  ;;  %v5978_v0 = vmov 0.0   ;;  %v196_v1 = vld [vmem:[#allocation2 + $0x8] sm:$0xff]  ;;  %v198_v2 = vld [vmem:[#allocation2 + $0x18] sm:$0xff]  ;;  %vm211_vm0 = vcmask 130048  }
  0xda   :  { %282 = vmatprep.mubr.f32.mxu1 %v5978_v0  ;;  %v195_v3 = vld [vmem:[#allocation2] sm:$0xff]  ;;  %v4005_v4 = vpack.c.bf16 %v198_v2, %v196_v1  ;;  %v197_v5 = vld [vmem:[#allocation2 + $0x10] sm:$0xff]  ;;  %v194_v25 = vld [vmem:[%s6446_s0 + $0x8] sm:$0xff] }
  0xdb   :  { %v4007_v6 = vpack.c.bf16 %v197_v5, %v195_v3  ;;  %v193_v7 = vld [vmem:[%s6446_s0] sm:$0xff]  ;;  %v300_v8 = vld [vmem:[#allocation6 + $0x8] sm:$0xff] }
  0xdc   :  { %v308_v9 = vld [vmem:[#allocation6 + $0x48] sm:$0xff]  ;;  %v299_v10 = vld [vmem:[#allocation6] sm:$0xff]  ;;  %4006 = vmatprep.subr.bf16.mxu1 %v4005_v4 }
  0xdd   :  { %v4009_v11 = vpack.c.bf16 %v308_v9, %v300_v8  ;;  %v307_v12 = vld [vmem:[#allocation6 + $0x40] sm:$0xff]  ;;  %v316_v13 = vld [vmem:[#allocation6 + $0x88] sm:$0xff]  ;;  %4008 = vmatpush1.bf16.msra.mxu1 %v4007_v6 }
  0xde   :  { %v324_v14 = vld [vmem:[#allocation6 + $0xc8] sm:$0xff]  ;;  %v4011_v15 = vpack.c.bf16 %v307_v12, %v299_v10  ;;  %v315_v17 = vld [vmem:[#allocation6 + $0x80] sm:$0xff] }
  0xdf   :  { %v4013_v16 = vpack.c.bf16 %v324_v14, %v316_v13  ;;  %v323_v18 = vld [vmem:[#allocation6 + $0xc0] sm:$0xff]  ;;  %v332_v19 = vld [vmem:[#allocation6 + $0x108] sm:$0xff]  ;;  %4010 = vmatprep.subr.bf16.mxu0 %v4009_v11 }
  0xe0   :  { %v340_v20 = vld [vmem:[#allocation6 + $0x148] sm:$0xff]  ;;  %4012 = vmatpush1.bf16.msra.mxu0 %v4011_v15  ;;  %v4015_v21 = vpack.c.bf16 %v323_v18, %v315_v17  ;;  %3962 = vmatmul.mubr.msk.f32.vlgmr.msra.gmra.mrb[0].mxu1 %vm211_vm0, %v193_v7  ;;  %v331_v23 = vld [vmem:[#allocation6 + $0x100] sm:$0xff] }
  0xe1   :  { %4014 = vmatprep.subr.bf16.mxu0 %v4013_v16  ;;  %v4017_v22 = vpack.c.bf16 %v340_v20, %v332_v19  ;;  %v339_v24 = vld [vmem:[#allocation6 + $0x140] sm:$0xff]  ;;  %288 = vmatprep.mubr.f32.mxu1 %v5978_v0  ;;  %v348_v26 = vld [vmem:[#allocation6 + $0x188] sm:$0xff] }
  0xe2   :  { %v356_v27 = vld [vmem:[#allocation6 + $0x1c8] sm:$0xff]  ;;  %v4019_v28 = vpack.c.bf16 %v339_v24, %v331_v23  ;;  %v347_v30 = vld [vmem:[#allocation6 + $0x180] sm:$0xff] }
  0xe3   :  { %v4021_v29 = vpack.c.bf16 %v356_v27, %v348_v26  ;;  %v355_v31 = vld [vmem:[#allocation6 + $0x1c0] sm:$0xff]  ;;  %v364_v32 = vld [vmem:[#allocation6 + $0x208] sm:$0xff] }
  0xe4   :  { %4016 = vmatpush1.bf16.msra.mxu0 %v4015_v21  ;;  %3963 = vmatmul.mubr.msk.f32.gmra.mrb[2].mxu1 %vm211_vm0, %v194_v25  ;;  %v372_v33 = vld [vmem:[#allocation6 + $0x248] sm:$0xff]  ;;  %v4023_v34 = vpack.c.bf16 %v355_v31, %v347_v30  ;;  %v363_v36 = vld [vmem:[#allocation6 + $0x200] sm:$0xff] }
  0xe5   :  { %4018 = vmatprep.subr.bf16.mxu0 %v4017_v22  ;;  %v4025_v35 = vpack.c.bf16 %v372_v33, %v364_v32  ;;  %v371_v37 = vld [vmem:[#allocation6 + $0x240] sm:$0xff]  ;;  %v380_v38 = vld [vmem:[#allocation6 + $0x288] sm:$0xff] }
  0xe6   :  { %v388_v39 = vld [vmem:[#allocation6 + $0x2c8] sm:$0xff]  ;;  %v4027_v40 = vpack.c.bf16 %v371_v37, %v363_v36  ;;  %v379_v42 = vld [vmem:[#allocation6 + $0x280] sm:$0xff] }
  0xe7   :  { %v4029_v41 = vpack.c.bf16 %v388_v39, %v380_v38  ;;  %v387_v43 = vld [vmem:[#allocation6 + $0x2c0] sm:$0xff]  ;;  %v396_v44 = vld [vmem:[#allocation6 + $0x308] sm:$0xff] }
  0xe8   :  { %4020 = vmatpush1.bf16.msra.mxu0 %v4019_v28  ;;  %v404_v45 = vld [vmem:[#allocation6 + $0x348] sm:$0xff]  ;;  %v4031_v46 = vpack.c.bf16 %v387_v43, %v379_v42  ;;  %v395_v48 = vld [vmem:[#allocation6 + $0x300] sm:$0xff]  ;;  %v310_v42 = vld [vmem:[#allocation6 + $0x58] sm:$0xff] }
  0xe9   :  { %4022 = vmatprep.subr.bf16.mxu0 %v4021_v29  ;;  %v4033_v47 = vpack.c.bf16 %v404_v45, %v396_v44  ;;  %v403_v49 = vld [vmem:[#allocation6 + $0x340] sm:$0xff]  ;;  %v412_v50 = vld [vmem:[#allocation6 + $0x388] sm:$0xff]  ;;  %v201_v44 = vlaneseq }
  0xea   :  { %v420_v51 = vld [vmem:[#allocation6 + $0x3c8] sm:$0xff]  ;;  %v4035_v52 = vpack.c.bf16 %v403_v49, %v395_v48  ;;  %v411_v54 = vld [vmem:[#allocation6 + $0x380] sm:$0xff] }
  0xeb   :  { %v4037_v53 = vpack.c.bf16 %v420_v51, %v412_v50  ;;  %v419_v55 = vld [vmem:[#allocation6 + $0x3c0] sm:$0xff]  ;;  %v428_v56 = vld [vmem:[#allocation6 + $0x408] sm:$0xff]  ;;  %v6214_v45 = vshrl.u32 %v201_v44, 7  ;;  %v438_v44 = vld [vmem:[#allocation6 + $0x458] sm:$0xff] }
  0xec   :  { %4024 = vmatpush1.bf16.msra.mxu0 %v4023_v34  ;;  %v436_v57 = vld [vmem:[#allocation6 + $0x448] sm:$0xff]  ;;  %v4039_v58 = vpack.c.bf16 %v419_v55, %v411_v54  ;;  %v427_v60 = vld [vmem:[#allocation6 + $0x400] sm:$0xff]  ;;  %v301_v54 = vld [vmem:[#allocation6 + $0x10] sm:$0xff] }
  0xed   :  { %4026 = vmatprep.subr.bf16.mxu0 %v4025_v35  ;;  %v4041_v59 = vpack.c.bf16 %v436_v57, %v428_v56  ;;  %v435_v61 = vld [vmem:[#allocation6 + $0x440] sm:$0xff]  ;;  %v444_v62 = vld [vmem:[#allocation6 + $0x488] sm:$0xff]  ;;  %v6220_v48 = vsub.s32 1, %v6214_v45  ;;  %v309_v55 = vld [vmem:[#allocation6 + $0x50] sm:$0xff] }
  0xee   :  { %v452_v63 = vld [vmem:[#allocation6 + $0x4c8] sm:$0xff]  ;;  %v4043_v0 = vpack.c.bf16 %v435_v61, %v427_v60  ;;  %v443_v2 = vld [vmem:[#allocation6 + $0x480] sm:$0xff]  ;;  %v318_v57 = vld [vmem:[#allocation6 + $0x98] sm:$0xff]  ;;  %v4075_v61 = vpack.c.bf16 %v309_v55, %v301_v54 }
  0xef   :  { %v4045_v1 = vpack.c.bf16 %v452_v63, %v444_v62  ;;  %v451_v3 = vld [vmem:[#allocation6 + $0x4c0] sm:$0xff]  ;;  %v460_v4 = vld [vmem:[#allocation6 + $0x508] sm:$0xff] }
  0xf0   :  { %4028 = vmatpush1.bf16.msra.mxu0 %v4027_v40  ;;  %v468_v5 = vld [vmem:[#allocation6 + $0x548] sm:$0xff]  ;;  %v4047_v6 = vpack.c.bf16 %v451_v3, %v443_v2  ;;  %v459_v8 = vld [vmem:[#allocation6 + $0x500] sm:$0xff]  ;;  %v317_v2 = vld [vmem:[#allocation6 + $0x90] sm:$0xff] }
  0xf1   :  { %4030 = vmatprep.subr.bf16.mxu0 %v4029_v41  ;;  %v4049_v7 = vpack.c.bf16 %v468_v5, %v460_v4  ;;  %v467_v9 = vld [vmem:[#allocation6 + $0x540] sm:$0xff]  ;;  %v476_v10 = vld [vmem:[#allocation6 + $0x588] sm:$0xff]  ;;  %v302_v41 = vld [vmem:[#allocation6 + $0x18] sm:$0xff] }
  0xf2   :  { %v484_v11 = vld [vmem:[#allocation6 + $0x5c8] sm:$0xff]  ;;  %v4051_v12 = vpack.c.bf16 %v467_v9, %v459_v8  ;;  %v475_v14 = vld [vmem:[#allocation6 + $0x580] sm:$0xff]  ;;  %v4073_v43 = vpack.c.bf16 %v310_v42, %v302_v41  ;;  %v325_v3 = vld [vmem:[#allocation6 + $0xd0] sm:$0xff] }
  0xf3   :  { %v4053_v13 = vpack.c.bf16 %v484_v11, %v476_v10  ;;  %v483_v15 = vld [vmem:[#allocation6 + $0x5c0] sm:$0xff]  ;;  %v492_v16 = vld [vmem:[#allocation6 + $0x608] sm:$0xff]  ;;  %v334_v5 = vld [vmem:[#allocation6 + $0x118] sm:$0xff]  ;;  %v4079_v9 = vpack.c.bf16 %v325_v3, %v317_v2 }
  0xf4   :  { %4032 = vmatpush1.bf16.msra.mxu0 %v4031_v46  ;;  %v500_v17 = vld [vmem:[#allocation6 + $0x648] sm:$0xff]  ;;  %v4055_v18 = vpack.c.bf16 %v483_v15, %v475_v14  ;;  %v491_v20 = vld [vmem:[#allocation6 + $0x600] sm:$0xff]  ;;  %v6217_v46 = vsub.s32 0, %v6214_v45  ;;  %v333_v11 = vld [vmem:[#allocation6 + $0x110] sm:$0xff] }
  0xf5   :  { %4034 = vmatprep.subr.bf16.mxu0 %v4033_v47  ;;  %v4057_v19 = vpack.c.bf16 %v500_v17, %v492_v16  ;;  %v499_v21 = vld [vmem:[#allocation6 + $0x640] sm:$0xff]  ;;  %v508_v22 = vld [vmem:[#allocation6 + $0x688] sm:$0xff]  ;;  %v199_v47 = vld [vmem:[#allocation4] sm:$0x3] }
  0xf6   :  { %v516_v23 = vld [vmem:[#allocation6 + $0x6c8] sm:$0xff]  ;;  %v4059_v24 = vpack.c.bf16 %v499_v21, %v491_v20  ;;  %v507_v26 = vld [vmem:[#allocation6 + $0x680] sm:$0xff]  ;;  %v204_v49 = vrot.slane %v199_v47, %v6217_v46  ;;  %v208_v50 = vrot.slane %v199_v47, %v6220_v48  ;;  %v358_v14 = vld [vmem:[#allocation6 + $0x1d8] sm:$0xff] }
  0xf7   :  { %v4061_v25 = vpack.c.bf16 %v516_v23, %v508_v22  ;;  %v515_v27 = vld [vmem:[#allocation6 + $0x6c0] sm:$0xff]  ;;  %v524_v28 = vld [vmem:[#allocation6 + $0x708] sm:$0xff]  ;;  %v349_v17 = vld [vmem:[#allocation6 + $0x190] sm:$0xff] }
  0xf8   :  { %4036 = vmatpush1.bf16.msra.mxu0 %v4035_v52  ;;  %v532_v29 = vld [vmem:[#allocation6 + $0x748] sm:$0xff]  ;;  %v4063_v30 = vpack.c.bf16 %v515_v27, %v507_v26  ;;  %v523_v32 = vld [vmem:[#allocation6 + $0x700] sm:$0xff]  ;;  %v374_v20 = vld [vmem:[#allocation6 + $0x258] sm:$0xff] }
  0xf9   :  { %4038 = vmatprep.subr.bf16.mxu0 %v4037_v53  ;;  %v4065_v31 = vpack.c.bf16 %v532_v29, %v524_v28  ;;  %v531_v33 = vld [vmem:[#allocation6 + $0x740] sm:$0xff]  ;;  %v540_v35 = vld [vmem:[#allocation6 + $0x788] sm:$0xff]  ;;  %v365_v23 = vld [vmem:[#allocation6 + $0x210] sm:$0xff] }
  0xfa   :  { %v4067_v34 = vpack.c.bf16 %v531_v33, %v523_v32  ;;  %v548_v36 = vld [vmem:[#allocation6 + $0x7c8] sm:$0xff]  ;;  %v539_v38 = vld [vmem:[#allocation6 + $0x780] sm:$0xff]  ;;  %v390_v26 = vld [vmem:[#allocation6 + $0x2d8] sm:$0xff] }
  0xfb   :  { %v4069_v37 = vpack.c.bf16 %v548_v36, %v540_v35  ;;  %v547_v39 = vld [vmem:[#allocation6 + $0x7c0] sm:$0xff]  ;;  %v381_v29 = vld [vmem:[#allocation6 + $0x290] sm:$0xff]  ;;  %v406_v32 = vld [vmem:[#allocation6 + $0x358] sm:$0xff] }
  0xfc   :  { %4040 = vmatpush1.bf16.msra.mxu0 %v4039_v58  ;;  %v4071_v40 = vpack.c.bf16 %v547_v39, %v539_v38  ;;  %v326_v58 = vld [vmem:[#allocation6 + $0xd8] sm:$0xff]  ;;  %v397_v35 = vld [vmem:[#allocation6 + $0x310] sm:$0xff]  ;;  %v945_v2 = vld [vmem:[#allocation9 + $0xc0] sm:$0xff] }
  0xfd   :  { %4042 = vmatprep.subr.bf16.mxu0 %v4041_v59  ;;  %v405_v36 = vld [vmem:[#allocation6 + $0x350] sm:$0xff]  ;;  %v422_v38 = vld [vmem:[#allocation6 + $0x3d8] sm:$0xff] }
  0xfe   :  { %v4099_v39 = vpack.c.bf16 %v405_v36, %v397_v35  ;;  %v413_v41 = vld [vmem:[#allocation6 + $0x390] sm:$0xff]  ;;  %v502_v35 = vld [vmem:[#allocation6 + $0x658] sm:$0xff] }
  0xff   :  { %v421_v42 = vld [vmem:[#allocation6 + $0x3d0] sm:$0xff] }
 0x100   :  { %4044 = vmatpush1.bf16.msra.mxu0 %v4043_v0  ;;  %v922_v47 = vld [vmem:[#allocation9 + $0x8] sm:$0xff] }
 0x101   :  { %4046 = vmatprep.subr.bf16.mxu0 %v4045_v1  ;;  %v4077_v1 = vpack.c.bf16 %v326_v58, %v318_v57  ;;  %v437_v57 = vld [vmem:[#allocation6 + $0x450] sm:$0xff]  ;;  %v446_v58 = vld [vmem:[#allocation6 + $0x498] sm:$0xff] }
 0x102   :  { %v986_v36 = vld [vmem:[#allocation9 + $0x208] sm:$0xff] }
 0x104   :  { %4048 = vmatpush1.bf16.msra.mxu0 %v4047_v6  ;;  %v342_v6 = vld [vmem:[#allocation6 + $0x158] sm:$0xff] }
 0x105   :  { %4050 = vmatprep.subr.bf16.mxu0 %v4049_v7  ;;  %v4081_v10 = vpack.c.bf16 %v342_v6, %v334_v5  ;;  %v445_v6 = vld [vmem:[#allocation6 + $0x490] sm:$0xff] }
 0x108   :  { %4052 = vmatpush1.bf16.msra.mxu0 %v4051_v12  ;;  %v341_v12 = vld [vmem:[#allocation6 + $0x150] sm:$0xff] }
 0x109   :  { %4054 = vmatprep.subr.bf16.mxu0 %v4053_v13  ;;  %v350_v13 = vld [vmem:[#allocation6 + $0x198] sm:$0xff]  ;;  %v4083_v15 = vpack.c.bf16 %v341_v12, %v333_v11  ;;  %v954_v12 = vld [vmem:[#allocation9 + $0x108] sm:$0xff] }
 0x10a   :  { %v4085_v16 = vpack.c.bf16 %v358_v14, %v350_v13  ;;  %v470_v11 = vld [vmem:[#allocation6 + $0x558] sm:$0xff]  ;;  %v962_v13 = vld [vmem:[#allocation9 + $0x148] sm:$0xff] }
 0x10b   :  { %v4273_v14 = vpack.c.bf16 %v962_v13, %v954_v12  ;;  %v533_v12 = vld [vmem:[#allocation6 + $0x750] sm:$0xff]  ;;  %v542_v13 = vld [vmem:[#allocation6 + $0x798] sm:$0xff] }
 0x10c   :  { %4056 = vmatpush1.bf16.msra.mxu0 %v4055_v18  ;;  %v357_v18 = vld [vmem:[#allocation6 + $0x1d0] sm:$0xff] }
 0x10d   :  { %4058 = vmatprep.subr.bf16.mxu0 %v4057_v19  ;;  %v366_v19 = vld [vmem:[#allocation6 + $0x218] sm:$0xff]  ;;  %v4087_v21 = vpack.c.bf16 %v357_v18, %v349_v17 }
 0x10e   :  { %v4089_v22 = vpack.c.bf16 %v374_v20, %v366_v19  ;;  %v461_v20 = vld [vmem:[#allocation6 + $0x510] sm:$0xff] }
 0x110   :  { %4060 = vmatpush1.bf16.msra.mxu0 %v4059_v24  ;;  %v373_v24 = vld [vmem:[#allocation6 + $0x250] sm:$0xff] }
 0x111   :  { %4062 = vmatprep.subr.bf16.mxu0 %v4061_v25  ;;  %v382_v25 = vld [vmem:[#allocation6 + $0x298] sm:$0xff]  ;;  %v4091_v27 = vpack.c.bf16 %v373_v24, %v365_v23  ;;  %v970_v24 = vld [vmem:[#allocation9 + $0x188] sm:$0xff] }
 0x112   :  { %v4093_v28 = vpack.c.bf16 %v390_v26, %v382_v25  ;;  %v486_v23 = vld [vmem:[#allocation6 + $0x5d8] sm:$0xff]  ;;  %v978_v25 = vld [vmem:[#allocation9 + $0x1c8] sm:$0xff] }
 0x113   :  { %v4277_v26 = vpack.c.bf16 %v978_v25, %v970_v24  ;;  %v549_v24 = vld [vmem:[#allocation6 + $0x7d0] sm:$0xff]  ;;  %v304_v25 = vld [vmem:[#allocation6 + $0x28] sm:$0xff] }
 0x114   :  { %4064 = vmatpush1.bf16.msra.mxu0 %v4063_v30  ;;  %v389_v30 = vld [vmem:[#allocation6 + $0x2d0] sm:$0xff] }
 0x115   :  { %4066 = vmatprep.subr.bf16.mxu0 %v4065_v31  ;;  %v398_v31 = vld [vmem:[#allocation6 + $0x318] sm:$0xff]  ;;  %v4095_v33 = vpack.c.bf16 %v389_v30, %v381_v29 }
 0x118   :  { %4068 = vmatpush1.bf16.msra.mxu0 %v4067_v34  ;;  %v4097_v34 = vpack.c.bf16 %v406_v32, %v398_v31  ;;  %v477_v32 = vld [vmem:[#allocation6 + $0x590] sm:$0xff] }
 0x119   :  { %4070 = vmatprep.subr.bf16.mxu0 %v4069_v37  ;;  %v414_v37 = vld [vmem:[#allocation6 + $0x398] sm:$0xff] }
 0x11c   :  { %4072 = vmatpush1.bf16.msra.mxu0 %v4071_v40  ;;  %v4101_v40 = vpack.c.bf16 %v422_v38, %v414_v37  ;;  %v994_v37 = vld [vmem:[#allocation9 + $0x248] sm:$0xff] }
 0x11d   :  { %4074 = vmatprep.subr.bf16.mxu0 %v4073_v43  ;;  %v430_v43 = vld [vmem:[#allocation6 + $0x418] sm:$0xff]  ;;  %v4281_v38 = vpack.c.bf16 %v994_v37, %v986_v36  ;;  %v311_v36 = vld [vmem:[#allocation6 + $0x60] sm:$0xff]  ;;  %v320_v37 = vld [vmem:[#allocation6 + $0xa8] sm:$0xff] }
 0x11e   :  { %v4105_v55 = vpack.c.bf16 %v438_v44, %v430_v43  ;;  %v493_v44 = vld [vmem:[#allocation6 + $0x610] sm:$0xff] }
 0x1b3   :  { %v284_v51 = vpop.f32.mrb[0].mxu1 }
 0x1b4   :  { %v285_v52 = vadd.f32 %v284_v51, %v204_v49  ;;  %v286_v53 = vpop.f32.mrb[1].mxu1  ;;  %v921_v51 = vld [vmem:[#allocation9] sm:$0xff] }
 0x1b5   :  { %v287_v56 = vadd.f32 %v286_v53, %v208_v50  ;;  %v4103_v53 = vpack.c.bf16 %v421_v42, %v413_v41 }
 0x1b6   :  { %v6226_v62 = vmax.f32 %v285_v52, 0.0  ;;  %v929_v52 = vld [vmem:[#allocation9 + $0x40] sm:$0xff] }
 0x1b7   :  { %v6224_v59 = vmax.f32 %v287_v56, 0.0  ;;  %v290_v60 = vpop.f32.mrb[2].mxu1  ;;  %v4267_v54 = vpack.c.bf16 %v929_v52, %v921_v51  ;;  %v429_v56 = vld [vmem:[#allocation6 + $0x410] sm:$0xff] }
 0x1b8   :  { %v291_v63 = vadd.f32 %v290_v60, %v204_v49  ;;  %v292_v0 = vpop.f32.mrb[3].mxu1  ;;  %v930_v49 = vld [vmem:[#allocation9 + $0x48] sm:$0xff]  ;;  %v454_v60 = vld [vmem:[#allocation6 + $0x4d8] sm:$0xff]  ;;  %v4107_v3 = vpack.c.bf16 %v437_v57, %v429_v56 }
 0x1b9   :  { %v293_v4 = vadd.f32 %v292_v0, %v208_v50  ;;  %661 = vmatprep.mubr.f32.mxu0 %v6224_v59  ;;  %v4265_v50 = vpack.c.bf16 %v930_v49, %v922_v47  ;;  %v4109_v5 = vpack.c.bf16 %v454_v60, %v446_v58  ;;  %v501_v47 = vld [vmem:[#allocation6 + $0x650] sm:$0xff]  ;;  %v510_v49 = vld [vmem:[#allocation6 + $0x698] sm:$0xff] }
 0x1ba   :  { %v6229_v7 = vmax.f32 %v291_v63, 0.0  ;;  %662 = vmatmul.mubr.f32.vlgmr.msra.gmra.mrb[0].mxu0 %v6226_v62  ;;  %v946_v63 = vld [vmem:[#allocation9 + $0xc8] sm:$0xff]  ;;  %v4123_v56 = vpack.c.bf16 %v501_v47, %v493_v44 }
 0x1bb   :  { %v6232_v8 = vmax.f32 %v293_v4, 0.0  ;;  %4076 = vmatpush1.bf16.msra.mxu0 %v4075_v61  ;;  %4266 = vmatprep.subr.bf16.mxu1 %v4265_v50  ;;  %v938_v61 = vld [vmem:[#allocation9 + $0x88] sm:$0xff]  ;;  %v518_v50 = vld [vmem:[#allocation6 + $0x6d8] sm:$0xff] }
 0x1bc   :  { %4078 = vmatprep.subr.bf16.mxu0 %v4077_v1  ;;  %4268 = vmatpush1.bf16.msra.mxu1 %v4267_v54  ;;  %v4269_v0 = vpack.c.bf16 %v946_v63, %v938_v61  ;;  %v937_v1 = vld [vmem:[#allocation9 + $0x80] sm:$0xff]  ;;  %v1002_v51 = vld [vmem:[#allocation9 + $0x288] sm:$0xff]  ;;  %v4125_v58 = vpack.c.bf16 %v518_v50, %v510_v49  ;;  %v526_v63 = vld [vmem:[#allocation6 + $0x718] sm:$0xff] }
 0x1bd   :  { %667 = vmatprep.mubr.f32.mxu0 %v6232_v8  ;;  %v4271_v4 = vpack.c.bf16 %v945_v2, %v937_v1  ;;  %v1010_v52 = vld [vmem:[#allocation9 + $0x2c8] sm:$0xff]  ;;  %v1001_v54 = vld [vmem:[#allocation9 + $0x280] sm:$0xff]  ;;  %v319_v50 = vld [vmem:[#allocation6 + $0xa0] sm:$0xff] }
 0x1be   :  { %668 = vmatmul.mubr.f32.gmra.mrb[2].mxu0 %v6229_v7  ;;  %4270 = vmatprep.subr.bf16.mxu1 %v4269_v0  ;;  %v509_v60 = vld [vmem:[#allocation6 + $0x690] sm:$0xff]  ;;  %v534_v0 = vld [vmem:[#allocation6 + $0x758] sm:$0xff] }
 0x1bf   :  { %4080 = vmatpush1.bf16.msra.mxu0 %v4079_v9  ;;  %738 = vmatprep.mubr.f32.mxu0 %v6224_v59  ;;  %v453_v9 = vld [vmem:[#allocation6 + $0x4d0] sm:$0xff] }
 0x1c0   :  { %4082 = vmatprep.subr.bf16.mxu0 %v4081_v10  ;;  %v462_v10 = vld [vmem:[#allocation6 + $0x518] sm:$0xff]  ;;  %4272 = vmatpush1.bf16.msra.mxu1 %v4271_v4  ;;  %v4111_v17 = vpack.c.bf16 %v453_v9, %v445_v6  ;;  %v517_v61 = vld [vmem:[#allocation6 + $0x6d0] sm:$0xff]  ;;  %v1017_v4 = vld [vmem:[#allocation9 + $0x300] sm:$0xff] }
 0x1c1   :  { %v4113_v19 = vpack.c.bf16 %v470_v11, %v462_v10  ;;  %4274 = vmatprep.subr.bf16.mxu1 %v4273_v14  ;;  %v1018_v1 = vld [vmem:[#allocation9 + $0x308] sm:$0xff]  ;;  %v4127_v6 = vpack.c.bf16 %v517_v61, %v509_v60  ;;  %v4129_v10 = vpack.c.bf16 %v534_v0, %v526_v63  ;;  %v550_v14 = vld [vmem:[#allocation6 + $0x7d8] sm:$0xff]  ;;  %v335_v0 = vld [vmem:[#allocation6 + $0x120] sm:$0xff] }
 0x1c2   :  { %v1026_v2 = vld [vmem:[#allocation9 + $0x348] sm:$0xff] }
 0x1c3   :  { %4084 = vmatpush1.bf16.msra.mxu0 %v4083_v15  ;;  %v953_v15 = vld [vmem:[#allocation9 + $0x100] sm:$0xff]  ;;  %v525_v11 = vld [vmem:[#allocation6 + $0x710] sm:$0xff] }
 0x1c4   :  { %4086 = vmatprep.subr.bf16.mxu0 %v4085_v16  ;;  %v961_v16 = vld [vmem:[#allocation9 + $0x140] sm:$0xff] }
 0x1c5   :  { %v4275_v18 = vpack.c.bf16 %v961_v16, %v953_v15  ;;  %v1034_v15 = vld [vmem:[#allocation9 + $0x388] sm:$0xff] }
 0x1c6   :  { %v1042_v16 = vld [vmem:[#allocation9 + $0x3c8] sm:$0xff] }
 0x1c7   :  { %4088 = vmatpush1.bf16.msra.mxu0 %v4087_v21  ;;  %v469_v21 = vld [vmem:[#allocation6 + $0x550] sm:$0xff]  ;;  %4276 = vmatpush1.bf16.msra.mxu1 %v4275_v18  ;;  %v1033_v18 = vld [vmem:[#allocation9 + $0x380] sm:$0xff] }
 0x1c8   :  { %4090 = vmatprep.subr.bf16.mxu0 %v4089_v22  ;;  %v478_v22 = vld [vmem:[#allocation6 + $0x598] sm:$0xff]  ;;  %v4115_v29 = vpack.c.bf16 %v469_v21, %v461_v20  ;;  %4278 = vmatprep.subr.bf16.mxu1 %v4277_v26  ;;  %v4131_v20 = vpack.c.bf16 %v533_v12, %v525_v11  ;;  %v312_v26 = vld [vmem:[#allocation6 + $0x68] sm:$0xff] }
 0x1c9   :  { %v4117_v31 = vpack.c.bf16 %v486_v23, %v478_v22  ;;  %v4133_v22 = vpack.c.bf16 %v550_v14, %v542_v13  ;;  %v541_v23 = vld [vmem:[#allocation6 + $0x790] sm:$0xff]  ;;  %v351_v14 = vld [vmem:[#allocation6 + $0x1a0] sm:$0xff] }
 0x1cb   :  { %4092 = vmatpush1.bf16.msra.mxu0 %v4091_v27  ;;  %v969_v27 = vld [vmem:[#allocation9 + $0x180] sm:$0xff] }
 0x1cc   :  { %4094 = vmatprep.subr.bf16.mxu0 %v4093_v28  ;;  %v977_v28 = vld [vmem:[#allocation9 + $0x1c0] sm:$0xff] }
 0x1cd   :  { %v4279_v30 = vpack.c.bf16 %v977_v28, %v969_v27  ;;  %v1050_v27 = vld [vmem:[#allocation9 + $0x408] sm:$0xff] }
 0x1ce   :  { %v1058_v28 = vld [vmem:[#allocation9 + $0x448] sm:$0xff] }
 0x1cf   :  { %4096 = vmatpush1.bf16.msra.mxu0 %v4095_v33  ;;  %v485_v33 = vld [vmem:[#allocation6 + $0x5d0] sm:$0xff]  ;;  %4280 = vmatpush1.bf16.msra.mxu1 %v4279_v30  ;;  %v1049_v30 = vld [vmem:[#allocation9 + $0x400] sm:$0xff] }
 0x1d0   :  { %4098 = vmatprep.subr.bf16.mxu0 %v4097_v34  ;;  %v494_v34 = vld [vmem:[#allocation6 + $0x618] sm:$0xff]  ;;  %v4119_v41 = vpack.c.bf16 %v485_v33, %v477_v32  ;;  %4282 = vmatprep.subr.bf16.mxu1 %v4281_v38  ;;  %v4135_v32 = vpack.c.bf16 %v549_v24, %v541_v23  ;;  %v328_v38 = vld [vmem:[#allocation6 + $0xe8] sm:$0xff] }
 0x1d1   :  { %v4121_v43 = vpack.c.bf16 %v502_v35, %v494_v34  ;;  %v4137_v34 = vpack.c.bf16 %v312_v26, %v304_v25  ;;  %v303_v35 = vld [vmem:[#allocation6 + $0x20] sm:$0xff]  ;;  %v4141_v49 = vpack.c.bf16 %v328_v38, %v320_v37 }
 0x1d2   :  { %v4139_v44 = vpack.c.bf16 %v311_v36, %v303_v35  ;;  %v367_v26 = vld [vmem:[#allocation6 + $0x220] sm:$0xff] }
 0x1d3   :  { %4100 = vmatpush1.bf16.msra.mxu0 %v4099_v39  ;;  %v985_v39 = vld [vmem:[#allocation9 + $0x200] sm:$0xff]  ;;  %v383_v38 = vld [vmem:[#allocation6 + $0x2a0] sm:$0xff] }
 0x1d4   :  { %4102 = vmatprep.subr.bf16.mxu0 %v4101_v40  ;;  %v993_v40 = vld [vmem:[#allocation9 + $0x240] sm:$0xff] }
 0x1d5   :  { %v4283_v42 = vpack.c.bf16 %v993_v40, %v985_v39  ;;  %v1066_v39 = vld [vmem:[#allocation9 + $0x488] sm:$0xff] }
 0x1d6   :  { %v1074_v40 = vld [vmem:[#allocation9 + $0x4c8] sm:$0xff] }
 0x1d7   :  { %4104 = vmatpush1.bf16.msra.mxu0 %v4103_v53  ;;  %4284 = vmatpush1.bf16.msra.mxu1 %v4283_v42  ;;  %v4285_v53 = vpack.c.bf16 %v1010_v52, %v1002_v51  ;;  %v1065_v42 = vld [vmem:[#allocation9 + $0x480] sm:$0xff]  ;;  %v327_v51 = vld [vmem:[#allocation6 + $0xe0] sm:$0xff] }
 0x1d8   :  { %4106 = vmatprep.subr.bf16.mxu0 %v4105_v55  ;;  %v1009_v55 = vld [vmem:[#allocation9 + $0x2c0] sm:$0xff]  ;;  %v4143_v60 = vpack.c.bf16 %v327_v51, %v319_v50 }
 0x1d9   :  { %v4287_v57 = vpack.c.bf16 %v1009_v55, %v1001_v54  ;;  %4286 = vmatprep.subr.bf16.mxu1 %v4285_v53  ;;  %v336_v52 = vld [vmem:[#allocation6 + $0x128] sm:$0xff]  ;;  %v1082_v54 = vld [vmem:[#allocation9 + $0x508] sm:$0xff] }
 0x1da   :  { %v344_v53 = vld [vmem:[#allocation6 + $0x168] sm:$0xff]  ;;  %v1090_v55 = vld [vmem:[#allocation9 + $0x548] sm:$0xff] }
 0x1db   :  { %4108 = vmatpush1.bf16.msra.mxu0 %v4107_v3  ;;  %4288 = vmatpush1.bf16.msra.mxu1 %v4287_v57  ;;  %v4289_v3 = vpack.c.bf16 %v1026_v2, %v1018_v1  ;;  %v1081_v57 = vld [vmem:[#allocation9 + $0x500] sm:$0xff]  ;;  %v4145_v63 = vpack.c.bf16 %v344_v53, %v336_v52  ;;  %v343_v1 = vld [vmem:[#allocation6 + $0x160] sm:$0xff] }
 0x1dc   :  { %4110 = vmatprep.subr.bf16.mxu0 %v4109_v5  ;;  %v1025_v5 = vld [vmem:[#allocation9 + $0x340] sm:$0xff]  ;;  %v4147_v11 = vpack.c.bf16 %v343_v1, %v335_v0  ;;  %v399_v53 = vld [vmem:[#allocation6 + $0x320] sm:$0xff] }
 0x1dd   :  { %v4291_v9 = vpack.c.bf16 %v1025_v5, %v1017_v4  ;;  %4290 = vmatprep.subr.bf16.mxu1 %v4289_v3  ;;  %v352_v2 = vld [vmem:[#allocation6 + $0x1a8] sm:$0xff]  ;;  %v1098_v4 = vld [vmem:[#allocation9 + $0x588] sm:$0xff] }
 0x1de   :  { %v360_v3 = vld [vmem:[#allocation6 + $0x1e8] sm:$0xff]  ;;  %v1106_v5 = vld [vmem:[#allocation9 + $0x5c8] sm:$0xff] }
 0x1df   :  { %4112 = vmatpush1.bf16.msra.mxu0 %v4111_v17  ;;  %4292 = vmatpush1.bf16.msra.mxu1 %v4291_v9  ;;  %v4293_v17 = vpack.c.bf16 %v1042_v16, %v1034_v15  ;;  %v1097_v9 = vld [vmem:[#allocation9 + $0x580] sm:$0xff]  ;;  %v4149_v13 = vpack.c.bf16 %v360_v3, %v352_v2  ;;  %v359_v15 = vld [vmem:[#allocation6 + $0x1e0] sm:$0xff] }
 0x1e0   :  { %4114 = vmatprep.subr.bf16.mxu0 %v4113_v19  ;;  %v1041_v19 = vld [vmem:[#allocation9 + $0x3c0] sm:$0xff]  ;;  %v4151_v23 = vpack.c.bf16 %v359_v15, %v351_v14  ;;  %v415_v3 = vld [vmem:[#allocation6 + $0x3a0] sm:$0xff] }
 0x1e1   :  { %v4295_v21 = vpack.c.bf16 %v1041_v19, %v1033_v18  ;;  %4294 = vmatprep.subr.bf16.mxu1 %v4293_v17  ;;  %v368_v16 = vld [vmem:[#allocation6 + $0x228] sm:$0xff]  ;;  %v1114_v18 = vld [vmem:[#allocation9 + $0x608] sm:$0xff]  ;;  %v431_v14 = vld [vmem:[#allocation6 + $0x420] sm:$0xff] }
 0x1e2   :  { %v376_v17 = vld [vmem:[#allocation6 + $0x268] sm:$0xff]  ;;  %v1122_v19 = vld [vmem:[#allocation9 + $0x648] sm:$0xff]  ;;  %v439_v15 = vld [vmem:[#allocation6 + $0x460] sm:$0xff] }
 0x1e3   :  { %4116 = vmatpush1.bf16.msra.mxu0 %v4115_v29  ;;  %4296 = vmatpush1.bf16.msra.mxu1 %v4295_v21  ;;  %v4297_v29 = vpack.c.bf16 %v1058_v28, %v1050_v27  ;;  %v1113_v21 = vld [vmem:[#allocation9 + $0x600] sm:$0xff]  ;;  %v4153_v25 = vpack.c.bf16 %v376_v17, %v368_v16  ;;  %v375_v27 = vld [vmem:[#allocation6 + $0x260] sm:$0xff] }
 0x1e4   :  { %4118 = vmatprep.subr.bf16.mxu0 %v4117_v31  ;;  %v1057_v31 = vld [vmem:[#allocation9 + $0x440] sm:$0xff]  ;;  %v4155_v35 = vpack.c.bf16 %v375_v27, %v367_v26  ;;  %v463_v26 = vld [vmem:[#allocation6 + $0x520] sm:$0xff] }
 0x1e5   :  { %v4299_v33 = vpack.c.bf16 %v1057_v31, %v1049_v30  ;;  %4298 = vmatprep.subr.bf16.mxu1 %v4297_v29  ;;  %v384_v28 = vld [vmem:[#allocation6 + $0x2a8] sm:$0xff]  ;;  %v1130_v30 = vld [vmem:[#allocation9 + $0x688] sm:$0xff]  ;;  %v471_v27 = vld [vmem:[#allocation6 + $0x560] sm:$0xff] }
 0x1e6   :  { %v392_v29 = vld [vmem:[#allocation6 + $0x2e8] sm:$0xff]  ;;  %v1138_v31 = vld [vmem:[#allocation9 + $0x6c8] sm:$0xff] }
 0x1e7   :  { %4120 = vmatpush1.bf16.msra.mxu0 %v4119_v41  ;;  %4300 = vmatpush1.bf16.msra.mxu1 %v4299_v33  ;;  %v4301_v41 = vpack.c.bf16 %v1074_v40, %v1066_v39  ;;  %v1129_v33 = vld [vmem:[#allocation9 + $0x680] sm:$0xff]  ;;  %v4157_v37 = vpack.c.bf16 %v392_v29, %v384_v28  ;;  %v391_v39 = vld [vmem:[#allocation6 + $0x2e0] sm:$0xff] }
 0x1e8   :  { %4122 = vmatprep.subr.bf16.mxu0 %v4121_v43  ;;  %v1073_v43 = vld [vmem:[#allocation9 + $0x4c0] sm:$0xff]  ;;  %v4159_v50 = vpack.c.bf16 %v391_v39, %v383_v38  ;;  %v495_v38 = vld [vmem:[#allocation6 + $0x620] sm:$0xff] }
 0x1e9   :  { %v4303_v47 = vpack.c.bf16 %v1073_v43, %v1065_v42  ;;  %4302 = vmatprep.subr.bf16.mxu1 %v4301_v41  ;;  %v400_v40 = vld [vmem:[#allocation6 + $0x328] sm:$0xff]  ;;  %v1146_v42 = vld [vmem:[#allocation9 + $0x708] sm:$0xff]  ;;  %v503_v39 = vld [vmem:[#allocation6 + $0x660] sm:$0xff] }
 0x1ea   :  { %v408_v41 = vld [vmem:[#allocation6 + $0x368] sm:$0xff]  ;;  %v1154_v43 = vld [vmem:[#allocation9 + $0x748] sm:$0xff] }
 0x1eb   :  { %4124 = vmatpush1.bf16.msra.mxu0 %v4123_v56  ;;  %4304 = vmatpush1.bf16.msra.mxu1 %v4303_v47  ;;  %v4305_v56 = vpack.c.bf16 %v1090_v55, %v1082_v54  ;;  %v1145_v47 = vld [vmem:[#allocation9 + $0x700] sm:$0xff]  ;;  %v4161_v52 = vpack.c.bf16 %v408_v41, %v400_v40  ;;  %v407_v54 = vld [vmem:[#allocation6 + $0x360] sm:$0xff] }
 0x1ec   :  { %4126 = vmatprep.subr.bf16.mxu0 %v4125_v58  ;;  %v1089_v58 = vld [vmem:[#allocation9 + $0x540] sm:$0xff]  ;;  %v4163_v0 = vpack.c.bf16 %v407_v54, %v399_v53  ;;  %v527_v53 = vld [vmem:[#allocation6 + $0x720] sm:$0xff] }
 0x1ed   :  { %v4307_v61 = vpack.c.bf16 %v1089_v58, %v1081_v57  ;;  %4306 = vmatprep.subr.bf16.mxu1 %v4305_v56  ;;  %v416_v55 = vld [vmem:[#allocation6 + $0x3a8] sm:$0xff]  ;;  %v1162_v57 = vld [vmem:[#allocation9 + $0x788] sm:$0xff]  ;;  %v535_v54 = vld [vmem:[#allocation6 + $0x760] sm:$0xff] }
 0x1ee   :  { %v424_v56 = vld [vmem:[#allocation6 + $0x3e8] sm:$0xff]  ;;  %v1170_v58 = vld [vmem:[#allocation9 + $0x7c8] sm:$0xff] }
 0x1ef   :  { %4128 = vmatpush1.bf16.msra.mxu0 %v4127_v6  ;;  %4308 = vmatpush1.bf16.msra.mxu1 %v4307_v61  ;;  %v4309_v6 = vpack.c.bf16 %v1106_v5, %v1098_v4  ;;  %v1161_v61 = vld [vmem:[#allocation9 + $0x780] sm:$0xff]  ;;  %v4165_v2 = vpack.c.bf16 %v424_v56, %v416_v55  ;;  %v423_v4 = vld [vmem:[#allocation6 + $0x3e0] sm:$0xff] }
 0x1f0   :  { %4130 = vmatprep.subr.bf16.mxu0 %v4129_v10  ;;  %v1105_v10 = vld [vmem:[#allocation9 + $0x5c0] sm:$0xff] }
 0x1f1   :  { %v4311_v12 = vpack.c.bf16 %v1105_v10, %v1097_v9  ;;  %4310 = vmatprep.subr.bf16.mxu1 %v4309_v6  ;;  %v432_v5 = vld [vmem:[#allocation6 + $0x428] sm:$0xff]  ;;  %v1178_v9 = vld [vmem:[#allocation9 + $0x808] sm:$0xff] }
 0x1f2   :  { %v440_v6 = vld [vmem:[#allocation6 + $0x468] sm:$0xff]  ;;  %v1186_v10 = vld [vmem:[#allocation9 + $0x848] sm:$0xff] }
 0x1f3   :  { %4132 = vmatpush1.bf16.msra.mxu0 %v4131_v20  ;;  %4312 = vmatpush1.bf16.msra.mxu1 %v4311_v12  ;;  %v4313_v20 = vpack.c.bf16 %v1122_v19, %v1114_v18  ;;  %v4167_v12 = vpack.c.bf16 %v423_v4, %v415_v3  ;;  %v448_v16 = vld [vmem:[#allocation6 + $0x4a8] sm:$0xff]  ;;  %v4171_v18 = vpack.c.bf16 %v439_v15, %v431_v14  ;;  %v305_v3 = vld [vmem:[#allocation6 + $0x30] sm:$0xff]  ;;  %v346_v14 = vld [vmem:[#allocation6 + $0x178] sm:$0xff] }
 0x1f4   :  { %4134 = vmatprep.subr.bf16.mxu0 %v4133_v22  ;;  %v1121_v22 = vld [vmem:[#allocation9 + $0x640] sm:$0xff]  ;;  %v313_v4 = vld [vmem:[#allocation6 + $0x70] sm:$0xff] }
 0x1f5   :  { %v4315_v24 = vpack.c.bf16 %v1121_v22, %v1113_v21  ;;  %4314 = vmatprep.subr.bf16.mxu1 %v4313_v20  ;;  %v456_v17 = vld [vmem:[#allocation6 + $0x4e8] sm:$0xff]  ;;  %v447_v20 = vld [vmem:[#allocation6 + $0x4a0] sm:$0xff] }
 0x1f6   :  { %v4173_v19 = vpack.c.bf16 %v456_v17, %v448_v16  ;;  %v455_v21 = vld [vmem:[#allocation6 + $0x4e0] sm:$0xff]  ;;  %v464_v22 = vld [vmem:[#allocation6 + $0x528] sm:$0xff]  ;;  %v337_v17 = vld [vmem:[#allocation6 + $0x130] sm:$0xff] }
 0x1f7   :  { %4136 = vmatpush1.bf16.msra.mxu0 %v4135_v32  ;;  %4316 = vmatpush1.bf16.msra.mxu1 %v4315_v24  ;;  %v4317_v32 = vpack.c.bf16 %v1138_v31, %v1130_v30  ;;  %v4175_v24 = vpack.c.bf16 %v455_v21, %v447_v20  ;;  %v480_v28 = vld [vmem:[#allocation6 + $0x5a8] sm:$0xff]  ;;  %v4179_v30 = vpack.c.bf16 %v471_v27, %v463_v26  ;;  %v362_v20 = vld [vmem:[#allocation6 + $0x1f8] sm:$0xff] }
 0x1f8   :  { %4138 = vmatprep.subr.bf16.mxu0 %v4137_v34  ;;  %v1137_v34 = vld [vmem:[#allocation9 + $0x6c0] sm:$0xff]  ;;  %v378_v26 = vld [vmem:[#allocation6 + $0x278] sm:$0xff] }
 0x1f9   :  { %v4319_v36 = vpack.c.bf16 %v1137_v34, %v1129_v33  ;;  %4318 = vmatprep.subr.bf16.mxu1 %v4317_v32  ;;  %v488_v29 = vld [vmem:[#allocation6 + $0x5e8] sm:$0xff]  ;;  %v479_v32 = vld [vmem:[#allocation6 + $0x5a0] sm:$0xff] }
 0x1fa   :  { %739 = vmatmul.mubr.f32.vlgmr.msra.gmra.mrb[4].mxu0 %v6226_v62  ;;  %v4181_v31 = vpack.c.bf16 %v488_v29, %v480_v28  ;;  %v487_v33 = vld [vmem:[#allocation6 + $0x5e0] sm:$0xff]  ;;  %v496_v34 = vld [vmem:[#allocation6 + $0x628] sm:$0xff]  ;;  %v369_v29 = vld [vmem:[#allocation6 + $0x230] sm:$0xff] }
 0x1fb   :  { %744 = vmatprep.mubr.f32.mxu0 %v6232_v8  ;;  %4140 = vmatpush1.bf16.msra.mxu0 %v4139_v44  ;;  %v4321_v44 = vpack.c.bf16 %v1154_v43, %v1146_v42  ;;  %v512_v40 = vld [vmem:[#allocation6 + $0x6a8] sm:$0xff]  ;;  %v4187_v42 = vpack.c.bf16 %v503_v39, %v495_v38 }
 0x1fc   :  { %4142 = vmatprep.subr.bf16.mxu0 %v4141_v49  ;;  %4320 = vmatpush1.bf16.msra.mxu1 %v4319_v36  ;;  %v1153_v49 = vld [vmem:[#allocation9 + $0x740] sm:$0xff]  ;;  %v4183_v36 = vpack.c.bf16 %v487_v33, %v479_v32  ;;  %v394_v32 = vld [vmem:[#allocation6 + $0x2f8] sm:$0xff] }
 0x1fd   :  { %v4323_v51 = vpack.c.bf16 %v1153_v49, %v1145_v47  ;;  %4322 = vmatprep.subr.bf16.mxu1 %v4321_v44  ;;  %v520_v41 = vld [vmem:[#allocation6 + $0x6e8] sm:$0xff]  ;;  %v511_v44 = vld [vmem:[#allocation6 + $0x6a0] sm:$0xff] }
 0x1fe   :  { %745 = vmatmul.mubr.f32.gmra.mrb[6].mxu0 %v6229_v7  ;;  %v4189_v43 = vpack.c.bf16 %v520_v41, %v512_v40  ;;  %v519_v47 = vld [vmem:[#allocation6 + $0x6e0] sm:$0xff]  ;;  %v528_v49 = vld [vmem:[#allocation6 + $0x728] sm:$0xff]  ;;  %v401_v40 = vld [vmem:[#allocation6 + $0x330] sm:$0xff] }
 0x1ff   :  { %4144 = vmatpush1.bf16.msra.mxu0 %v4143_v60  ;;  %815 = vmatprep.mubr.f32.mxu0 %v6224_v59  ;;  %v4325_v60 = vpack.c.bf16 %v1170_v58, %v1162_v57  ;;  %v544_v55 = vld [vmem:[#allocation6 + $0x7a8] sm:$0xff]  ;;  %v4195_v57 = vpack.c.bf16 %v535_v54, %v527_v53  ;;  %v409_v41 = vld [vmem:[#allocation6 + $0x370] sm:$0xff] }
 0x200   :  { %4146 = vmatprep.subr.bf16.mxu0 %v4145_v63  ;;  %4324 = vmatpush1.bf16.msra.mxu1 %v4323_v51  ;;  %v1169_v63 = vld [vmem:[#allocation9 + $0x7c0] sm:$0xff]  ;;  %v4191_v51 = vpack.c.bf16 %v519_v47, %v511_v44  ;;  %v4227_v44 = vpack.c.bf16 %v409_v41, %v401_v40 }
 0x201   :  { %v4327_v1 = vpack.c.bf16 %v1169_v63, %v1161_v61  ;;  %4326 = vmatprep.subr.bf16.mxu1 %v4325_v60  ;;  %v552_v56 = vld [vmem:[#allocation6 + $0x7e8] sm:$0xff]  ;;  %v543_v60 = vld [vmem:[#allocation6 + $0x7a0] sm:$0xff]  ;;  %v306_v63 = vld [vmem:[#allocation6 + $0x38] sm:$0xff] }
 0x202   :  { %v4197_v58 = vpack.c.bf16 %v552_v56, %v544_v55  ;;  %v551_v61 = vld [vmem:[#allocation6 + $0x7e0] sm:$0xff]  ;;  %v433_v55 = vld [vmem:[#allocation6 + $0x430] sm:$0xff] }
 0x203   :  { %4148 = vmatpush1.bf16.msra.mxu0 %v4147_v11  ;;  %v4329_v11 = vpack.c.bf16 %v1186_v10, %v1178_v9  ;;  %v4203_v9 = vpack.c.bf16 %v313_v4, %v305_v3  ;;  %v441_v56 = vld [vmem:[#allocation6 + $0x470] sm:$0xff] }
 0x204   :  { %4150 = vmatprep.subr.bf16.mxu0 %v4149_v13  ;;  %4328 = vmatpush1.bf16.msra.mxu1 %v4327_v1  ;;  %v4169_v13 = vpack.c.bf16 %v440_v6, %v432_v5  ;;  %v4199_v1 = vpack.c.bf16 %v551_v61, %v543_v60  ;;  %v322_v5 = vld [vmem:[#allocation6 + $0xb8] sm:$0xff]  ;;  %v4235_v60 = vpack.c.bf16 %v441_v56, %v433_v55 }
 0x205   :  { %4330 = vmatprep.subr.bf16.mxu1 %v4329_v11  ;;  %v330_v6 = vld [vmem:[#allocation6 + $0xf8] sm:$0xff]  ;;  %v321_v11 = vld [vmem:[#allocation6 + $0xb0] sm:$0xff] }
 0x206   :  { %v4205_v10 = vpack.c.bf16 %v330_v6, %v322_v5  ;;  %v465_v5 = vld [vmem:[#allocation6 + $0x530] sm:$0xff] }
 0x207   :  { %4152 = vmatpush1.bf16.msra.mxu0 %v4151_v23  ;;  %v472_v23 = vld [vmem:[#allocation6 + $0x568] sm:$0xff]  ;;  %v473_v6 = vld [vmem:[#allocation6 + $0x570] sm:$0xff] }
 0x208   :  { %4154 = vmatprep.subr.bf16.mxu0 %v4153_v25  ;;  %v4177_v25 = vpack.c.bf16 %v472_v23, %v464_v22  ;;  %v353_v23 = vld [vmem:[#allocation6 + $0x1b0] sm:$0xff] }
 0x20b   :  { %4156 = vmatpush1.bf16.msra.mxu0 %v4155_v35  ;;  %v504_v35 = vld [vmem:[#allocation6 + $0x668] sm:$0xff] }
 0x20c   :  { %4158 = vmatprep.subr.bf16.mxu0 %v4157_v37  ;;  %v4185_v37 = vpack.c.bf16 %v504_v35, %v496_v34  ;;  %v393_v35 = vld [vmem:[#allocation6 + $0x2f0] sm:$0xff] }
 0x20f   :  { %4160 = vmatpush1.bf16.msra.mxu0 %v4159_v50  ;;  %v536_v50 = vld [vmem:[#allocation6 + $0x768] sm:$0xff] }
 0x210   :  { %4162 = vmatprep.subr.bf16.mxu0 %v4161_v52  ;;  %v4193_v52 = vpack.c.bf16 %v536_v50, %v528_v49  ;;  %v417_v49 = vld [vmem:[#allocation6 + $0x3b0] sm:$0xff] }
 0x211   :  { %v425_v50 = vld [vmem:[#allocation6 + $0x3f0] sm:$0xff] }
 0x212   :  { %v4231_v53 = vpack.c.bf16 %v425_v50, %v417_v49 }
 0x213   :  { %4164 = vmatpush1.bf16.msra.mxu0 %v4163_v0  ;;  %v314_v0 = vld [vmem:[#allocation6 + $0x78] sm:$0xff] }
 0x214   :  { %4166 = vmatprep.subr.bf16.mxu0 %v4165_v2  ;;  %v4201_v2 = vpack.c.bf16 %v314_v0, %v306_v63  ;;  %v449_v63 = vld [vmem:[#allocation6 + $0x4b0] sm:$0xff] }
 0x215   :  { %v457_v0 = vld [vmem:[#allocation6 + $0x4f0] sm:$0xff] }
 0x216   :  { %v4239_v3 = vpack.c.bf16 %v457_v0, %v449_v63 }
 0x217   :  { %4168 = vmatpush1.bf16.msra.mxu0 %v4167_v12  ;;  %v329_v12 = vld [vmem:[#allocation6 + $0xf0] sm:$0xff] }
 0x218   :  { %4170 = vmatprep.subr.bf16.mxu0 %v4169_v13  ;;  %v338_v13 = vld [vmem:[#allocation6 + $0x138] sm:$0xff]  ;;  %v4207_v15 = vpack.c.bf16 %v329_v12, %v321_v11  ;;  %v4243_v11 = vpack.c.bf16 %v473_v6, %v465_v5 }
 0x219   :  { %v4209_v16 = vpack.c.bf16 %v346_v14, %v338_v13  ;;  %v481_v13 = vld [vmem:[#allocation6 + $0x5b0] sm:$0xff]  ;;  %v987_v5 = vld [vmem:[#allocation9 + $0x210] sm:$0xff] }
 0x21a   :  { %v489_v14 = vld [vmem:[#allocation6 + $0x5f0] sm:$0xff]  ;;  %v995_v6 = vld [vmem:[#allocation9 + $0x250] sm:$0xff] }
 0x21b   :  { %4172 = vmatpush1.bf16.msra.mxu0 %v4171_v18  ;;  %v345_v18 = vld [vmem:[#allocation6 + $0x170] sm:$0xff] }
 0x21c   :  { %4174 = vmatprep.subr.bf16.mxu0 %v4173_v19  ;;  %v354_v19 = vld [vmem:[#allocation6 + $0x1b8] sm:$0xff]  ;;  %v4211_v21 = vpack.c.bf16 %v345_v18, %v337_v17  ;;  %v4247_v17 = vpack.c.bf16 %v489_v14, %v481_v13 }
 0x21d   :  { %v4213_v22 = vpack.c.bf16 %v362_v20, %v354_v19  ;;  %v497_v19 = vld [vmem:[#allocation6 + $0x630] sm:$0xff]  ;;  %v1003_v13 = vld [vmem:[#allocation9 + $0x290] sm:$0xff] }
 0x21e   :  { %v505_v20 = vld [vmem:[#allocation6 + $0x670] sm:$0xff]  ;;  %v1011_v14 = vld [vmem:[#allocation9 + $0x2d0] sm:$0xff] }
 0x21f   :  { %4176 = vmatpush1.bf16.msra.mxu0 %v4175_v24  ;;  %v361_v24 = vld [vmem:[#allocation6 + $0x1f0] sm:$0xff] }
 0x220   :  { %4178 = vmatprep.subr.bf16.mxu0 %v4177_v25  ;;  %v370_v25 = vld [vmem:[#allocation6 + $0x238] sm:$0xff]  ;;  %v4215_v27 = vpack.c.bf16 %v361_v24, %v353_v23  ;;  %v4251_v23 = vpack.c.bf16 %v505_v20, %v497_v19  ;;  %v4543_v19 = vpack.c.bf16 %v1011_v14, %v1003_v13  ;;  %v1225_v13 = vld [vmem:[#allocation9 + $0x980] sm:$0xff] }
 0x221   :  { %v4217_v28 = vpack.c.bf16 %v378_v26, %v370_v25  ;;  %v513_v25 = vld [vmem:[#allocation6 + $0x6b0] sm:$0xff]  ;;  %v1233_v14 = vld [vmem:[#allocation9 + $0x9c0] sm:$0xff] }
 0x222   :  { %v521_v26 = vld [vmem:[#allocation6 + $0x6f0] sm:$0xff] }
 0x223   :  { %4180 = vmatpush1.bf16.msra.mxu0 %v4179_v30  ;;  %v377_v30 = vld [vmem:[#allocation6 + $0x270] sm:$0xff] }
 0x224   :  { %4182 = vmatprep.subr.bf16.mxu0 %v4181_v31  ;;  %v386_v31 = vld [vmem:[#allocation6 + $0x2b8] sm:$0xff]  ;;  %v4219_v33 = vpack.c.bf16 %v377_v30, %v369_v29  ;;  %v4255_v29 = vpack.c.bf16 %v521_v26, %v513_v25 }
 0x225   :  { %v4221_v34 = vpack.c.bf16 %v394_v32, %v386_v31  ;;  %v529_v31 = vld [vmem:[#allocation6 + $0x730] sm:$0xff] }
 0x226   :  { %v537_v32 = vld [vmem:[#allocation6 + $0x770] sm:$0xff] }
 0x227   :  { %4184 = vmatpush1.bf16.msra.mxu0 %v4183_v36  ;;  %v402_v36 = vld [vmem:[#allocation6 + $0x338] sm:$0xff] }
 0x228   :  { %4186 = vmatprep.subr.bf16.mxu0 %v4185_v37  ;;  %v410_v37 = vld [vmem:[#allocation6 + $0x378] sm:$0xff] }
 0x229   :  { %v4225_v39 = vpack.c.bf16 %v410_v37, %v402_v36  ;;  %v545_v36 = vld [vmem:[#allocation6 + $0x7b0] sm:$0xff] }
 0x22a   :  { %v553_v37 = vld [vmem:[#allocation6 + $0x7f0] sm:$0xff] }
 0x22b   :  { %4188 = vmatpush1.bf16.msra.mxu0 %v4187_v42  ;;  %v418_v42 = vld [vmem:[#allocation6 + $0x3b8] sm:$0xff]  ;;  %v4263_v40 = vpack.c.bf16 %v553_v37, %v545_v36 }
 0x22c   :  { %4190 = vmatprep.subr.bf16.mxu0 %v4189_v43  ;;  %v426_v43 = vld [vmem:[#allocation6 + $0x3f8] sm:$0xff] }
 0x22d   :  { %v4229_v47 = vpack.c.bf16 %v426_v43, %v418_v42  ;;  %v923_v42 = vld [vmem:[#allocation9 + $0x10] sm:$0xff] }
 0x22e   :  { %v931_v43 = vld [vmem:[#allocation9 + $0x50] sm:$0xff] }
 0x22f   :  { %4192 = vmatpush1.bf16.msra.mxu0 %v4191_v51  ;;  %v434_v51 = vld [vmem:[#allocation6 + $0x438] sm:$0xff]  ;;  %v4523_v49 = vpack.c.bf16 %v931_v43, %v923_v42  ;;  %v1193_v43 = vld [vmem:[#allocation9 + $0x880] sm:$0xff] }
 0x230   :  { %4194 = vmatprep.subr.bf16.mxu0 %v4193_v52  ;;  %v442_v52 = vld [vmem:[#allocation6 + $0x478] sm:$0xff] }
 0x231   :  { %v4233_v54 = vpack.c.bf16 %v442_v52, %v434_v51  ;;  %v939_v51 = vld [vmem:[#allocation9 + $0x90] sm:$0xff] }
 0x232   :  { %v947_v52 = vld [vmem:[#allocation9 + $0xd0] sm:$0xff] }
 0x233   :  { %4196 = vmatpush1.bf16.msra.mxu0 %v4195_v57  ;;  %v450_v57 = vld [vmem:[#allocation6 + $0x4b8] sm:$0xff]  ;;  %v4527_v55 = vpack.c.bf16 %v947_v52, %v939_v51  ;;  %v1210_v51 = vld [vmem:[#allocation9 + $0x908] sm:$0xff] }
 0x234   :  { %4198 = vmatprep.subr.bf16.mxu0 %v4197_v58  ;;  %v458_v58 = vld [vmem:[#allocation6 + $0x4f8] sm:$0xff]  ;;  %v1218_v52 = vld [vmem:[#allocation9 + $0x948] sm:$0xff] }
 0x235   :  { %v4237_v61 = vpack.c.bf16 %v458_v58, %v450_v57  ;;  %v955_v57 = vld [vmem:[#allocation9 + $0x110] sm:$0xff] }
 0x236   :  { %v963_v58 = vld [vmem:[#allocation9 + $0x150] sm:$0xff] }
 0x237   :  { %4200 = vmatpush1.bf16.msra.mxu0 %v4199_v1  ;;  %v466_v1 = vld [vmem:[#allocation6 + $0x538] sm:$0xff]  ;;  %v4531_v63 = vpack.c.bf16 %v963_v58, %v955_v57 }
 0x238   :  { %4202 = vmatprep.subr.bf16.mxu0 %v4201_v2  ;;  %v474_v2 = vld [vmem:[#allocation6 + $0x578] sm:$0xff] }
 0x239   :  { %v4241_v4 = vpack.c.bf16 %v474_v2, %v466_v1  ;;  %v971_v1 = vld [vmem:[#allocation9 + $0x190] sm:$0xff] }
 0x23a   :  { %816 = vmatmul.mubr.f32.vlgmr.msra.gmra.mrb[8].mxu0 %v6226_v62  ;;  %v979_v2 = vld [vmem:[#allocation9 + $0x1d0] sm:$0xff] }
 0x23b   :  { %821 = vmatprep.mubr.f32.mxu0 %v6232_v8  ;;  %4204 = vmatpush1.bf16.msra.mxu0 %v4203_v9  ;;  %v482_v9 = vld [vmem:[#allocation6 + $0x5b8] sm:$0xff] }
 0x23c   :  { %4206 = vmatprep.subr.bf16.mxu0 %v4205_v10  ;;  %v490_v10 = vld [vmem:[#allocation6 + $0x5f8] sm:$0xff] }
 0x23d   :  { %v4245_v12 = vpack.c.bf16 %v490_v10, %v482_v9  ;;  %v1004_v9 = vld [vmem:[#allocation9 + $0x298] sm:$0xff] }
 0x23e   :  { %822 = vmatmul.mubr.f32.gmra.mrb[10].mxu0 %v6229_v7  ;;  %v1012_v10 = vld [vmem:[#allocation9 + $0x2d8] sm:$0xff] }
 0x23f   :  { %4208 = vmatpush1.bf16.msra.mxu0 %v4207_v15  ;;  %892 = vmatprep.mubr.f32.mxu0 %v6224_v59  ;;  %v385_v59 = vld [vmem:[#allocation6 + $0x2b0] sm:$0xff]  ;;  %v498_v15 = vld [vmem:[#allocation6 + $0x638] sm:$0xff] }
 0x240   :  { %4210 = vmatprep.subr.bf16.mxu0 %v4209_v16  ;;  %v4223_v38 = vpack.c.bf16 %v393_v35, %v385_v59  ;;  %v506_v16 = vld [vmem:[#allocation6 + $0x678] sm:$0xff]  ;;  %v4259_v59 = vpack.c.bf16 %v537_v32, %v529_v31  ;;  %v1194_v32 = vld [vmem:[#allocation9 + $0x888] sm:$0xff] }
 0x241   :  { %v4249_v18 = vpack.c.bf16 %v506_v16, %v498_v15  ;;  %v1020_v15 = vld [vmem:[#allocation9 + $0x318] sm:$0xff] }
 0x242   :  { %v1028_v16 = vld [vmem:[#allocation9 + $0x358] sm:$0xff] }
 0x243   :  { %4212 = vmatpush1.bf16.msra.mxu0 %v4211_v21  ;;  %v514_v21 = vld [vmem:[#allocation6 + $0x6b8] sm:$0xff]  ;;  %v4545_v20 = vpack.c.bf16 %v1028_v16, %v1020_v15  ;;  %v1242_v16 = vld [vmem:[#allocation9 + $0xa08] sm:$0xff] }
 0x244   :  { %4214 = vmatprep.subr.bf16.mxu0 %v4213_v22  ;;  %v522_v22 = vld [vmem:[#allocation6 + $0x6f8] sm:$0xff] }
 0x245   :  { %v4253_v24 = vpack.c.bf16 %v522_v22, %v514_v21  ;;  %v1019_v21 = vld [vmem:[#allocation9 + $0x310] sm:$0xff] }
 0x246   :  { %v1027_v22 = vld [vmem:[#allocation9 + $0x350] sm:$0xff] }
 0x247   :  { %4216 = vmatpush1.bf16.msra.mxu0 %v4215_v27  ;;  %v530_v27 = vld [vmem:[#allocation6 + $0x738] sm:$0xff]  ;;  %v4547_v31 = vpack.c.bf16 %v1027_v22, %v1019_v21  ;;  %v4343_v21 = vpack.c.bf16 %v1233_v14, %v1225_v13  ;;  %v1100_v22 = vld [vmem:[#allocation9 + $0x598] sm:$0xff] }
 0x248   :  { %4218 = vmatprep.subr.bf16.mxu0 %v4217_v28  ;;  %v538_v28 = vld [vmem:[#allocation6 + $0x778] sm:$0xff]  ;;  %v1164_v14 = vld [vmem:[#allocation9 + $0x798] sm:$0xff] }
 0x249   :  { %v4257_v30 = vpack.c.bf16 %v538_v28, %v530_v27  ;;  %v1185_v27 = vld [vmem:[#allocation9 + $0x840] sm:$0xff]  ;;  %v1036_v28 = vld [vmem:[#allocation9 + $0x398] sm:$0xff] }
 0x24b   :  { %4220 = vmatpush1.bf16.msra.mxu0 %v4219_v33  ;;  %v546_v33 = vld [vmem:[#allocation6 + $0x7b8] sm:$0xff] }
 0x24c   :  { %4222 = vmatprep.subr.bf16.mxu0 %v4221_v34  ;;  %v554_v34 = vld [vmem:[#allocation6 + $0x7f8] sm:$0xff] }
 0x24d   :  { %v4261_v35 = vpack.c.bf16 %v554_v34, %v546_v33  ;;  %v1202_v33 = vld [vmem:[#allocation9 + $0x8c8] sm:$0xff]  ;;  %v1035_v34 = vld [vmem:[#allocation9 + $0x390] sm:$0xff] }
 0x24e   :  { %v4333_v42 = vpack.c.bf16 %v1202_v33, %v1194_v32  ;;  %v1107_v32 = vld [vmem:[#allocation9 + $0x5d0] sm:$0xff] }
 0x24f   :  { %4224 = vmatpush1.bf16.msra.mxu0 %v4223_v38  ;;  %v924_v38 = vld [vmem:[#allocation9 + $0x18] sm:$0xff] }
 0x250   :  { %4226 = vmatprep.subr.bf16.mxu0 %v4225_v39  ;;  %v932_v39 = vld [vmem:[#allocation9 + $0x58] sm:$0xff] }
 0x251   :  { %v4521_v41 = vpack.c.bf16 %v932_v39, %v924_v38  ;;  %v1052_v38 = vld [vmem:[#allocation9 + $0x418] sm:$0xff] }
 0x252   :  { %v1060_v39 = vld [vmem:[#allocation9 + $0x458] sm:$0xff] }
 0x253   :  { %4228 = vmatpush1.bf16.msra.mxu0 %v4227_v44  ;;  %v940_v44 = vld [vmem:[#allocation9 + $0x98] sm:$0xff] }
 0x254   :  { %4230 = vmatprep.subr.bf16.mxu0 %v4229_v47  ;;  %v948_v47 = vld [vmem:[#allocation9 + $0xd8] sm:$0xff] }
 0x255   :  { %v4525_v50 = vpack.c.bf16 %v948_v47, %v940_v44  ;;  %v1201_v44 = vld [vmem:[#allocation9 + $0x8c0] sm:$0xff] }
 0x256   :  { %v4335_v58 = vpack.c.bf16 %v1201_v44, %v1193_v43  ;;  %v1115_v44 = vld [vmem:[#allocation9 + $0x610] sm:$0xff] }
 0x257   :  { %4232 = vmatpush1.bf16.msra.mxu0 %v4231_v53  ;;  %v956_v53 = vld [vmem:[#allocation9 + $0x118] sm:$0xff] }
 0x258   :  { %4234 = vmatprep.subr.bf16.mxu0 %v4233_v54  ;;  %v964_v54 = vld [vmem:[#allocation9 + $0x158] sm:$0xff] }
 0x259   :  { %v4529_v56 = vpack.c.bf16 %v964_v54, %v956_v53  ;;  %v4553_v54 = vpack.c.bf16 %v1060_v39, %v1052_v38  ;;  %v1265_v38 = vld [vmem:[#allocation9 + $0xac0] sm:$0xff] }
 0x25b   :  { %4236 = vmatpush1.bf16.msra.mxu0 %v4235_v60  ;;  %v972_v60 = vld [vmem:[#allocation9 + $0x198] sm:$0xff] }
 0x25c   :  { %4238 = vmatprep.subr.bf16.mxu0 %v4237_v61  ;;  %v980_v61 = vld [vmem:[#allocation9 + $0x1d8] sm:$0xff] }
 0x25d   :  { %v4533_v0 = vpack.c.bf16 %v980_v61, %v972_v60  ;;  %v1068_v60 = vld [vmem:[#allocation9 + $0x498] sm:$0xff] }
 0x25e   :  { %v1076_v61 = vld [vmem:[#allocation9 + $0x4d8] sm:$0xff] }
 0x25f   :  { %4240 = vmatpush1.bf16.msra.mxu0 %v4239_v3  ;;  %v988_v3 = vld [vmem:[#allocation9 + $0x218] sm:$0xff] }
 0x260   :  { %4242 = vmatprep.subr.bf16.mxu0 %v4241_v4 }
 0x263   :  { %4244 = vmatpush1.bf16.msra.mxu0 %v4243_v11  ;;  %v4539_v11 = vpack.c.bf16 %v995_v6, %v987_v5  ;;  %v1067_v5 = vld [vmem:[#allocation9 + $0x490] sm:$0xff] }
 0x264   :  { %4246 = vmatprep.subr.bf16.mxu0 %v4245_v12  ;;  %v6248_v12 = vld [vmem:[#allocation7] sm:$0xff]  ;;  %v1075_v6 = vld [vmem:[#allocation9 + $0x4d0] sm:$0xff] }
 0x265   :  { %v4559_v15 = vpack.c.bf16 %v1075_v6, %v1067_v5  ;;  %v1306_v6 = vld [vmem:[#allocation9 + $0xc08] sm:$0xff] }
 0x267   :  { %4248 = vmatpush1.bf16.msra.mxu0 %v4247_v17  ;;  %v560_v17 = vrot.slane %v6248_v12, %v6217_v46 }
 0x268   :  { %4250 = vmatprep.subr.bf16.mxu0 %v4249_v18  ;;  %v564_v18 = vrot.slane %v6248_v12, %v6220_v48 }
 0x26b   :  { %4252 = vmatpush1.bf16.msra.mxu0 %v4251_v23 }
 0x26c   :  { %4254 = vmatprep.subr.bf16.mxu0 %v4253_v24  ;;  %v1177_v24 = vld [vmem:[#allocation9 + $0x800] sm:$0xff] }
 0x26d   :  { %v4331_v36 = vpack.c.bf16 %v1185_v27, %v1177_v24 }
 0x26f   :  { %4256 = vmatpush1.bf16.msra.mxu0 %v4255_v29  ;;  %v1044_v29 = vld [vmem:[#allocation9 + $0x3d8] sm:$0xff] }
 0x270   :  { %4258 = vmatprep.subr.bf16.mxu0 %v4257_v30  ;;  %v4549_v37 = vpack.c.bf16 %v1044_v29, %v1036_v28  ;;  %v1258_v28 = vld [vmem:[#allocation9 + $0xa88] sm:$0xff] }
 0x271   :  { %v1266_v29 = vld [vmem:[#allocation9 + $0xac8] sm:$0xff] }
 0x273   :  { %4260 = vmatpush1.bf16.msra.mxu0 %v4259_v59  ;;  %v1043_v59 = vld [vmem:[#allocation9 + $0x3d0] sm:$0xff] }
 0x274   :  { %4262 = vmatprep.subr.bf16.mxu0 %v4261_v35 }
 0x277   :  { %4264 = vmatpush1.bf16.msra.mxu0 %v4263_v40 }
 0x278   :  { %4522 = vmatprep.subr.bf16.mxu0 %v4521_v41 }
 0x27a   :  { %893 = vmatmul.mubr.f32.vlgmr.msra.gmra.mrb[12].mxu0 %v6226_v62  ;;  %v996_v62 = vld [vmem:[#allocation9 + $0x258] sm:$0xff] }
 0x27b   :  { %898 = vmatprep.mubr.f32.mxu0 %v6232_v8  ;;  %4524 = vmatpush1.bf16.msra.mxu0 %v4523_v49  ;;  %v4535_v8 = vpack.c.bf16 %v979_v2, %v971_v1  ;;  %v4537_v4 = vpack.c.bf16 %v996_v62, %v988_v3  ;;  %v1209_v1 = vld [vmem:[#allocation9 + $0x900] sm:$0xff]  ;;  %v1226_v62 = vld [vmem:[#allocation9 + $0x988] sm:$0xff] }
 0x27c   :  { %4526 = vmatprep.subr.bf16.mxu0 %v4525_v50  ;;  %v4551_v50 = vpack.c.bf16 %v1043_v59, %v1035_v34  ;;  %v1217_v2 = vld [vmem:[#allocation9 + $0x940] sm:$0xff]  ;;  %v1116_v34 = vld [vmem:[#allocation9 + $0x618] sm:$0xff] }
 0x27d   :  { %v1124_v59 = vld [vmem:[#allocation9 + $0x658] sm:$0xff] }
 0x27e   :  { %899 = vmatmul.mubr.f32.gmra.mrb[14].mxu0 %v6229_v7  ;;  %v4541_v7 = vpack.c.bf16 %v1012_v10, %v1004_v9  ;;  %v4339_v9 = vpack.c.bf16 %v1217_v2, %v1209_v1  ;;  %v1084_v10 = vld [vmem:[#allocation9 + $0x518] sm:$0xff]  ;;  %v4569_v43 = vpack.c.bf16 %v1124_v59, %v1116_v34  ;;  %v1179_v59 = vld [vmem:[#allocation9 + $0x810] sm:$0xff] }
 0x27f   :  { %4528 = vmatpush1.bf16.msra.mxu0 %v4527_v55  ;;  %v1051_v55 = vld [vmem:[#allocation9 + $0x410] sm:$0xff]  ;;  %v1148_v2 = vld [vmem:[#allocation9 + $0x718] sm:$0xff] }
 0x280   :  { %4530 = vmatprep.subr.bf16.mxu0 %v4529_v56  ;;  %v1059_v56 = vld [vmem:[#allocation9 + $0x450] sm:$0xff] }
 0x281   :  { %v4555_v3 = vpack.c.bf16 %v1059_v56, %v1051_v55  ;;  %v1290_v56 = vld [vmem:[#allocation9 + $0xb88] sm:$0xff] }
 0x283   :  { %4532 = vmatpush1.bf16.msra.mxu0 %v4531_v63 }
 0x284   :  { %4534 = vmatprep.subr.bf16.mxu0 %v4533_v0  ;;  %v4337_v0 = vpack.c.bf16 %v1218_v52, %v1210_v51  ;;  %v1140_v51 = vld [vmem:[#allocation9 + $0x6d8] sm:$0xff] }
 0x287   :  { %4536 = vmatpush1.bf16.msra.mxu0 %v4535_v8  ;;  %v1234_v8 = vld [vmem:[#allocation9 + $0x9c8] sm:$0xff] }
 0x288   :  { %4538 = vmatprep.subr.bf16.mxu0 %v4537_v4  ;;  %v4557_v4 = vpack.c.bf16 %v1076_v61, %v1068_v60  ;;  %v1131_v61 = vld [vmem:[#allocation9 + $0x690] sm:$0xff] }
 0x28b   :  { %4540 = vmatpush1.bf16.msra.mxu0 %v4539_v11  ;;  %v1092_v11 = vld [vmem:[#allocation9 + $0x558] sm:$0xff] }
 0x28c   :  { %4542 = vmatprep.subr.bf16.mxu0 %v4541_v7  ;;  %v4341_v7 = vpack.c.bf16 %v1234_v8, %v1226_v62  ;;  %v1289_v8 = vld [vmem:[#allocation9 + $0xb80] sm:$0xff] }
 0x28d   :  { %v663_v23 = vpop.f32.mrb[0].mxu0 }
 0x28e   :  { %v664_v25 = vadd.f32 %v663_v23, %v560_v17  ;;  %v665_v26 = vpop.f32.mrb[1].mxu0  ;;  %v1108_v23 = vld [vmem:[#allocation9 + $0x5d8] sm:$0xff] }
 0x28f   :  { %v666_v30 = vadd.f32 %v665_v26, %v564_v18  ;;  %4544 = vmatpush1.bf16.msra.mxu0 %v4543_v19  ;;  %v1083_v19 = vld [vmem:[#allocation9 + $0x510] sm:$0xff]  ;;  %v1249_v26 = vld [vmem:[#allocation9 + $0xa40] sm:$0xff] }
 0x290   :  { %4546 = vmatprep.subr.bf16.mxu0 %v4545_v20  ;;  %v6256_v41 = vmax.f32 %v664_v25, 0.0  ;;  %v1091_v20 = vld [vmem:[#allocation9 + $0x550] sm:$0xff]  ;;  %v1241_v25 = vld [vmem:[#allocation9 + $0xa00] sm:$0xff] }
 0x291   :  { %v6254_v35 = vmax.f32 %v666_v30, 0.0  ;;  %v669_v40 = vpop.f32.mrb[2].mxu0  ;;  %v4563_v27 = vpack.c.bf16 %v1091_v20, %v1083_v19  ;;  %v4565_v30 = vpack.c.bf16 %v1108_v23, %v1100_v22  ;;  %v4347_v33 = vpack.c.bf16 %v1249_v26, %v1241_v25  ;;  %v1322_v20 = vld [vmem:[#allocation9 + $0xc88] sm:$0xff]  ;;  %v1163_v23 = vld [vmem:[#allocation9 + $0x790] sm:$0xff]  ;;  %v1180_v26 = vld [vmem:[#allocation9 + $0x818] sm:$0xff] }
 0x292   :  { %v670_v47 = vadd.f32 %v669_v40, %v560_v17  ;;  %v671_v49 = vpop.f32.mrb[3].mxu0  ;;  %v1250_v17 = vld [vmem:[#allocation9 + $0xa48] sm:$0xff] }
 0x293   :  { %4548 = vmatpush1.bf16.msra.mxu0 %v4547_v31  ;;  %2051 = vmatprep.mubr.f32.mxu1 %v6254_v35  ;;  %v672_v53 = vadd.f32 %v671_v49, %v564_v18  ;;  %v4561_v18 = vpack.c.bf16 %v1092_v11, %v1084_v10  ;;  %v4345_v24 = vpack.c.bf16 %v1250_v17, %v1242_v16  ;;  %v1099_v31 = vld [vmem:[#allocation9 + $0x590] sm:$0xff]  ;;  %v1274_v40 = vld [vmem:[#allocation9 + $0xb08] sm:$0xff]  ;;  %v1305_v17 = vld [vmem:[#allocation9 + $0xc00] sm:$0xff] }
 0x294   :  { %2359 = vmatprep.mubr.f32.mxu0 %v6254_v35  ;;  %2052 = vmatmul.mubr.f32.vlgmr.msra.gmra.mrb[4].mxu1 %v6256_v41  ;;  %v6261_v57 = vmax.f32 %v670_v47, 0.0  ;;  %v4567_v39 = vpack.c.bf16 %v1107_v32, %v1099_v31  ;;  %v1123_v47 = vld [vmem:[#allocation9 + $0x650] sm:$0xff]  ;;  %v1338_v32 = vld [vmem:[#allocation9 + $0xd08] sm:$0xff] }
 0x295   :  { %4332 = vmatpush1.bf16.msra.mxu1 %v4331_v36  ;;  %4550 = vmatprep.subr.bf16.mxu0 %v4549_v37  ;;  %v6263_v63 = vmax.f32 %v672_v53, 0.0  ;;  %v4349_v36 = vpack.c.bf16 %v1266_v29, %v1258_v28  ;;  %v1257_v37 = vld [vmem:[#allocation9 + $0xa80] sm:$0xff]  ;;  %v4571_v55 = vpack.c.bf16 %v1123_v47, %v1115_v44  ;;  %v1147_v11 = vld [vmem:[#allocation9 + $0x710] sm:$0xff]  ;;  %v1354_v47 = vld [vmem:[#allocation9 + $0xd88] sm:$0xff] }
 0x296   :  { %4334 = vmatprep.subr.bf16.mxu1 %v4333_v42  ;;  %v1282_v42 = vld [vmem:[#allocation9 + $0xb48] sm:$0xff]  ;;  %v4351_v49 = vpack.c.bf16 %v1265_v38, %v1257_v37  ;;  %v1273_v53 = vld [vmem:[#allocation9 + $0xb00] sm:$0xff]  ;;  %v1196_v38 = vld [vmem:[#allocation9 + $0x898] sm:$0xff] }
 0x297   :  { %4552 = vmatpush1.bf16.msra.mxu0 %v4551_v50  ;;  %2057 = vmatprep.mubr.f32.mxu1 %v6263_v63  ;;  %v1132_v50 = vld [vmem:[#allocation9 + $0x698] sm:$0xff]  ;;  %v4353_v52 = vpack.c.bf16 %v1282_v42, %v1274_v40  ;;  %v1321_v29 = vld [vmem:[#allocation9 + $0xc80] sm:$0xff] }
 0x298   :  { %4554 = vmatprep.subr.bf16.mxu0 %v4553_v54  ;;  %2058 = vmatmul.mubr.f32.gmra.mrb[6].mxu1 %v6261_v57  ;;  %v1281_v54 = vld [vmem:[#allocation9 + $0xb40] sm:$0xff]  ;;  %v4573_v60 = vpack.c.bf16 %v1140_v51, %v1132_v50  ;;  %v1195_v51 = vld [vmem:[#allocation9 + $0x890] sm:$0xff] }
 0x299   :  { %4336 = vmatpush1.bf16.msra.mxu1 %v4335_v58  ;;  %v1298_v58 = vld [vmem:[#allocation9 + $0xbc8] sm:$0xff]  ;;  %v4355_v1 = vpack.c.bf16 %v1281_v54, %v1273_v53  ;;  %v1337_v42 = vld [vmem:[#allocation9 + $0xd00] sm:$0xff]  ;;  %v1212_v54 = vld [vmem:[#allocation9 + $0x918] sm:$0xff] }
 0x29a   :  { %4338 = vmatprep.subr.bf16.mxu1 %v4337_v0  ;;  %v1139_v0 = vld [vmem:[#allocation9 + $0x6d0] sm:$0xff]  ;;  %v4357_v62 = vpack.c.bf16 %v1298_v58, %v1290_v56  ;;  %v1353_v58 = vld [vmem:[#allocation9 + $0xd80] sm:$0xff] }
 0x29b   :  { %4556 = vmatpush1.bf16.msra.mxu0 %v4555_v3  ;;  %v1156_v3 = vld [vmem:[#allocation9 + $0x758] sm:$0xff]  ;;  %v4575_v5 = vpack.c.bf16 %v1139_v0, %v1131_v61  ;;  %v1370_v0 = vld [vmem:[#allocation9 + $0xe08] sm:$0xff] }
 0x29c   :  { %4558 = vmatprep.subr.bf16.mxu0 %v4557_v4  ;;  %v1297_v4 = vld [vmem:[#allocation9 + $0xbc0] sm:$0xff]  ;;  %v4577_v10 = vpack.c.bf16 %v1156_v3, %v1148_v2  ;;  %v1211_v3 = vld [vmem:[#allocation9 + $0x910] sm:$0xff] }
 0x29d   :  { %4340 = vmatpush1.bf16.msra.mxu1 %v4339_v9  ;;  %v1314_v9 = vld [vmem:[#allocation9 + $0xc48] sm:$0xff]  ;;  %v4359_v13 = vpack.c.bf16 %v1297_v4, %v1289_v8  ;;  %v1228_v4 = vld [vmem:[#allocation9 + $0x998] sm:$0xff] }
 0x29e   :  { %4342 = vmatprep.subr.bf16.mxu1 %v4341_v7  ;;  %v1155_v7 = vld [vmem:[#allocation9 + $0x750] sm:$0xff]  ;;  %v4361_v16 = vpack.c.bf16 %v1314_v9, %v1306_v6  ;;  %v1369_v9 = vld [vmem:[#allocation9 + $0xe00] sm:$0xff] }
 0x29f   :  { %4560 = vmatpush1.bf16.msra.mxu0 %v4559_v15  ;;  %v1172_v15 = vld [vmem:[#allocation9 + $0x7d8] sm:$0xff]  ;;  %v4579_v19 = vpack.c.bf16 %v1155_v7, %v1147_v11  ;;  %v1386_v7 = vld [vmem:[#allocation9 + $0xe88] sm:$0xff] }
 0x2a0   :  { %4562 = vmatprep.subr.bf16.mxu0 %v4561_v18  ;;  %v1313_v18 = vld [vmem:[#allocation9 + $0xc40] sm:$0xff]  ;;  %v4581_v22 = vpack.c.bf16 %v1172_v15, %v1164_v14  ;;  %v1227_v15 = vld [vmem:[#allocation9 + $0x990] sm:$0xff] }
 0x2a1   :  { %4344 = vmatpush1.bf16.msra.mxu1 %v4343_v21  ;;  %v1330_v21 = vld [vmem:[#allocation9 + $0xcc8] sm:$0xff]  ;;  %v4363_v25 = vpack.c.bf16 %v1313_v18, %v1305_v17  ;;  %v1244_v18 = vld [vmem:[#allocation9 + $0xa18] sm:$0xff] }
 0x2a2   :  { %4346 = vmatprep.subr.bf16.mxu1 %v4345_v24  ;;  %v1171_v24 = vld [vmem:[#allocation9 + $0x7d0] sm:$0xff]  ;;  %v4365_v28 = vpack.c.bf16 %v1330_v21, %v1322_v20  ;;  %v1385_v21 = vld [vmem:[#allocation9 + $0xe80] sm:$0xff] }
 0x2a3   :  { %4564 = vmatpush1.bf16.msra.mxu0 %v4563_v27  ;;  %v1188_v27 = vld [vmem:[#allocation9 + $0x858] sm:$0xff]  ;;  %v4583_v31 = vpack.c.bf16 %v1171_v24, %v1163_v23  ;;  %v1402_v24 = vld [vmem:[#allocation9 + $0xf08] sm:$0xff] }
 0x2a4   :  { %4566 = vmatprep.subr.bf16.mxu0 %v4565_v30  ;;  %v1329_v30 = vld [vmem:[#allocation9 + $0xcc0] sm:$0xff]  ;;  %v4585_v34 = vpack.c.bf16 %v1188_v27, %v1180_v26  ;;  %v1243_v27 = vld [vmem:[#allocation9 + $0xa10] sm:$0xff] }
 0x2a5   :  { %4348 = vmatpush1.bf16.msra.mxu1 %v4347_v33  ;;  %v1346_v33 = vld [vmem:[#allocation9 + $0xd48] sm:$0xff]  ;;  %v4367_v37 = vpack.c.bf16 %v1329_v30, %v1321_v29  ;;  %v1260_v30 = vld [vmem:[#allocation9 + $0xa98] sm:$0xff] }
 0x2a6   :  { %4350 = vmatprep.subr.bf16.mxu1 %v4349_v36  ;;  %v1187_v36 = vld [vmem:[#allocation9 + $0x850] sm:$0xff]  ;;  %v4369_v40 = vpack.c.bf16 %v1346_v33, %v1338_v32  ;;  %v567_v33 = vsub.s32 2, %v6214_v45 }
 0x2a7   :  { %4568 = vmatpush1.bf16.msra.mxu0 %v4567_v39  ;;  %v1204_v39 = vld [vmem:[#allocation9 + $0x8d8] sm:$0xff]  ;;  %v4587_v44 = vpack.c.bf16 %v1187_v36, %v1179_v59  ;;  %v1409_v59 = vld [vmem:[#allocation9 + $0xf40] sm:$0xff] }
 0x2a8   :  { %4570 = vmatprep.subr.bf16.mxu0 %v4569_v43  ;;  %v1345_v43 = vld [vmem:[#allocation9 + $0xd40] sm:$0xff]  ;;  %v4589_v50 = vpack.c.bf16 %v1204_v39, %v1196_v38  ;;  %v1418_v38 = vld [vmem:[#allocation9 + $0xf88] sm:$0xff] }
 0x2a9   :  { %4352 = vmatpush1.bf16.msra.mxu1 %v4351_v49  ;;  %v1362_v49 = vld [vmem:[#allocation9 + $0xdc8] sm:$0xff]  ;;  %v4371_v53 = vpack.c.bf16 %v1345_v43, %v1337_v42  ;;  %v1259_v42 = vld [vmem:[#allocation9 + $0xa90] sm:$0xff] }
 0x2aa   :  { %4354 = vmatprep.subr.bf16.mxu1 %v4353_v52  ;;  %v1203_v52 = vld [vmem:[#allocation9 + $0x8d0] sm:$0xff]  ;;  %v4373_v56 = vpack.c.bf16 %v1362_v49, %v1354_v47  ;;  %v1426_v39 = vld [vmem:[#allocation9 + $0xfc8] sm:$0xff]  ;;  %v1276_v47 = vld [vmem:[#allocation9 + $0xb18] sm:$0xff] }
 0x2ab   :  { %4572 = vmatpush1.bf16.msra.mxu0 %v4571_v55  ;;  %v1220_v55 = vld [vmem:[#allocation9 + $0x958] sm:$0xff]  ;;  %v4591_v61 = vpack.c.bf16 %v1203_v52, %v1195_v51  ;;  %v1267_v43 = vld [vmem:[#allocation9 + $0xad0] sm:$0xff]  ;;  %v4389_v51 = vpack.c.bf16 %v1426_v39, %v1418_v38  ;;  %v1417_v52 = vld [vmem:[#allocation9 + $0xf80] sm:$0xff] }
 0x2ac   :  { %4574 = vmatprep.subr.bf16.mxu0 %v4573_v60  ;;  %v1361_v60 = vld [vmem:[#allocation9 + $0xdc0] sm:$0xff]  ;;  %v4593_v2 = vpack.c.bf16 %v1220_v55, %v1212_v54  ;;  %v1284_v49 = vld [vmem:[#allocation9 + $0xb58] sm:$0xff]  ;;  %v4607_v55 = vpack.c.bf16 %v1267_v43, %v1259_v42 }
 0x2ad   :  { %4356 = vmatpush1.bf16.msra.mxu1 %v4355_v1  ;;  %v1378_v1 = vld [vmem:[#allocation9 + $0xe48] sm:$0xff]  ;;  %v4375_v8 = vpack.c.bf16 %v1361_v60, %v1353_v58  ;;  %v4609_v60 = vpack.c.bf16 %v1284_v49, %v1276_v47  ;;  %v1324_v38 = vld [vmem:[#allocation9 + $0xc98] sm:$0xff]  ;;  %v1465_v43 = vld [vmem:[#allocation9 + $0x1100] sm:$0xff] }
 0x2ae   :  { %4358 = vmatprep.subr.bf16.mxu1 %v4357_v62  ;;  %v1219_v62 = vld [vmem:[#allocation9 + $0x950] sm:$0xff]  ;;  %v4377_v6 = vpack.c.bf16 %v1378_v1, %v1370_v0  ;;  %v1442_v58 = vld [vmem:[#allocation9 + $0x1048] sm:$0xff]  ;;  %v1332_v39 = vld [vmem:[#allocation9 + $0xcd8] sm:$0xff] }
 0x2af   :  { %4576 = vmatpush1.bf16.msra.mxu0 %v4575_v5  ;;  %v1236_v5 = vld [vmem:[#allocation9 + $0x9d8] sm:$0xff]  ;;  %v4595_v11 = vpack.c.bf16 %v1219_v62, %v1211_v3  ;;  %v1283_v0 = vld [vmem:[#allocation9 + $0xb50] sm:$0xff]  ;;  %v1433_v3 = vld [vmem:[#allocation9 + $0x1000] sm:$0xff] }
 0x2b0   :  { %4578 = vmatprep.subr.bf16.mxu0 %v4577_v10  ;;  %v1377_v10 = vld [vmem:[#allocation9 + $0xe40] sm:$0xff]  ;;  %v4597_v14 = vpack.c.bf16 %v1236_v5, %v1228_v4  ;;  %v1482_v49 = vld [vmem:[#allocation9 + $0x1188] sm:$0xff] }
 0x2b1   :  { %4360 = vmatpush1.bf16.msra.mxu1 %v4359_v13  ;;  %v1394_v13 = vld [vmem:[#allocation9 + $0xec8] sm:$0xff]  ;;  %v4379_v17 = vpack.c.bf16 %v1377_v10, %v1369_v9  ;;  %v1441_v5 = vld [vmem:[#allocation9 + $0x1040] sm:$0xff]  ;;  %v1300_v9 = vld [vmem:[#allocation9 + $0xbd8] sm:$0xff] }
 0x2b2   :  { %4362 = vmatprep.subr.bf16.mxu1 %v4361_v16  ;;  %v1235_v16 = vld [vmem:[#allocation9 + $0x9d0] sm:$0xff]  ;;  %v4381_v20 = vpack.c.bf16 %v1394_v13, %v1386_v7  ;;  %v1458_v7 = vld [vmem:[#allocation9 + $0x10c8] sm:$0xff] }
 0x2b3   :  { %4580 = vmatpush1.bf16.msra.mxu0 %v4579_v19  ;;  %v1252_v19 = vld [vmem:[#allocation9 + $0xa58] sm:$0xff]  ;;  %v4599_v23 = vpack.c.bf16 %v1235_v16, %v1227_v15  ;;  %v1291_v13 = vld [vmem:[#allocation9 + $0xb90] sm:$0xff] }
 0x2b4   :  { %4582 = vmatprep.subr.bf16.mxu0 %v4581_v22  ;;  %v1393_v22 = vld [vmem:[#allocation9 + $0xec0] sm:$0xff]  ;;  %v4601_v26 = vpack.c.bf16 %v1252_v19, %v1244_v18  ;;  %v1308_v19 = vld [vmem:[#allocation9 + $0xc18] sm:$0xff] }
 0x2b5   :  { %4364 = vmatpush1.bf16.msra.mxu1 %v4363_v25  ;;  %v1410_v25 = vld [vmem:[#allocation9 + $0xf48] sm:$0xff]  ;;  %v4383_v29 = vpack.c.bf16 %v1393_v22, %v1385_v21 }
 0x2b6   :  { %4366 = vmatprep.subr.bf16.mxu1 %v4365_v28  ;;  %v1251_v28 = vld [vmem:[#allocation9 + $0xa50] sm:$0xff]  ;;  %v4385_v32 = vpack.c.bf16 %v1410_v25, %v1402_v24  ;;  %v1449_v25 = vld [vmem:[#allocation9 + $0x1080] sm:$0xff] }
 0x2b7   :  { %4584 = vmatpush1.bf16.msra.mxu0 %v4583_v31  ;;  %v1268_v31 = vld [vmem:[#allocation9 + $0xad8] sm:$0xff]  ;;  %v4603_v36 = vpack.c.bf16 %v1251_v28, %v1243_v27 }
 0x2b8   :  { %4586 = vmatprep.subr.bf16.mxu0 %v4585_v34  ;;  %v1401_v34 = vld [vmem:[#allocation9 + $0xf00] sm:$0xff] }
 0x2b9   :  { %4368 = vmatpush1.bf16.msra.mxu1 %v4367_v37  ;;  %v571_v37 = vsub.s32 3, %v6214_v45 }
 0x2ba   :  { %2360 = vmatmul.mubr.f32.vlgmr.msra.gmra.mrb[16].mxu0 %v6256_v41  ;;  %4370 = vmatprep.subr.bf16.mxu1 %v4369_v40  ;;  %v4605_v40 = vpack.c.bf16 %v1268_v31, %v1260_v30  ;;  %v1474_v30 = vld [vmem:[#allocation9 + $0x1148] sm:$0xff] }
 0x2bb   :  { %4588 = vmatpush1.bf16.msra.mxu0 %v4587_v44  ;;  %2365 = vmatprep.mubr.f32.mxu0 %v6263_v63  ;;  %v4387_v44 = vpack.c.bf16 %v1409_v59, %v1401_v34  ;;  %v572_v54 = vrot.slane %v6248_v12, %v571_v37  ;;  %v1315_v34 = vld [vmem:[#allocation9 + $0xc50] sm:$0xff] }
 0x2bc   :  { %4590 = vmatprep.subr.bf16.mxu0 %v4589_v50  ;;  %v568_v50 = vrot.slane %v6248_v12, %v567_v33 }
 0x2bd   :  { %4372 = vmatpush1.bf16.msra.mxu1 %v4371_v53  ;;  %v1425_v53 = vld [vmem:[#allocation9 + $0xfc0] sm:$0xff] }
 0x2be   :  { %4374 = vmatprep.subr.bf16.mxu1 %v4373_v56  ;;  %2366 = vmatmul.mubr.f32.gmra.mrb[18].mxu0 %v6261_v57  ;;  %v1434_v56 = vld [vmem:[#allocation9 + $0x1008] sm:$0xff] }
 0x2bf   :  { %4592 = vmatpush1.bf16.msra.mxu0 %v4591_v61  ;;  %v1275_v61 = vld [vmem:[#allocation9 + $0xb10] sm:$0xff]  ;;  %v4393_v4 = vpack.c.bf16 %v1442_v58, %v1434_v56  ;;  %v1348_v56 = vld [vmem:[#allocation9 + $0xd58] sm:$0xff] }
 0x2c0   :  { %4594 = vmatprep.subr.bf16.mxu0 %v4593_v2  ;;  %v4391_v2 = vpack.c.bf16 %v1425_v53, %v1417_v52  ;;  %v4611_v12 = vpack.c.bf16 %v1283_v0, %v1275_v61  ;;  %v1323_v52 = vld [vmem:[#allocation9 + $0xc90] sm:$0xff]  ;;  %v1489_v61 = vld [vmem:[#allocation9 + $0x11c0] sm:$0xff] }
 0x2c1   :  { %4376 = vmatpush1.bf16.msra.mxu1 %v4375_v8  ;;  %v1331_v53 = vld [vmem:[#allocation9 + $0xcd0] sm:$0xff] }
 0x2c2   :  { %4378 = vmatprep.subr.bf16.mxu1 %v4377_v6  ;;  %v1292_v6 = vld [vmem:[#allocation9 + $0xb98] sm:$0xff]  ;;  %v4623_v0 = vpack.c.bf16 %v1331_v53, %v1323_v52 }
 0x2c3   :  { %4596 = vmatpush1.bf16.msra.mxu0 %v4595_v11  ;;  %v1450_v11 = vld [vmem:[#allocation9 + $0x1088] sm:$0xff]  ;;  %v4613_v18 = vpack.c.bf16 %v1300_v9, %v1292_v6  ;;  %v1364_v6 = vld [vmem:[#allocation9 + $0xdd8] sm:$0xff] }
 0x2c4   :  { %4598 = vmatprep.subr.bf16.mxu0 %v4597_v14  ;;  %v1299_v14 = vld [vmem:[#allocation9 + $0xbd0] sm:$0xff]  ;;  %v4397_v24 = vpack.c.bf16 %v1458_v7, %v1450_v11  ;;  %v1514_v7 = vld [vmem:[#allocation9 + $0x1288] sm:$0xff]  ;;  %v1404_v52 = vld [vmem:[#allocation9 + $0xf18] sm:$0xff] }
 0x2c5   :  { %4380 = vmatpush1.bf16.msra.mxu1 %v4379_v17  ;;  %v4395_v17 = vpack.c.bf16 %v1441_v5, %v1433_v3  ;;  %v4615_v28 = vpack.c.bf16 %v1299_v14, %v1291_v13  ;;  %v1356_v5 = vld [vmem:[#allocation9 + $0xd98] sm:$0xff]  ;;  %v1522_v13 = vld [vmem:[#allocation9 + $0x12c8] sm:$0xff] }
 0x2c6   :  { %4382 = vmatprep.subr.bf16.mxu1 %v4381_v20  ;;  %v1316_v20 = vld [vmem:[#allocation9 + $0xc58] sm:$0xff]  ;;  %v4629_v14 = vpack.c.bf16 %v1364_v6, %v1356_v5  ;;  %v1561_v5 = vld [vmem:[#allocation9 + $0x1400] sm:$0xff] }
 0x2c7   :  { %4600 = vmatpush1.bf16.msra.mxu0 %v4599_v23  ;;  %v4617_v31 = vpack.c.bf16 %v1316_v20, %v1308_v19  ;;  %v1372_v19 = vld [vmem:[#allocation9 + $0xe18] sm:$0xff]  ;;  %v1569_v6 = vld [vmem:[#allocation9 + $0x1440] sm:$0xff] }
 0x2c8   :  { %4602 = vmatprep.subr.bf16.mxu0 %v4601_v26  ;;  %v1457_v26 = vld [vmem:[#allocation9 + $0x10c0] sm:$0xff]  ;;  %v1380_v20 = vld [vmem:[#allocation9 + $0xe58] sm:$0xff] }
 0x2c9   :  { %4384 = vmatpush1.bf16.msra.mxu1 %v4383_v29  ;;  %v1466_v29 = vld [vmem:[#allocation9 + $0x1108] sm:$0xff]  ;;  %v1412_v53 = vld [vmem:[#allocation9 + $0xf58] sm:$0xff] }
 0x2ca   :  { %4386 = vmatprep.subr.bf16.mxu1 %v4385_v32  ;;  %v1307_v32 = vld [vmem:[#allocation9 + $0xc10] sm:$0xff]  ;;  %v4401_v42 = vpack.c.bf16 %v1474_v30, %v1466_v29 }
 0x2cb   :  { %4604 = vmatpush1.bf16.msra.mxu0 %v4603_v36  ;;  %v4399_v36 = vpack.c.bf16 %v1457_v26, %v1449_v25  ;;  %v4619_v47 = vpack.c.bf16 %v1315_v34, %v1307_v32  ;;  %v1530_v26 = vld [vmem:[#allocation9 + $0x1308] sm:$0xff]  ;;  %v1371_v29 = vld [vmem:[#allocation9 + $0xe10] sm:$0xff]  ;;  %v1388_v32 = vld [vmem:[#allocation9 + $0xe98] sm:$0xff] }
 0x2cc   :  { %4606 = vmatprep.subr.bf16.mxu0 %v4605_v40  ;;  %v1379_v30 = vld [vmem:[#allocation9 + $0xe50] sm:$0xff]  ;;  %v1396_v34 = vld [vmem:[#allocation9 + $0xed8] sm:$0xff] }
 0x2cd   :  { %v740_v1 = vpop.f32.mrb[4].mxu0  ;;  %4388 = vmatpush1.bf16.msra.mxu1 %v4387_v44  ;;  %v1473_v44 = vld [vmem:[#allocation9 + $0x1140] sm:$0xff] }
 0x2ce   :  { %v741_v62 = vadd.f32 %v740_v1, %v568_v50  ;;  %v742_v8 = vpop.f32.mrb[5].mxu0  ;;  %4390 = vmatprep.subr.bf16.mxu1 %v4389_v51  ;;  %v4621_v51 = vpack.c.bf16 %v1332_v39, %v1324_v38  ;;  %v1498_v1 = vld [vmem:[#allocation9 + $0x1208] sm:$0xff]  ;;  %v1529_v38 = vld [vmem:[#allocation9 + $0x1300] sm:$0xff] }
 0x2cf   :  { %v743_v10 = vadd.f32 %v742_v8, %v572_v54  ;;  %4608 = vmatpush1.bf16.msra.mxu0 %v4607_v55  ;;  %v1340_v55 = vld [vmem:[#allocation9 + $0xd18] sm:$0xff]  ;;  %v1347_v8 = vld [vmem:[#allocation9 + $0xd50] sm:$0xff]  ;;  %v1537_v39 = vld [vmem:[#allocation9 + $0x1340] sm:$0xff] }
 0x2d0   :  { %4610 = vmatprep.subr.bf16.mxu0 %v4609_v60  ;;  %v6280_v21 = vmax.f32 %v741_v62, 0.0  ;;  %v1481_v60 = vld [vmem:[#allocation9 + $0x1180] sm:$0xff]  ;;  %v4625_v3 = vpack.c.bf16 %v1348_v56, %v1340_v55  ;;  %v1339_v62 = vld [vmem:[#allocation9 + $0xd10] sm:$0xff] }
 0x2d1   :  { %v6278_v15 = vmax.f32 %v743_v10, 0.0  ;;  %v746_v16 = vpop.f32.mrb[6].mxu0  ;;  %4392 = vmatpush1.bf16.msra.mxu1 %v4391_v2  ;;  %v1506_v2 = vld [vmem:[#allocation9 + $0x1248] sm:$0xff]  ;;  %v1497_v10 = vld [vmem:[#allocation9 + $0x1200] sm:$0xff]  ;;  %v4627_v11 = vpack.c.bf16 %v1347_v8, %v1339_v62  ;;  %v1420_v62 = vld [vmem:[#allocation9 + $0xf98] sm:$0xff] }
 0x2d2   :  { %v747_v22 = vadd.f32 %v746_v16, %v568_v50  ;;  %v748_v23 = vpop.f32.mrb[7].mxu0  ;;  %4394 = vmatprep.subr.bf16.mxu1 %v4393_v4  ;;  %v1490_v50 = vld [vmem:[#allocation9 + $0x11c8] sm:$0xff]  ;;  %v4407_v4 = vpack.c.bf16 %v1489_v61, %v1481_v60  ;;  %v4409_v9 = vpack.c.bf16 %v1506_v2, %v1498_v1  ;;  %v1355_v16 = vld [vmem:[#allocation9 + $0xd90] sm:$0xff]  ;;  %v1545_v55 = vld [vmem:[#allocation9 + $0x1380] sm:$0xff] }
 0x2d3   :  { %v749_v27 = vadd.f32 %v748_v23, %v572_v54  ;;  %2128 = vmatprep.mubr.f32.mxu1 %v6278_v15  ;;  %4612 = vmatpush1.bf16.msra.mxu0 %v4611_v12  ;;  %v4403_v54 = vpack.c.bf16 %v1473_v44, %v1465_v43  ;;  %v4405_v58 = vpack.c.bf16 %v1490_v50, %v1482_v49  ;;  %v1505_v12 = vld [vmem:[#allocation9 + $0x1240] sm:$0xff]  ;;  %v1546_v43 = vld [vmem:[#allocation9 + $0x1388] sm:$0xff]  ;;  %v1387_v49 = vld [vmem:[#allocation9 + $0xe90] sm:$0xff] }
 0x2d4   :  { %2436 = vmatprep.mubr.f32.mxu0 %v6278_v15  ;;  %2129 = vmatmul.mubr.f32.vlgmr.msra.gmra.mrb[4].mxu1 %v6280_v21  ;;  %v6287_v40 = vmax.f32 %v747_v22, 0.0  ;;  %v4413_v22 = vpack.c.bf16 %v1522_v13, %v1514_v7  ;;  %v1513_v23 = vld [vmem:[#allocation9 + $0x1280] sm:$0xff]  ;;  %v1554_v44 = vld [vmem:[#allocation9 + $0x13c8] sm:$0xff]  ;;  %v1395_v50 = vld [vmem:[#allocation9 + $0xed0] sm:$0xff] }
 0x2d5   :  { %v6285_v59 = vmax.f32 %v749_v27, 0.0  ;;  %4396 = vmatpush1.bf16.msra.mxu1 %v4395_v17  ;;  %4614 = vmatprep.subr.bf16.mxu0 %v4613_v18  ;;  %v1363_v17 = vld [vmem:[#allocation9 + $0xdd0] sm:$0xff]  ;;  %v4411_v18 = vpack.c.bf16 %v1505_v12, %v1497_v10  ;;  %v1538_v27 = vld [vmem:[#allocation9 + $0x1348] sm:$0xff]  ;;  %v1553_v56 = vld [vmem:[#allocation9 + $0x13c0] sm:$0xff] }
 0x2d6   :  { %4398 = vmatprep.subr.bf16.mxu1 %v4397_v24  ;;  %v1521_v24 = vld [vmem:[#allocation9 + $0x12c0] sm:$0xff]  ;;  %v4631_v25 = vpack.c.bf16 %v1363_v17, %v1355_v16  ;;  %v1562_v60 = vld [vmem:[#allocation9 + $0x1408] sm:$0xff]  ;;  %v1403_v1 = vld [vmem:[#allocation9 + $0xf10] sm:$0xff] }
 0x2d7   :  { %2134 = vmatprep.mubr.f32.mxu1 %v6285_v59  ;;  %4616 = vmatpush1.bf16.msra.mxu0 %v4615_v28  ;;  %v4633_v28 = vpack.c.bf16 %v1380_v20, %v1372_v19  ;;  %v1570_v61 = vld [vmem:[#allocation9 + $0x1448] sm:$0xff]  ;;  %v1411_v2 = vld [vmem:[#allocation9 + $0xf50] sm:$0xff]  ;;  %v1428_v8 = vld [vmem:[#allocation9 + $0xfd8] sm:$0xff] }
 0x2d8   :  { %2135 = vmatmul.mubr.f32.gmra.mrb[6].mxu1 %v6287_v40  ;;  %4618 = vmatprep.subr.bf16.mxu0 %v4617_v31  ;;  %v4415_v31 = vpack.c.bf16 %v1521_v24, %v1513_v23  ;;  %v1578_v10 = vld [vmem:[#allocation9 + $0x1488] sm:$0xff]  ;;  %v1419_v7 = vld [vmem:[#allocation9 + $0xf90] sm:$0xff]  ;;  %v1436_v16 = vld [vmem:[#allocation9 + $0x1018] sm:$0xff] }
 0x2d9   :  { %4400 = vmatpush1.bf16.msra.mxu1 %v4399_v36  ;;  %v4417_v36 = vpack.c.bf16 %v1538_v27, %v1530_v26  ;;  %v1586_v12 = vld [vmem:[#allocation9 + $0x14c8] sm:$0xff]  ;;  %v1427_v13 = vld [vmem:[#allocation9 + $0xfd0] sm:$0xff]  ;;  %v1444_v17 = vld [vmem:[#allocation9 + $0x1058] sm:$0xff] }
 0x2da   :  { %4402 = vmatprep.subr.bf16.mxu1 %v4401_v42  ;;  %v4635_v42 = vpack.c.bf16 %v1379_v30, %v1371_v29  ;;  %v1577_v19 = vld [vmem:[#allocation9 + $0x1480] sm:$0xff]  ;;  %v1594_v23 = vld [vmem:[#allocation9 + $0x1508] sm:$0xff]  ;;  %v1435_v26 = vld [vmem:[#allocation9 + $0x1010] sm:$0xff] }
 0x2db   :  { %4620 = vmatpush1.bf16.msra.mxu0 %v4619_v47  ;;  %v4637_v47 = vpack.c.bf16 %v1396_v34, %v1388_v32  ;;  %v1585_v20 = vld [vmem:[#allocation9 + $0x14c0] sm:$0xff]  ;;  %v1602_v24 = vld [vmem:[#allocation9 + $0x1548] sm:$0xff]  ;;  %v1443_v27 = vld [vmem:[#allocation9 + $0x1050] sm:$0xff] }
 0x2dc   :  { %4622 = vmatprep.subr.bf16.mxu0 %v4621_v51  ;;  %v4419_v51 = vpack.c.bf16 %v1537_v39, %v1529_v38  ;;  %v1452_v29 = vld [vmem:[#allocation9 + $0x1098] sm:$0xff]  ;;  %v1593_v32 = vld [vmem:[#allocation9 + $0x1500] sm:$0xff]  ;;  %v1610_v38 = vld [vmem:[#allocation9 + $0x1588] sm:$0xff] }
 0x2dd   :  { %4404 = vmatpush1.bf16.msra.mxu1 %v4403_v54  ;;  %v4421_v54 = vpack.c.bf16 %v1554_v44, %v1546_v43  ;;  %v1460_v30 = vld [vmem:[#allocation9 + $0x10d8] sm:$0xff]  ;;  %v1601_v34 = vld [vmem:[#allocation9 + $0x1540] sm:$0xff]  ;;  %v1618_v39 = vld [vmem:[#allocation9 + $0x15c8] sm:$0xff] }
 0x2de   :  { %4406 = vmatprep.subr.bf16.mxu1 %v4405_v58  ;;  %v4639_v58 = vpack.c.bf16 %v1395_v50, %v1387_v49  ;;  %v1451_v43 = vld [vmem:[#allocation9 + $0x1090] sm:$0xff]  ;;  %v1468_v49 = vld [vmem:[#allocation9 + $0x1118] sm:$0xff] }
 0x2df   :  { %4624 = vmatpush1.bf16.msra.mxu0 %v4623_v0  ;;  %v4641_v0 = vpack.c.bf16 %v1412_v53, %v1404_v52  ;;  %v1459_v44 = vld [vmem:[#allocation9 + $0x10d0] sm:$0xff]  ;;  %v1476_v50 = vld [vmem:[#allocation9 + $0x1158] sm:$0xff]  ;;  %v1609_v52 = vld [vmem:[#allocation9 + $0x1580] sm:$0xff] }
 0x2e0   :  { %4626 = vmatprep.subr.bf16.mxu0 %v4625_v3  ;;  %v4423_v3 = vpack.c.bf16 %v1553_v56, %v1545_v55  ;;  %v1617_v53 = vld [vmem:[#allocation9 + $0x15c0] sm:$0xff]  ;;  %v1626_v55 = vld [vmem:[#allocation9 + $0x1608] sm:$0xff] }
 0x2e1   :  { %4408 = vmatpush1.bf16.msra.mxu1 %v4407_v4  ;;  %v4425_v4 = vpack.c.bf16 %v1570_v61, %v1562_v60  ;;  %v1634_v56 = vld [vmem:[#allocation9 + $0x1648] sm:$0xff]  ;;  %v1467_v60 = vld [vmem:[#allocation9 + $0x1110] sm:$0xff] }
 0x2e2   :  { %4410 = vmatprep.subr.bf16.mxu1 %v4409_v9  ;;  %v4643_v9 = vpack.c.bf16 %v1411_v2, %v1403_v1  ;;  %v1475_v61 = vld [vmem:[#allocation9 + $0x1150] sm:$0xff]  ;;  %v1484_v1 = vld [vmem:[#allocation9 + $0x1198] sm:$0xff] }
 0x2e3   :  { %4628 = vmatpush1.bf16.msra.mxu0 %v4627_v11  ;;  %v4645_v11 = vpack.c.bf16 %v1428_v8, %v1420_v62  ;;  %v1492_v2 = vld [vmem:[#allocation9 + $0x11d8] sm:$0xff]  ;;  %v1625_v62 = vld [vmem:[#allocation9 + $0x1600] sm:$0xff] }
 0x2e4   :  { %4630 = vmatprep.subr.bf16.mxu0 %v4629_v14  ;;  %v4427_v14 = vpack.c.bf16 %v1569_v6, %v1561_v5  ;;  %v1633_v8 = vld [vmem:[#allocation9 + $0x1640] sm:$0xff]  ;;  %v1642_v5 = vld [vmem:[#allocation9 + $0x1688] sm:$0xff] }
 0x2e5   :  { %4412 = vmatpush1.bf16.msra.mxu1 %v4411_v18  ;;  %v4429_v18 = vpack.c.bf16 %v1586_v12, %v1578_v10  ;;  %v1650_v6 = vld [vmem:[#allocation9 + $0x16c8] sm:$0xff]  ;;  %v1483_v10 = vld [vmem:[#allocation9 + $0x1190] sm:$0xff] }
 0x2e6   :  { %4414 = vmatprep.subr.bf16.mxu1 %v4413_v22  ;;  %v4647_v22 = vpack.c.bf16 %v1427_v13, %v1419_v7  ;;  %v1491_v12 = vld [vmem:[#allocation9 + $0x11d0] sm:$0xff]  ;;  %v1500_v7 = vld [vmem:[#allocation9 + $0x1218] sm:$0xff] }
 0x2e7   :  { %4632 = vmatpush1.bf16.msra.mxu0 %v4631_v25  ;;  %v4649_v25 = vpack.c.bf16 %v1444_v17, %v1436_v16  ;;  %v1508_v13 = vld [vmem:[#allocation9 + $0x1258] sm:$0xff]  ;;  %v1641_v16 = vld [vmem:[#allocation9 + $0x1680] sm:$0xff] }
 0x2e8   :  { %4634 = vmatprep.subr.bf16.mxu0 %v4633_v28  ;;  %v4431_v28 = vpack.c.bf16 %v1585_v20, %v1577_v19  ;;  %v1649_v17 = vld [vmem:[#allocation9 + $0x16c0] sm:$0xff]  ;;  %v1658_v19 = vld [vmem:[#allocation9 + $0x1708] sm:$0xff] }
 0x2e9   :  { %4416 = vmatpush1.bf16.msra.mxu1 %v4415_v31  ;;  %v4433_v31 = vpack.c.bf16 %v1602_v24, %v1594_v23  ;;  %v1666_v20 = vld [vmem:[#allocation9 + $0x1748] sm:$0xff]  ;;  %v1499_v23 = vld [vmem:[#allocation9 + $0x1210] sm:$0xff] }
 0x2ea   :  { %4418 = vmatprep.subr.bf16.mxu1 %v4417_v36  ;;  %v4651_v36 = vpack.c.bf16 %v1443_v27, %v1435_v26  ;;  %v1507_v24 = vld [vmem:[#allocation9 + $0x1250] sm:$0xff]  ;;  %v1516_v26 = vld [vmem:[#allocation9 + $0x1298] sm:$0xff] }
 0x2eb   :  { %4636 = vmatpush1.bf16.msra.mxu0 %v4635_v42  ;;  %v4653_v42 = vpack.c.bf16 %v1460_v30, %v1452_v29  ;;  %v1524_v27 = vld [vmem:[#allocation9 + $0x12d8] sm:$0xff]  ;;  %v575_v29 = vsub.s32 4, %v6214_v45  ;;  %v1657_v30 = vld [vmem:[#allocation9 + $0x1700] sm:$0xff] }
 0x2ec   :  { %4638 = vmatprep.subr.bf16.mxu0 %v4637_v47  ;;  %v4435_v47 = vpack.c.bf16 %v1601_v34, %v1593_v32  ;;  %v4667_v32 = vpack.c.bf16 %v1507_v24, %v1499_v23  ;;  %v579_v34 = vsub.s32 5, %v6214_v45  ;;  %v1572_v23 = vld [vmem:[#allocation9 + $0x1458] sm:$0xff] }
 0x2ed   :  { %4420 = vmatpush1.bf16.msra.mxu1 %v4419_v51  ;;  %v4437_v51 = vpack.c.bf16 %v1618_v39, %v1610_v38  ;;  %v1682_v38 = vld [vmem:[#allocation9 + $0x17c8] sm:$0xff]  ;;  %v4669_v39 = vpack.c.bf16 %v1524_v27, %v1516_v26 }
 0x2ee   :  { %4422 = vmatprep.subr.bf16.mxu1 %v4421_v54  ;;  %v4655_v54 = vpack.c.bf16 %v1459_v44, %v1451_v43  ;;  %v1523_v43 = vld [vmem:[#allocation9 + $0x12d0] sm:$0xff] }
 0x2ef   :  { %4640 = vmatpush1.bf16.msra.mxu0 %v4639_v58  ;;  %v4657_v58 = vpack.c.bf16 %v1476_v50, %v1468_v49  ;;  %v1540_v49 = vld [vmem:[#allocation9 + $0x1358] sm:$0xff] }
 0x2f0   :  { %4642 = vmatprep.subr.bf16.mxu0 %v4641_v0  ;;  %v4439_v0 = vpack.c.bf16 %v1617_v53, %v1609_v52  ;;  %v6296_v50 = vld [vmem:[#allocation7] sm:$0xff]  ;;  %v1673_v53 = vld [vmem:[#allocation9 + $0x1780] sm:$0xff] }
 0x2f1   :  { %4424 = vmatpush1.bf16.msra.mxu1 %v4423_v3  ;;  %v4441_v3 = vpack.c.bf16 %v1634_v56, %v1626_v55  ;;  %v580_v55 = vrot.slane %v6296_v50, %v579_v34 }
 0x2f2   :  { %4426 = vmatprep.subr.bf16.mxu1 %v4425_v4  ;;  %v4659_v4 = vpack.c.bf16 %v1475_v61, %v1467_v60  ;;  %v1698_v60 = vld [vmem:[#allocation9 + $0x1848] sm:$0xff] }
 0x2f3   :  { %4644 = vmatpush1.bf16.msra.mxu0 %v4643_v9  ;;  %v4661_v9 = vpack.c.bf16 %v1492_v2, %v1484_v1  ;;  %v1539_v1 = vld [vmem:[#allocation9 + $0x1350] sm:$0xff] }
 0x2f4   :  { %4646 = vmatprep.subr.bf16.mxu0 %v4645_v11  ;;  %v4443_v11 = vpack.c.bf16 %v1633_v8, %v1625_v62  ;;  %v1689_v62 = vld [vmem:[#allocation9 + $0x1800] sm:$0xff] }
 0x2f5   :  { %4428 = vmatpush1.bf16.msra.mxu1 %v4427_v14  ;;  %v4445_v14 = vpack.c.bf16 %v1650_v6, %v1642_v5  ;;  %v1697_v6 = vld [vmem:[#allocation9 + $0x1840] sm:$0xff] }
 0x2f6   :  { %4430 = vmatprep.subr.bf16.mxu1 %v4429_v18  ;;  %v4663_v18 = vpack.c.bf16 %v1491_v12, %v1483_v10  ;;  %v1556_v10 = vld [vmem:[#allocation9 + $0x13d8] sm:$0xff] }
 0x2f7   :  { %4648 = vmatpush1.bf16.msra.mxu0 %v4647_v22  ;;  %v4665_v22 = vpack.c.bf16 %v1508_v13, %v1500_v7  ;;  %v1706_v7 = vld [vmem:[#allocation9 + $0x1888] sm:$0xff] }
 0x2f8   :  { %4650 = vmatprep.subr.bf16.mxu0 %v4649_v25  ;;  %v4447_v25 = vpack.c.bf16 %v1649_v17, %v1641_v16  ;;  %v1714_v13 = vld [vmem:[#allocation9 + $0x18c8] sm:$0xff]  ;;  %v1555_v16 = vld [vmem:[#allocation9 + $0x13d0] sm:$0xff] }
 0x2f9   :  { %4432 = vmatpush1.bf16.msra.mxu1 %v4431_v28  ;;  %v4449_v28 = vpack.c.bf16 %v1666_v20, %v1658_v19  ;;  %v4459_v19 = vpack.c.bf16 %v1697_v6, %v1689_v62  ;;  %v4461_v27 = vpack.c.bf16 %v1714_v13, %v1706_v7  ;;  %v1604_v62 = vld [vmem:[#allocation9 + $0x1558] sm:$0xff]  ;;  %v1603_v7 = vld [vmem:[#allocation9 + $0x1550] sm:$0xff] }
 0x2fa   :  { %2437 = vmatmul.mubr.f32.vlgmr.msra.gmra.mrb[16].mxu0 %v6280_v21  ;;  %4434 = vmatprep.subr.bf16.mxu1 %v4433_v31  ;;  %v1665_v31 = vld [vmem:[#allocation9 + $0x1740] sm:$0xff] }
 0x2fb   :  { %2442 = vmatprep.mubr.f32.mxu0 %v6285_v59  ;;  %4652 = vmatpush1.bf16.msra.mxu0 %v4651_v36  ;;  %v1674_v36 = vld [vmem:[#allocation9 + $0x1788] sm:$0xff]  ;;  %v4451_v44 = vpack.c.bf16 %v1665_v31, %v1657_v30  ;;  %v1713_v30 = vld [vmem:[#allocation9 + $0x18c0] sm:$0xff] }
 0x2fc   :  { %4654 = vmatprep.subr.bf16.mxu0 %v4653_v42  ;;  %v1515_v42 = vld [vmem:[#allocation9 + $0x1290] sm:$0xff]  ;;  %v4453_v52 = vpack.c.bf16 %v1682_v38, %v1674_v36  ;;  %v1722_v36 = vld [vmem:[#allocation9 + $0x1908] sm:$0xff] }
 0x2fd   :  { %4436 = vmatpush1.bf16.msra.mxu1 %v4435_v47  ;;  %v1532_v47 = vld [vmem:[#allocation9 + $0x1318] sm:$0xff]  ;;  %v4671_v56 = vpack.c.bf16 %v1523_v43, %v1515_v42  ;;  %v1730_v38 = vld [vmem:[#allocation9 + $0x1948] sm:$0xff]  ;;  %v1563_v42 = vld [vmem:[#allocation9 + $0x1410] sm:$0xff] }
 0x2fe   :  { %2443 = vmatmul.mubr.f32.gmra.mrb[18].mxu0 %v6287_v40  ;;  %4438 = vmatprep.subr.bf16.mxu1 %v4437_v51  ;;  %v576_v51 = vrot.slane %v6296_v50, %v575_v29  ;;  %v4673_v61 = vpack.c.bf16 %v1540_v49, %v1532_v47  ;;  %v1571_v43 = vld [vmem:[#allocation9 + $0x1450] sm:$0xff]  ;;  %v1580_v49 = vld [vmem:[#allocation9 + $0x1498] sm:$0xff] }
 0x2ff   :  { %4656 = vmatpush1.bf16.msra.mxu0 %v4655_v54  ;;  %v1681_v54 = vld [vmem:[#allocation9 + $0x17c0] sm:$0xff] }
 0x300   :  { %4658 = vmatprep.subr.bf16.mxu0 %v4657_v58  ;;  %v1690_v58 = vld [vmem:[#allocation9 + $0x1808] sm:$0xff] }
 0x301   :  { %4440 = vmatpush1.bf16.msra.mxu1 %v4439_v0  ;;  %v1531_v0 = vld [vmem:[#allocation9 + $0x1310] sm:$0xff]  ;;  %v4457_v5 = vpack.c.bf16 %v1698_v60, %v1690_v58  ;;  %v1738_v58 = vld [vmem:[#allocation9 + $0x1988] sm:$0xff] }
 0x302   :  { %4442 = vmatprep.subr.bf16.mxu1 %v4441_v3  ;;  %v4455_v3 = vpack.c.bf16 %v1681_v54, %v1673_v53  ;;  %v4465_v53 = vpack.c.bf16 %v1730_v38, %v1722_v36  ;;  %v1721_v54 = vld [vmem:[#allocation9 + $0x1900] sm:$0xff]  ;;  %v1746_v60 = vld [vmem:[#allocation9 + $0x19c8] sm:$0xff] }
 0x303   :  { %4660 = vmatpush1.bf16.msra.mxu0 %v4659_v4  ;;  %v1769_v38 = vld [vmem:[#allocation9 + $0x1a80] sm:$0xff] }
 0x304   :  { %4662 = vmatprep.subr.bf16.mxu0 %v4661_v9  ;;  %v1548_v9 = vld [vmem:[#allocation9 + $0x1398] sm:$0xff] }
 0x305   :  { %4444 = vmatpush1.bf16.msra.mxu1 %v4443_v11  ;;  %v4675_v11 = vpack.c.bf16 %v1539_v1, %v1531_v0  ;;  %v4677_v20 = vpack.c.bf16 %v1556_v10, %v1548_v9  ;;  %v1579_v0 = vld [vmem:[#allocation9 + $0x1490] sm:$0xff]  ;;  %v1754_v9 = vld [vmem:[#allocation9 + $0x1a08] sm:$0xff] }
 0x306   :  { %4446 = vmatprep.subr.bf16.mxu1 %v4445_v14  ;;  %v1547_v14 = vld [vmem:[#allocation9 + $0x1390] sm:$0xff]  ;;  %v1762_v10 = vld [vmem:[#allocation9 + $0x1a48] sm:$0xff] }
 0x307   :  { %4664 = vmatpush1.bf16.msra.mxu0 %v4663_v18  ;;  %v1587_v1 = vld [vmem:[#allocation9 + $0x14d0] sm:$0xff] }
 0x308   :  { %4666 = vmatprep.subr.bf16.mxu0 %v4665_v22  ;;  %v1564_v22 = vld [vmem:[#allocation9 + $0x1418] sm:$0xff]  ;;  %v4687_v6 = vpack.c.bf16 %v1587_v1, %v1579_v0  ;;  %v1802_v1 = vld [vmem:[#allocation9 + $0x1b88] sm:$0xff] }
 0x309   :  { %4448 = vmatpush1.bf16.msra.mxu1 %v4447_v25 }
 0x30a   :  { %4450 = vmatprep.subr.bf16.mxu1 %v4449_v28  ;;  %v1705_v28 = vld [vmem:[#allocation9 + $0x1880] sm:$0xff] }
 0x30b   :  { %4668 = vmatpush1.bf16.msra.mxu0 %v4667_v32  ;;  %v4679_v32 = vpack.c.bf16 %v1555_v16, %v1547_v14  ;;  %v4463_v47 = vpack.c.bf16 %v1713_v30, %v1705_v28  ;;  %v1612_v14 = vld [vmem:[#allocation9 + $0x1598] sm:$0xff]  ;;  %v1619_v28 = vld [vmem:[#allocation9 + $0x15d0] sm:$0xff] }
 0x30c   :  { %4670 = vmatprep.subr.bf16.mxu0 %v4669_v39  ;;  %v4681_v39 = vpack.c.bf16 %v1572_v23, %v1564_v22  ;;  %v1620_v16 = vld [vmem:[#allocation9 + $0x15d8] sm:$0xff]  ;;  %v1770_v23 = vld [vmem:[#allocation9 + $0x1a88] sm:$0xff] }
 0x30d   :  { %v817_v2 = vpop.f32.mrb[8].mxu0  ;;  %4452 = vmatpush1.bf16.msra.mxu1 %v4451_v44 }
 0x30e   :  { %v818_v8 = vadd.f32 %v817_v2, %v576_v51  ;;  %v819_v4 = vpop.f32.mrb[9].mxu0  ;;  %4454 = vmatprep.subr.bf16.mxu1 %v4453_v52 }
 0x30f   :  { %v820_v12 = vadd.f32 %v819_v4, %v580_v55  ;;  %4672 = vmatpush1.bf16.msra.mxu0 %v4671_v56  ;;  %v4683_v56 = vpack.c.bf16 %v1571_v43, %v1563_v42  ;;  %v1737_v4 = vld [vmem:[#allocation9 + $0x1980] sm:$0xff]  ;;  %v1786_v43 = vld [vmem:[#allocation9 + $0x1b08] sm:$0xff] }
 0x310   :  { %4674 = vmatprep.subr.bf16.mxu0 %v4673_v61  ;;  %v6306_v24 = vmax.f32 %v818_v8, 0.0  ;;  %v4469_v8 = vpack.c.bf16 %v1746_v60, %v1738_v58  ;;  %v1785_v60 = vld [vmem:[#allocation9 + $0x1b00] sm:$0xff] }
 0x311   :  { %v6304_v17 = vmax.f32 %v820_v12, 0.0  ;;  %v823_v18 = vpop.f32.mrb[10].mxu0  ;;  %4456 = vmatpush1.bf16.msra.mxu1 %v4455_v3  ;;  %v1596_v3 = vld [vmem:[#allocation9 + $0x1518] sm:$0xff] }
 0x312   :  { %v824_v25 = vadd.f32 %v823_v18, %v576_v51  ;;  %v825_v26 = vpop.f32.mrb[11].mxu0  ;;  %4458 = vmatprep.subr.bf16.mxu1 %v4457_v5  ;;  %v1588_v51 = vld [vmem:[#allocation9 + $0x14d8] sm:$0xff]  ;;  %v1745_v5 = vld [vmem:[#allocation9 + $0x19c0] sm:$0xff]  ;;  %v4689_v12 = vpack.c.bf16 %v1604_v62, %v1596_v3  ;;  %v4473_v18 = vpack.c.bf16 %v1762_v10, %v1754_v9  ;;  %v1643_v62 = vld [vmem:[#allocation9 + $0x1690] sm:$0xff] }
 0x313   :  { %v826_v31 = vadd.f32 %v825_v26, %v580_v55  ;;  %2205 = vmatprep.mubr.f32.mxu1 %v6304_v17  ;;  %4676 = vmatpush1.bf16.msra.mxu0 %v4675_v11  ;;  %v1729_v55 = vld [vmem:[#allocation9 + $0x1940] sm:$0xff]  ;;  %v4685_v61 = vpack.c.bf16 %v1588_v51, %v1580_v49  ;;  %v1595_v11 = vld [vmem:[#allocation9 + $0x1510] sm:$0xff]  ;;  %v4471_v13 = vpack.c.bf16 %v1745_v5, %v1737_v4  ;;  %v1660_v5 = vld [vmem:[#allocation9 + $0x1718] sm:$0xff] }
 0x314   :  { %2513 = vmatprep.mubr.f32.mxu0 %v6304_v17  ;;  %2206 = vmatmul.mubr.f32.vlgmr.msra.gmra.mrb[4].mxu1 %v6306_v24  ;;  %v6313_v52 = vmax.f32 %v824_v25, 0.0  ;;  %v4467_v2 = vpack.c.bf16 %v1729_v55, %v1721_v54  ;;  %v4691_v22 = vpack.c.bf16 %v1603_v7, %v1595_v11  ;;  %v1778_v25 = vld [vmem:[#allocation9 + $0x1ac8] sm:$0xff]  ;;  %v4693_v26 = vpack.c.bf16 %v1620_v16, %v1612_v14  ;;  %v1627_v51 = vld [vmem:[#allocation9 + $0x1610] sm:$0xff]  ;;  %v1644_v55 = vld [vmem:[#allocation9 + $0x1698] sm:$0xff] }
 0x315   :  { %v6311_v44 = vmax.f32 %v826_v31, 0.0  ;;  %4460 = vmatpush1.bf16.msra.mxu1 %v4459_v19  ;;  %4678 = vmatprep.subr.bf16.mxu0 %v4677_v20  ;;  %v1753_v19 = vld [vmem:[#allocation9 + $0x1a00] sm:$0xff]  ;;  %v1628_v31 = vld [vmem:[#allocation9 + $0x1618] sm:$0xff]  ;;  %v4477_v36 = vpack.c.bf16 %v1778_v25, %v1770_v23  ;;  %v1818_v7 = vld [vmem:[#allocation9 + $0x1c08] sm:$0xff] }
 0x316   :  { %4462 = vmatprep.subr.bf16.mxu1 %v4461_v27  ;;  %v1761_v20 = vld [vmem:[#allocation9 + $0x1a40] sm:$0xff]  ;;  %v1611_v27 = vld [vmem:[#allocation9 + $0x1590] sm:$0xff] }
 0x317   :  { %2211 = vmatprep.mubr.f32.mxu1 %v6311_v44  ;;  %4680 = vmatpush1.bf16.msra.mxu0 %v4679_v32  ;;  %v4475_v30 = vpack.c.bf16 %v1761_v20, %v1753_v19  ;;  %v1636_v32 = vld [vmem:[#allocation9 + $0x1658] sm:$0xff]  ;;  %v4695_v42 = vpack.c.bf16 %v1619_v28, %v1611_v27  ;;  %v1801_v10 = vld [vmem:[#allocation9 + $0x1b80] sm:$0xff]  ;;  %v1659_v16 = vld [vmem:[#allocation9 + $0x1710] sm:$0xff] }
 0x318   :  { %2212 = vmatmul.mubr.f32.gmra.mrb[6].mxu1 %v6313_v52  ;;  %4682 = vmatprep.subr.bf16.mxu0 %v4681_v39  ;;  %v1777_v39 = vld [vmem:[#allocation9 + $0x1ac0] sm:$0xff]  ;;  %v4697_v49 = vpack.c.bf16 %v1636_v32, %v1628_v31  ;;  %v1676_v20 = vld [vmem:[#allocation9 + $0x1798] sm:$0xff]  ;;  %v1834_v28 = vld [vmem:[#allocation9 + $0x1c88] sm:$0xff] }
 0x319   :  { %4464 = vmatpush1.bf16.msra.mxu1 %v4463_v47  ;;  %v1794_v47 = vld [vmem:[#allocation9 + $0x1b48] sm:$0xff]  ;;  %v4479_v54 = vpack.c.bf16 %v1777_v39, %v1769_v38  ;;  %v1817_v25 = vld [vmem:[#allocation9 + $0x1c00] sm:$0xff]  ;;  %v1675_v32 = vld [vmem:[#allocation9 + $0x1790] sm:$0xff] }
 0x31a   :  { %4466 = vmatprep.subr.bf16.mxu1 %v4465_v53  ;;  %v1635_v53 = vld [vmem:[#allocation9 + $0x1650] sm:$0xff]  ;;  %v4481_v58 = vpack.c.bf16 %v1794_v47, %v1786_v43  ;;  %v1692_v39 = vld [vmem:[#allocation9 + $0x1818] sm:$0xff]  ;;  %v1833_v47 = vld [vmem:[#allocation9 + $0x1c80] sm:$0xff] }
 0x31b   :  { %4684 = vmatpush1.bf16.msra.mxu0 %v4683_v56  ;;  %v1652_v56 = vld [vmem:[#allocation9 + $0x16d8] sm:$0xff]  ;;  %v4699_v0 = vpack.c.bf16 %v1635_v53, %v1627_v51  ;;  %v1850_v53 = vld [vmem:[#allocation9 + $0x1d08] sm:$0xff] }
 0x31c   :  { %4686 = vmatprep.subr.bf16.mxu0 %v4685_v61  ;;  %v1793_v61 = vld [vmem:[#allocation9 + $0x1b40] sm:$0xff]  ;;  %v4701_v3 = vpack.c.bf16 %v1652_v56, %v1644_v55  ;;  %v1691_v56 = vld [vmem:[#allocation9 + $0x1810] sm:$0xff] }
 0x31d   :  { %4468 = vmatpush1.bf16.msra.mxu1 %v4467_v2  ;;  %v1810_v2 = vld [vmem:[#allocation9 + $0x1bc8] sm:$0xff]  ;;  %v4483_v4 = vpack.c.bf16 %v1793_v61, %v1785_v60  ;;  %v1708_v61 = vld [vmem:[#allocation9 + $0x1898] sm:$0xff] }
 0x31e   :  { %4470 = vmatprep.subr.bf16.mxu1 %v4469_v8  ;;  %v1651_v8 = vld [vmem:[#allocation9 + $0x16d0] sm:$0xff]  ;;  %v4485_v9 = vpack.c.bf16 %v1810_v2, %v1802_v1  ;;  %v1849_v2 = vld [vmem:[#allocation9 + $0x1d00] sm:$0xff] }
 0x31f   :  { %4688 = vmatpush1.bf16.msra.mxu0 %v4687_v6  ;;  %v1668_v6 = vld [vmem:[#allocation9 + $0x1758] sm:$0xff]  ;;  %v4703_v11 = vpack.c.bf16 %v1651_v8, %v1643_v62  ;;  %v1866_v8 = vld [vmem:[#allocation9 + $0x1d88] sm:$0xff] }
 0x320   :  { %4690 = vmatprep.subr.bf16.mxu0 %v4689_v12  ;;  %v1809_v12 = vld [vmem:[#allocation9 + $0x1bc0] sm:$0xff]  ;;  %v4705_v14 = vpack.c.bf16 %v1668_v6, %v1660_v5  ;;  %v1707_v6 = vld [vmem:[#allocation9 + $0x1890] sm:$0xff] }
 0x321   :  { %4472 = vmatpush1.bf16.msra.mxu1 %v4471_v13  ;;  %v1826_v13 = vld [vmem:[#allocation9 + $0x1c48] sm:$0xff]  ;;  %v4487_v19 = vpack.c.bf16 %v1809_v12, %v1801_v10  ;;  %v1724_v12 = vld [vmem:[#allocation9 + $0x1918] sm:$0xff] }
 0x322   :  { %4474 = vmatprep.subr.bf16.mxu1 %v4473_v18  ;;  %v1667_v18 = vld [vmem:[#allocation9 + $0x1750] sm:$0xff]  ;;  %v4489_v23 = vpack.c.bf16 %v1826_v13, %v1818_v7  ;;  %v1865_v13 = vld [vmem:[#allocation9 + $0x1d80] sm:$0xff] }
 0x323   :  { %4692 = vmatpush1.bf16.msra.mxu0 %v4691_v22  ;;  %v1684_v22 = vld [vmem:[#allocation9 + $0x17d8] sm:$0xff]  ;;  %v4707_v27 = vpack.c.bf16 %v1667_v18, %v1659_v16  ;;  %v1882_v18 = vld [vmem:[#allocation9 + $0x1e08] sm:$0xff] }
 0x324   :  { %4694 = vmatprep.subr.bf16.mxu0 %v4693_v26  ;;  %v1825_v26 = vld [vmem:[#allocation9 + $0x1c40] sm:$0xff]  ;;  %v4709_v31 = vpack.c.bf16 %v1684_v22, %v1676_v20  ;;  %v1723_v22 = vld [vmem:[#allocation9 + $0x1910] sm:$0xff] }
 0x325   :  { %4476 = vmatpush1.bf16.msra.mxu1 %v4475_v30  ;;  %v1842_v30 = vld [vmem:[#allocation9 + $0x1cc8] sm:$0xff]  ;;  %v4491_v38 = vpack.c.bf16 %v1825_v26, %v1817_v25  ;;  %v1740_v26 = vld [vmem:[#allocation9 + $0x1998] sm:$0xff] }
 0x326   :  { %4478 = vmatprep.subr.bf16.mxu1 %v4477_v36  ;;  %v1683_v36 = vld [vmem:[#allocation9 + $0x17d0] sm:$0xff]  ;;  %v4493_v43 = vpack.c.bf16 %v1842_v30, %v1834_v28  ;;  %v1881_v30 = vld [vmem:[#allocation9 + $0x1e00] sm:$0xff] }
 0x327   :  { %4696 = vmatpush1.bf16.msra.mxu0 %v4695_v42  ;;  %v1700_v42 = vld [vmem:[#allocation9 + $0x1858] sm:$0xff]  ;;  %v4711_v51 = vpack.c.bf16 %v1683_v36, %v1675_v32  ;;  %v1898_v36 = vld [vmem:[#allocation9 + $0x1e88] sm:$0xff] }
 0x328   :  { %4698 = vmatprep.subr.bf16.mxu0 %v4697_v49  ;;  %v1841_v49 = vld [vmem:[#allocation9 + $0x1cc0] sm:$0xff]  ;;  %v4713_v55 = vpack.c.bf16 %v1700_v42, %v1692_v39  ;;  %v1739_v42 = vld [vmem:[#allocation9 + $0x1990] sm:$0xff] }
 0x329   :  { %4480 = vmatpush1.bf16.msra.mxu1 %v4479_v54  ;;  %v1858_v54 = vld [vmem:[#allocation9 + $0x1d48] sm:$0xff]  ;;  %v4495_v60 = vpack.c.bf16 %v1841_v49, %v1833_v47  ;;  %v1756_v49 = vld [vmem:[#allocation9 + $0x1a18] sm:$0xff] }
 0x32a   :  { %4482 = vmatprep.subr.bf16.mxu1 %v4481_v58  ;;  %v1699_v58 = vld [vmem:[#allocation9 + $0x1850] sm:$0xff]  ;;  %v4497_v1 = vpack.c.bf16 %v1858_v54, %v1850_v53  ;;  %v1897_v54 = vld [vmem:[#allocation9 + $0x1e80] sm:$0xff] }
 0x32b   :  { %4700 = vmatpush1.bf16.msra.mxu0 %v4699_v0  ;;  %v1716_v0 = vld [vmem:[#allocation9 + $0x18d8] sm:$0xff]  ;;  %v4715_v62 = vpack.c.bf16 %v1699_v58, %v1691_v56  ;;  %v1914_v58 = vld [vmem:[#allocation9 + $0x1f08] sm:$0xff] }
 0x32c   :  { %4702 = vmatprep.subr.bf16.mxu0 %v4701_v3  ;;  %v1857_v3 = vld [vmem:[#allocation9 + $0x1d40] sm:$0xff]  ;;  %v4717_v5 = vpack.c.bf16 %v1716_v0, %v1708_v61  ;;  %v1755_v0 = vld [vmem:[#allocation9 + $0x1a10] sm:$0xff] }
 0x32d   :  { %4484 = vmatpush1.bf16.msra.mxu1 %v4483_v4  ;;  %v1874_v4 = vld [vmem:[#allocation9 + $0x1dc8] sm:$0xff]  ;;  %v4499_v10 = vpack.c.bf16 %v1857_v3, %v1849_v2  ;;  %v1772_v3 = vld [vmem:[#allocation9 + $0x1a98] sm:$0xff] }
 0x32e   :  { %4486 = vmatprep.subr.bf16.mxu1 %v4485_v9  ;;  %v1715_v9 = vld [vmem:[#allocation9 + $0x18d0] sm:$0xff]  ;;  %v4501_v7 = vpack.c.bf16 %v1874_v4, %v1866_v8  ;;  %v583_v4 = vsub.s32 6, %v6214_v45 }
 0x32f   :  { %4704 = vmatpush1.bf16.msra.mxu0 %v4703_v11  ;;  %v1732_v11 = vld [vmem:[#allocation9 + $0x1958] sm:$0xff]  ;;  %v4719_v16 = vpack.c.bf16 %v1715_v9, %v1707_v6  ;;  %v1921_v6 = vld [vmem:[#allocation9 + $0x1f40] sm:$0xff] }
 0x330   :  { %4706 = vmatprep.subr.bf16.mxu0 %v4705_v14  ;;  %v1873_v14 = vld [vmem:[#allocation9 + $0x1dc0] sm:$0xff]  ;;  %v4721_v20 = vpack.c.bf16 %v1732_v11, %v1724_v12  ;;  %v1930_v12 = vld [vmem:[#allocation9 + $0x1f88] sm:$0xff] }
 0x331   :  { %4488 = vmatpush1.bf16.msra.mxu1 %v4487_v19  ;;  %v1890_v19 = vld [vmem:[#allocation9 + $0x1e48] sm:$0xff]  ;;  %v4503_v25 = vpack.c.bf16 %v1873_v14, %v1865_v13  ;;  %v1771_v13 = vld [vmem:[#allocation9 + $0x1a90] sm:$0xff] }
 0x332   :  { %4490 = vmatprep.subr.bf16.mxu1 %v4489_v23  ;;  %v1731_v23 = vld [vmem:[#allocation9 + $0x1950] sm:$0xff]  ;;  %v4505_v28 = vpack.c.bf16 %v1890_v19, %v1882_v18  ;;  %v1938_v11 = vld [vmem:[#allocation9 + $0x1fc8] sm:$0xff]  ;;  %v1788_v18 = vld [vmem:[#allocation9 + $0x1b18] sm:$0xff] }
 0x333   :  { %4708 = vmatpush1.bf16.msra.mxu0 %v4707_v27  ;;  %v1748_v27 = vld [vmem:[#allocation9 + $0x19d8] sm:$0xff]  ;;  %v4723_v32 = vpack.c.bf16 %v1731_v23, %v1723_v22  ;;  %v1779_v14 = vld [vmem:[#allocation9 + $0x1ad0] sm:$0xff]  ;;  %v4517_v22 = vpack.c.bf16 %v1938_v11, %v1930_v12  ;;  %v1929_v23 = vld [vmem:[#allocation9 + $0x1f80] sm:$0xff] }
 0x334   :  { %4710 = vmatprep.subr.bf16.mxu0 %v4709_v31  ;;  %v1889_v31 = vld [vmem:[#allocation9 + $0x1e40] sm:$0xff]  ;;  %v4725_v39 = vpack.c.bf16 %v1748_v27, %v1740_v26  ;;  %v1796_v19 = vld [vmem:[#allocation9 + $0x1b58] sm:$0xff]  ;;  %v4735_v27 = vpack.c.bf16 %v1779_v14, %v1771_v13 }
 0x335   :  { %4492 = vmatpush1.bf16.msra.mxu1 %v4491_v38  ;;  %v1906_v38 = vld [vmem:[#allocation9 + $0x1ec8] sm:$0xff]  ;;  %v4507_v47 = vpack.c.bf16 %v1889_v31, %v1881_v30  ;;  %v4737_v31 = vpack.c.bf16 %v1796_v19, %v1788_v18  ;;  %v941_v11 = vld [vmem:[#allocation9 + $0xa0] sm:$0xff] }
 0x336   :  { %4494 = vmatprep.subr.bf16.mxu1 %v4493_v43  ;;  %v1747_v43 = vld [vmem:[#allocation9 + $0x19d0] sm:$0xff]  ;;  %v4509_v53 = vpack.c.bf16 %v1906_v38, %v1898_v36  ;;  %v934_v30 = vld [vmem:[#allocation9 + $0x68] sm:$0xff] }
 0x337   :  { %4712 = vmatpush1.bf16.msra.mxu0 %v4711_v51  ;;  %v1764_v51 = vld [vmem:[#allocation9 + $0x1a58] sm:$0xff]  ;;  %v4727_v56 = vpack.c.bf16 %v1747_v43, %v1739_v42  ;;  %v1795_v36 = vld [vmem:[#allocation9 + $0x1b50] sm:$0xff]  ;;  %v925_v42 = vld [vmem:[#allocation9 + $0x20] sm:$0xff] }
 0x338   :  { %4714 = vmatprep.subr.bf16.mxu0 %v4713_v55  ;;  %v1905_v55 = vld [vmem:[#allocation9 + $0x1ec0] sm:$0xff]  ;;  %v4729_v61 = vpack.c.bf16 %v1764_v51, %v1756_v49  ;;  %v966_v18 = vld [vmem:[#allocation9 + $0x168] sm:$0xff] }
 0x339   :  { %4496 = vmatpush1.bf16.msra.mxu1 %v4495_v60  ;;  %v1922_v60 = vld [vmem:[#allocation9 + $0x1f48] sm:$0xff]  ;;  %v4511_v2 = vpack.c.bf16 %v1905_v55, %v1897_v54  ;;  %v933_v51 = vld [vmem:[#allocation9 + $0x60] sm:$0xff]  ;;  %v1812_v54 = vld [vmem:[#allocation9 + $0x1bd8] sm:$0xff] }
 0x33a   :  { %2514 = vmatmul.mubr.f32.vlgmr.msra.gmra.mrb[16].mxu0 %v6306_v24  ;;  %4498 = vmatprep.subr.bf16.mxu1 %v4497_v1  ;;  %v1763_v1 = vld [vmem:[#allocation9 + $0x1a50] sm:$0xff]  ;;  %v4513_v8 = vpack.c.bf16 %v1922_v60, %v1914_v58  ;;  %v950_v58 = vld [vmem:[#allocation9 + $0xe8] sm:$0xff] }
 0x33b   :  { %2519 = vmatprep.mubr.f32.mxu0 %v6311_v44  ;;  %4716 = vmatpush1.bf16.msra.mxu0 %v4715_v62  ;;  %v1780_v62 = vld [vmem:[#allocation9 + $0x1ad8] sm:$0xff]  ;;  %v4731_v9 = vpack.c.bf16 %v1763_v1, %v1755_v0  ;;  %v1803_v60 = vld [vmem:[#allocation9 + $0x1b90] sm:$0xff] }
 0x33c   :  { %4718 = vmatprep.subr.bf16.mxu0 %v4717_v5  ;;  %v1913_v5 = vld [vmem:[#allocation9 + $0x1f00] sm:$0xff] }
 0x33d   :  { %4500 = vmatpush1.bf16.msra.mxu1 %v4499_v10  ;;  %v587_v10 = vsub.s32 7, %v6214_v45  ;;  %v3827_v45 = vld [vmem:[#allocation15 + $0x60] sm:$0xff] }
 0x33e   :  { %2520 = vmatmul.mubr.f32.gmra.mrb[18].mxu0 %v6313_v52  ;;  %4502 = vmatprep.subr.bf16.mxu1 %v4501_v7  ;;  %v4733_v7 = vpack.c.bf16 %v1780_v62, %v1772_v3  ;;  %v1820_v62 = vld [vmem:[#allocation9 + $0x1c18] sm:$0xff] }
 0x33f   :  { %4720 = vmatpush1.bf16.msra.mxu0 %v4719_v16  ;;  %v4515_v16 = vpack.c.bf16 %v1921_v6, %v1913_v5  ;;  %v588_v26 = vrot.slane %v6296_v50, %v587_v10 }
 0x340   :  { %4722 = vmatprep.subr.bf16.mxu0 %v4721_v20  ;;  %v584_v20 = vrot.slane %v6296_v50, %v583_v4 }
 0x341   :  { %4504 = vmatpush1.bf16.msra.mxu1 %v4503_v25  ;;  %v1937_v25 = vld [vmem:[#allocation9 + $0x1fc0] sm:$0xff] }
 0x342   :  { %4506 = vmatprep.subr.bf16.mxu1 %v4505_v28  ;;  %v926_v28 = vld [vmem:[#allocation9 + $0x28] sm:$0xff] }
 0x343   :  { %4724 = vmatpush1.bf16.msra.mxu0 %v4723_v32  ;;  %v1787_v32 = vld [vmem:[#allocation9 + $0x1b10] sm:$0xff]  ;;  %v4777_v49 = vpack.c.bf16 %v934_v30, %v926_v28 }
 0x344   :  { %4726 = vmatprep.subr.bf16.mxu0 %v4725_v39  ;;  %v4519_v39 = vpack.c.bf16 %v1937_v25, %v1929_v23  ;;  %v4739_v50 = vpack.c.bf16 %v1795_v36, %v1787_v32  ;;  %v1827_v23 = vld [vmem:[#allocation9 + $0x1c50] sm:$0xff]  ;;  %v965_v32 = vld [vmem:[#allocation9 + $0x160] sm:$0xff] }
 0x345   :  { %4508 = vmatpush1.bf16.msra.mxu1 %v4507_v47 }
 0x346   :  { %4510 = vmatprep.subr.bf16.mxu1 %v4509_v53  ;;  %v1804_v53 = vld [vmem:[#allocation9 + $0x1b98] sm:$0xff] }
 0x347   :  { %4728 = vmatpush1.bf16.msra.mxu0 %v4727_v56  ;;  %v942_v56 = vld [vmem:[#allocation9 + $0xa8] sm:$0xff]  ;;  %v4741_v3 = vpack.c.bf16 %v1812_v54, %v1804_v53  ;;  %v1860_v53 = vld [vmem:[#allocation9 + $0x1d58] sm:$0xff] }
 0x348   :  { %4730 = vmatprep.subr.bf16.mxu0 %v4729_v61  ;;  %v1811_v61 = vld [vmem:[#allocation9 + $0x1bd0] sm:$0xff]  ;;  %v4781_v12 = vpack.c.bf16 %v950_v58, %v942_v56  ;;  %v990_v58 = vld [vmem:[#allocation9 + $0x228] sm:$0xff] }
 0x349   :  { %4512 = vmatpush1.bf16.msra.mxu1 %v4511_v2  ;;  %v4779_v2 = vpack.c.bf16 %v933_v51, %v925_v42  ;;  %v4743_v14 = vpack.c.bf16 %v1811_v61, %v1803_v60  ;;  %v1852_v51 = vld [vmem:[#allocation9 + $0x1d18] sm:$0xff]  ;;  %v998_v60 = vld [vmem:[#allocation9 + $0x268] sm:$0xff] }
 0x34a   :  { %4514 = vmatprep.subr.bf16.mxu1 %v4513_v8  ;;  %v1828_v8 = vld [vmem:[#allocation9 + $0x1c58] sm:$0xff]  ;;  %v4753_v61 = vpack.c.bf16 %v1860_v53, %v1852_v51  ;;  %v1021_v51 = vld [vmem:[#allocation9 + $0x320] sm:$0xff] }
 0x34b   :  { %4732 = vmatpush1.bf16.msra.mxu0 %v4731_v9  ;;  %v4745_v19 = vpack.c.bf16 %v1828_v8, %v1820_v62  ;;  %v1868_v62 = vld [vmem:[#allocation9 + $0x1d98] sm:$0xff]  ;;  %v1029_v53 = vld [vmem:[#allocation9 + $0x360] sm:$0xff] }
 0x34c   :  { %4734 = vmatprep.subr.bf16.mxu0 %v4733_v7  ;;  %v949_v7 = vld [vmem:[#allocation9 + $0xe0] sm:$0xff]  ;;  %v1876_v8 = vld [vmem:[#allocation9 + $0x1dd8] sm:$0xff] }
 0x34d   :  { %v894_v38 = vpop.f32.mrb[12].mxu0  ;;  %4516 = vmatpush1.bf16.msra.mxu1 %v4515_v16  ;;  %v958_v16 = vld [vmem:[#allocation9 + $0x128] sm:$0xff]  ;;  %v4783_v25 = vpack.c.bf16 %v949_v7, %v941_v11 }
 0x34e   :  { %v895_v43 = vadd.f32 %v894_v38, %v584_v20  ;;  %v896_v47 = vpop.f32.mrb[13].mxu0  ;;  %4518 = vmatprep.subr.bf16.mxu1 %v4517_v22  ;;  %v1819_v22 = vld [vmem:[#allocation9 + $0x1c10] sm:$0xff]  ;;  %v4785_v30 = vpack.c.bf16 %v966_v18, %v958_v16  ;;  %v974_v38 = vld [vmem:[#allocation9 + $0x1a8] sm:$0xff] }
 0x34f   :  { %v897_v55 = vadd.f32 %v896_v47, %v588_v26  ;;  %4736 = vmatpush1.bf16.msra.mxu0 %v4735_v27  ;;  %v1836_v27 = vld [vmem:[#allocation9 + $0x1c98] sm:$0xff]  ;;  %v4747_v36 = vpack.c.bf16 %v1827_v23, %v1819_v22  ;;  %v1843_v47 = vld [vmem:[#allocation9 + $0x1cd0] sm:$0xff]  ;;  %v1006_v7 = vld [vmem:[#allocation9 + $0x2a8] sm:$0xff] }
 0x350   :  { %4738 = vmatprep.subr.bf16.mxu0 %v4737_v31  ;;  %v6330_v5 = vmax.f32 %v895_v43, 0.0  ;;  %v957_v31 = vld [vmem:[#allocation9 + $0x120] sm:$0xff]  ;;  %v1835_v43 = vld [vmem:[#allocation9 + $0x1c90] sm:$0xff]  ;;  %v1884_v22 = vld [vmem:[#allocation9 + $0x1e18] sm:$0xff] }
 0x351   :  { %v6328_v0 = vmax.f32 %v897_v55, 0.0  ;;  %v900_v1 = vpop.f32.mrb[14].mxu0  ;;  %4520 = vmatpush1.bf16.msra.mxu1 %v4519_v39  ;;  %v982_v39 = vld [vmem:[#allocation9 + $0x1e8] sm:$0xff]  ;;  %v973_v55 = vld [vmem:[#allocation9 + $0x1a0] sm:$0xff]  ;;  %v4751_v56 = vpack.c.bf16 %v1843_v47, %v1835_v43  ;;  %v1867_v16 = vld [vmem:[#allocation9 + $0x1d90] sm:$0xff] }
 0x352   :  { %v901_v6 = vadd.f32 %v900_v1, %v584_v20  ;;  %v902_v9 = vpop.f32.mrb[15].mxu0  ;;  %4778 = vmatprep.subr.bf16.mxu1 %v4777_v49  ;;  %v4787_v49 = vpack.c.bf16 %v965_v32, %v957_v31  ;;  %v4789_v54 = vpack.c.bf16 %v982_v39, %v974_v38  ;;  %v1851_v1 = vld [vmem:[#allocation9 + $0x1d10] sm:$0xff]  ;;  %v1892_v23 = vld [vmem:[#allocation9 + $0x1e58] sm:$0xff]  ;;  %v1022_v31 = vld [vmem:[#allocation9 + $0x328] sm:$0xff] }
 0x353   :  { %v903_v13 = vadd.f32 %v902_v9, %v588_v26  ;;  %2282 = vmatprep.mubr.f32.mxu1 %v6328_v0  ;;  %4740 = vmatpush1.bf16.msra.mxu0 %v4739_v50  ;;  %v1844_v26 = vld [vmem:[#allocation9 + $0x1cd8] sm:$0xff]  ;;  %v981_v50 = vld [vmem:[#allocation9 + $0x1e0] sm:$0xff]  ;;  %v1875_v18 = vld [vmem:[#allocation9 + $0x1dd0] sm:$0xff] }
 0x354   :  { %2590 = vmatprep.mubr.f32.mxu0 %v6328_v0  ;;  %2283 = vmatmul.mubr.f32.vlgmr.msra.gmra.mrb[4].mxu1 %v6330_v5  ;;  %v6337_v28 = vmax.f32 %v901_v6, 0.0  ;;  %v4749_v42 = vpack.c.bf16 %v1844_v26, %v1836_v27  ;;  %v4793_v6 = vpack.c.bf16 %v998_v60, %v990_v58  ;;  %v989_v9 = vld [vmem:[#allocation9 + $0x220] sm:$0xff]  ;;  %v1030_v32 = vld [vmem:[#allocation9 + $0x368] sm:$0xff]  ;;  %v1883_v38 = vld [vmem:[#allocation9 + $0x1e10] sm:$0xff] }
 0x355   :  { %v6335_v20 = vmax.f32 %v903_v13, 0.0  ;;  %4780 = vmatpush1.bf16.msra.mxu1 %v4779_v2  ;;  %4742 = vmatprep.subr.bf16.mxu0 %v4741_v3  ;;  %v1859_v2 = vld [vmem:[#allocation9 + $0x1d50] sm:$0xff]  ;;  %v4791_v3 = vpack.c.bf16 %v981_v50, %v973_v55  ;;  %v1014_v13 = vld [vmem:[#allocation9 + $0x2e8] sm:$0xff]  ;;  %v1005_v27 = vld [vmem:[#allocation9 + $0x2a0] sm:$0xff] }
 0x356   :  { %4782 = vmatprep.subr.bf16.mxu1 %v4781_v12  ;;  %v997_v12 = vld [vmem:[#allocation9 + $0x260] sm:$0xff]  ;;  %v4755_v11 = vpack.c.bf16 %v1859_v2, %v1851_v1  ;;  %v1891_v39 = vld [vmem:[#allocation9 + $0x1e50] sm:$0xff]  ;;  %v1900_v43 = vld [vmem:[#allocation9 + $0x1e98] sm:$0xff] }
 0x357   :  { %2288 = vmatprep.mubr.f32.mxu1 %v6335_v20  ;;  %4744 = vmatpush1.bf16.msra.mxu0 %v4743_v14  ;;  %v4757_v14 = vpack.c.bf16 %v1876_v8, %v1868_v62  ;;  %v1013_v26 = vld [vmem:[#allocation9 + $0x2e0] sm:$0xff]  ;;  %v1908_v47 = vld [vmem:[#allocation9 + $0x1ed8] sm:$0xff]  ;;  %v1038_v55 = vld [vmem:[#allocation9 + $0x3a8] sm:$0xff] }
 0x358   :  { %2289 = vmatmul.mubr.f32.gmra.mrb[6].mxu1 %v6337_v28  ;;  %4746 = vmatprep.subr.bf16.mxu0 %v4745_v19  ;;  %v4795_v19 = vpack.c.bf16 %v997_v12, %v989_v9  ;;  %v1046_v50 = vld [vmem:[#allocation9 + $0x3e8] sm:$0xff]  ;;  %v1899_v58 = vld [vmem:[#allocation9 + $0x1e90] sm:$0xff]  ;;  %v1916_v1 = vld [vmem:[#allocation9 + $0x1f18] sm:$0xff] }
 0x359   :  { %4784 = vmatpush1.bf16.msra.mxu1 %v4783_v25  ;;  %2667 = vmatprep.mubr.f32.mxu1 %v6254_v35  ;;  %v4797_v25 = vpack.c.bf16 %v1014_v13, %v1006_v7  ;;  %v1907_v60 = vld [vmem:[#allocation9 + $0x1ed0] sm:$0xff]  ;;  %v1924_v2 = vld [vmem:[#allocation9 + $0x1f58] sm:$0xff]  ;;  %v1037_v62 = vld [vmem:[#allocation9 + $0x3a0] sm:$0xff] }
 0x35a   :  { %4786 = vmatprep.subr.bf16.mxu1 %v4785_v30  ;;  %v4759_v30 = vpack.c.bf16 %v1875_v18, %v1867_v16  ;;  %v1045_v8 = vld [vmem:[#allocation9 + $0x3e0] sm:$0xff]  ;;  %v1054_v9 = vld [vmem:[#allocation9 + $0x428] sm:$0xff]  ;;  %v1915_v7 = vld [vmem:[#allocation9 + $0x1f10] sm:$0xff] }
 0x35b   :  { %4748 = vmatpush1.bf16.msra.mxu0 %v4747_v36  ;;  %v4761_v36 = vpack.c.bf16 %v1892_v23, %v1884_v22  ;;  %v1062_v12 = vld [vmem:[#allocation9 + $0x468] sm:$0xff]  ;;  %v1923_v13 = vld [vmem:[#allocation9 + $0x1f50] sm:$0xff]  ;;  %v1932_v16 = vld [vmem:[#allocation9 + $0x1f98] sm:$0xff] }
 0x35c   :  { %4750 = vmatprep.subr.bf16.mxu0 %v4749_v42  ;;  %v4799_v42 = vpack.c.bf16 %v1013_v26, %v1005_v27  ;;  %v1940_v18 = vld [vmem:[#allocation9 + $0x1fd8] sm:$0xff]  ;;  %v1053_v22 = vld [vmem:[#allocation9 + $0x420] sm:$0xff]  ;;  %v1070_v27 = vld [vmem:[#allocation9 + $0x4a8] sm:$0xff] }
 0x35d   :  { %4788 = vmatpush1.bf16.msra.mxu1 %v4787_v49  ;;  %v4801_v49 = vpack.c.bf16 %v1030_v32, %v1022_v31  ;;  %v1061_v23 = vld [vmem:[#allocation9 + $0x460] sm:$0xff]  ;;  %v1078_v26 = vld [vmem:[#allocation9 + $0x4e8] sm:$0xff]  ;;  %v1931_v31 = vld [vmem:[#allocation9 + $0x1f90] sm:$0xff] }
 0x35e   :  { %4790 = vmatprep.subr.bf16.mxu1 %v4789_v54  ;;  %v4763_v54 = vpack.c.bf16 %v1891_v39, %v1883_v38  ;;  %v1939_v32 = vld [vmem:[#allocation9 + $0x1fd0] sm:$0xff]  ;;  %v928_v38 = vld [vmem:[#allocation9 + $0x38] sm:$0xff] }
 0x35f   :  { %4752 = vmatpush1.bf16.msra.mxu0 %v4751_v56  ;;  %v4765_v56 = vpack.c.bf16 %v1908_v47, %v1900_v43  ;;  %v936_v39 = vld [vmem:[#allocation9 + $0x78] sm:$0xff]  ;;  %v1069_v43 = vld [vmem:[#allocation9 + $0x4a0] sm:$0xff] }
 0x360   :  { %4754 = vmatprep.subr.bf16.mxu0 %v4753_v61  ;;  %v4803_v61 = vpack.c.bf16 %v1029_v53, %v1021_v51  ;;  %v1077_v47 = vld [vmem:[#allocation9 + $0x4e0] sm:$0xff]  ;;  %v1086_v51 = vld [vmem:[#allocation9 + $0x528] sm:$0xff] }
 0x361   :  { %4792 = vmatpush1.bf16.msra.mxu1 %v4791_v3  ;;  %v4805_v3 = vpack.c.bf16 %v1046_v50, %v1038_v55  ;;  %v1094_v53 = vld [vmem:[#allocation9 + $0x568] sm:$0xff]  ;;  %v927_v55 = vld [vmem:[#allocation9 + $0x30] sm:$0xff] }
 0x362   :  { %4794 = vmatprep.subr.bf16.mxu1 %v4793_v6  ;;  %v4767_v6 = vpack.c.bf16 %v1907_v60, %v1899_v58  ;;  %v935_v50 = vld [vmem:[#allocation9 + $0x70] sm:$0xff]  ;;  %v944_v58 = vld [vmem:[#allocation9 + $0xb8] sm:$0xff] }
 0x363   :  { %4756 = vmatpush1.bf16.msra.mxu0 %v4755_v11  ;;  %v4769_v11 = vpack.c.bf16 %v1924_v2, %v1916_v1  ;;  %v952_v60 = vld [vmem:[#allocation9 + $0xf8] sm:$0xff]  ;;  %v1085_v1 = vld [vmem:[#allocation9 + $0x520] sm:$0xff] }
 0x364   :  { %4758 = vmatprep.subr.bf16.mxu0 %v4757_v14  ;;  %v4807_v14 = vpack.c.bf16 %v1045_v8, %v1037_v62  ;;  %v1093_v2 = vld [vmem:[#allocation9 + $0x560] sm:$0xff]  ;;  %v1102_v62 = vld [vmem:[#allocation9 + $0x5a8] sm:$0xff] }
 0x365   :  { %4796 = vmatpush1.bf16.msra.mxu1 %v4795_v19  ;;  %v4809_v19 = vpack.c.bf16 %v1062_v12, %v1054_v9  ;;  %v1110_v8 = vld [vmem:[#allocation9 + $0x5e8] sm:$0xff]  ;;  %v943_v9 = vld [vmem:[#allocation9 + $0xb0] sm:$0xff] }
 0x366   :  { %4798 = vmatprep.subr.bf16.mxu1 %v4797_v25  ;;  %v4771_v25 = vpack.c.bf16 %v1923_v13, %v1915_v7  ;;  %v951_v12 = vld [vmem:[#allocation9 + $0xf0] sm:$0xff]  ;;  %v960_v7 = vld [vmem:[#allocation9 + $0x138] sm:$0xff] }
 0x367   :  { %4760 = vmatpush1.bf16.msra.mxu0 %v4759_v30  ;;  %v4773_v30 = vpack.c.bf16 %v1940_v18, %v1932_v16  ;;  %v968_v13 = vld [vmem:[#allocation9 + $0x178] sm:$0xff]  ;;  %v1101_v16 = vld [vmem:[#allocation9 + $0x5a0] sm:$0xff] }
 0x368   :  { %4762 = vmatprep.subr.bf16.mxu0 %v4761_v36  ;;  %v4811_v36 = vpack.c.bf16 %v1061_v23, %v1053_v22  ;;  %v1109_v18 = vld [vmem:[#allocation9 + $0x5e0] sm:$0xff]  ;;  %v1118_v22 = vld [vmem:[#allocation9 + $0x628] sm:$0xff] }
 0x369   :  { %4800 = vmatpush1.bf16.msra.mxu1 %v4799_v42  ;;  %v4813_v42 = vpack.c.bf16 %v1078_v26, %v1070_v27  ;;  %v1126_v23 = vld [vmem:[#allocation9 + $0x668] sm:$0xff]  ;;  %v959_v27 = vld [vmem:[#allocation9 + $0x130] sm:$0xff] }
 0x36a   :  { %4802 = vmatprep.subr.bf16.mxu1 %v4801_v49  ;;  %v4775_v49 = vpack.c.bf16 %v1939_v32, %v1931_v31  ;;  %v967_v26 = vld [vmem:[#allocation9 + $0x170] sm:$0xff]  ;;  %v976_v31 = vld [vmem:[#allocation9 + $0x1b8] sm:$0xff] }
 0x36b   :  { %4764 = vmatpush1.bf16.msra.mxu0 %v4763_v54  ;;  %v5033_v54 = vpack.c.bf16 %v936_v39, %v928_v38  ;;  %v984_v32 = vld [vmem:[#allocation9 + $0x1f8] sm:$0xff]  ;;  %v1117_v38 = vld [vmem:[#allocation9 + $0x620] sm:$0xff] }
 0x36c   :  { %4766 = vmatprep.subr.bf16.mxu0 %v4765_v56  ;;  %v4815_v56 = vpack.c.bf16 %v1077_v47, %v1069_v43  ;;  %v1125_v39 = vld [vmem:[#allocation9 + $0x660] sm:$0xff]  ;;  %v1134_v43 = vld [vmem:[#allocation9 + $0x6a8] sm:$0xff] }
 0x36d   :  { %4804 = vmatpush1.bf16.msra.mxu1 %v4803_v61  ;;  %v4817_v61 = vpack.c.bf16 %v1094_v53, %v1086_v51  ;;  %v1142_v47 = vld [vmem:[#allocation9 + $0x6e8] sm:$0xff]  ;;  %v975_v51 = vld [vmem:[#allocation9 + $0x1b0] sm:$0xff] }
 0x36e   :  { %4806 = vmatprep.subr.bf16.mxu1 %v4805_v3  ;;  %v5035_v3 = vpack.c.bf16 %v935_v50, %v927_v55  ;;  %v983_v53 = vld [vmem:[#allocation9 + $0x1f0] sm:$0xff]  ;;  %v992_v55 = vld [vmem:[#allocation9 + $0x238] sm:$0xff] }
 0x36f   :  { %4768 = vmatpush1.bf16.msra.mxu0 %v4767_v6  ;;  %v5037_v6 = vpack.c.bf16 %v952_v60, %v944_v58  ;;  %v1000_v50 = vld [vmem:[#allocation9 + $0x278] sm:$0xff]  ;;  %v1133_v58 = vld [vmem:[#allocation9 + $0x6a0] sm:$0xff] }
 0x370   :  { %4770 = vmatprep.subr.bf16.mxu0 %v4769_v11  ;;  %v4819_v11 = vpack.c.bf16 %v1093_v2, %v1085_v1  ;;  %v1141_v60 = vld [vmem:[#allocation9 + $0x6e0] sm:$0xff]  ;;  %v1150_v1 = vld [vmem:[#allocation9 + $0x728] sm:$0xff] }
 0x371   :  { %4808 = vmatpush1.bf16.msra.mxu1 %v4807_v14  ;;  %v4821_v14 = vpack.c.bf16 %v1110_v8, %v1102_v62  ;;  %v1158_v2 = vld [vmem:[#allocation9 + $0x768] sm:$0xff]  ;;  %v999_v62 = vld [vmem:[#allocation9 + $0x270] sm:$0xff]  ;;  %v4831_v8 = vpack.c.bf16 %v1141_v60, %v1133_v58 }
 0x372   :  { %4810 = vmatprep.subr.bf16.mxu1 %v4809_v19  ;;  %v5039_v19 = vpack.c.bf16 %v951_v12, %v943_v9  ;;  %v1016_v9 = vld [vmem:[#allocation9 + $0x2f8] sm:$0xff]  ;;  %v4833_v12 = vpack.c.bf16 %v1158_v2, %v1150_v1  ;;  %v1206_v58 = vld [vmem:[#allocation9 + $0x8e8] sm:$0xff]  ;;  %v1047_v1 = vld [vmem:[#allocation9 + $0x3f0] sm:$0xff] }
 0x373   :  { %4772 = vmatpush1.bf16.msra.mxu0 %v4771_v25  ;;  %v5041_v25 = vpack.c.bf16 %v968_v13, %v960_v7  ;;  %v1157_v7 = vld [vmem:[#allocation9 + $0x760] sm:$0xff] }
 0x374   :  { %4774 = vmatprep.subr.bf16.mxu0 %v4773_v30  ;;  %v4823_v30 = vpack.c.bf16 %v1109_v18, %v1101_v16  ;;  %v1174_v16 = vld [vmem:[#allocation9 + $0x7e8] sm:$0xff] }
 0x375   :  { %4812 = vmatpush1.bf16.msra.mxu1 %v4811_v36  ;;  %v4825_v36 = vpack.c.bf16 %v1126_v23, %v1118_v22  ;;  %v1015_v22 = vld [vmem:[#allocation9 + $0x2f0] sm:$0xff] }
 0x376   :  { %4814 = vmatprep.subr.bf16.mxu1 %v4813_v42  ;;  %v5043_v42 = vpack.c.bf16 %v967_v26, %v959_v27  ;;  %v1032_v27 = vld [vmem:[#allocation9 + $0x378] sm:$0xff] }
 0x377   :  { %4776 = vmatpush1.bf16.msra.mxu0 %v4775_v49  ;;  %v5045_v49 = vpack.c.bf16 %v984_v32, %v976_v31  ;;  %v1173_v31 = vld [vmem:[#allocation9 + $0x7e0] sm:$0xff] }
 0x378   :  { %5034 = vmatprep.subr.bf16.mxu0 %v5033_v54  ;;  %v4827_v54 = vpack.c.bf16 %v1125_v39, %v1117_v38  ;;  %v1190_v38 = vld [vmem:[#allocation9 + $0x868] sm:$0xff] }
 0x379   :  { %4816 = vmatpush1.bf16.msra.mxu1 %v4815_v56  ;;  %v4829_v56 = vpack.c.bf16 %v1142_v47, %v1134_v43  ;;  %v1031_v43 = vld [vmem:[#allocation9 + $0x370] sm:$0xff] }
 0x37a   :  { %2591 = vmatmul.mubr.f32.vlgmr.msra.gmra.mrb[16].mxu0 %v6330_v5  ;;  %4818 = vmatprep.subr.bf16.mxu1 %v4817_v61  ;;  %v5047_v61 = vpack.c.bf16 %v983_v53, %v975_v51  ;;  %v1048_v51 = vld [vmem:[#allocation9 + $0x3f8] sm:$0xff] }
 0x37b   :  { %2596 = vmatprep.mubr.f32.mxu0 %v6335_v20  ;;  %5036 = vmatpush1.bf16.msra.mxu0 %v5035_v3  ;;  %v991_v3 = vld [vmem:[#allocation9 + $0x230] sm:$0xff] }
 0x37c   :  { %5038 = vmatprep.subr.bf16.mxu0 %v5037_v6  ;;  %v1008_v6 = vld [vmem:[#allocation9 + $0x2b8] sm:$0xff]  ;;  %v5051_v13 = vpack.c.bf16 %v999_v62, %v991_v3 }
 0x37d   :  { %4820 = vmatpush1.bf16.msra.mxu1 %v4819_v11  ;;  %v1149_v11 = vld [vmem:[#allocation9 + $0x720] sm:$0xff]  ;;  %v5053_v18 = vpack.c.bf16 %v1016_v9, %v1008_v6  ;;  %v1064_v3 = vld [vmem:[#allocation9 + $0x478] sm:$0xff] }
 0x37e   :  { %2597 = vmatmul.mubr.f32.gmra.mrb[18].mxu0 %v6337_v28  ;;  %4822 = vmatprep.subr.bf16.mxu1 %v4821_v14  ;;  %v1166_v14 = vld [vmem:[#allocation9 + $0x7a8] sm:$0xff]  ;;  %v4835_v23 = vpack.c.bf16 %v1157_v7, %v1149_v11  ;;  %v1205_v6 = vld [vmem:[#allocation9 + $0x8e0] sm:$0xff] }
 0x37f   :  { %5040 = vmatpush1.bf16.msra.mxu0 %v5039_v19  ;;  %2975 = vmatprep.mubr.f32.mxu0 %v6254_v35  ;;  %v5049_v35 = vpack.c.bf16 %v1000_v50, %v992_v55  ;;  %v1007_v19 = vld [vmem:[#allocation9 + $0x2b0] sm:$0xff]  ;;  %v4837_v26 = vpack.c.bf16 %v1174_v16, %v1166_v14  ;;  %v1189_v55 = vld [vmem:[#allocation9 + $0x860] sm:$0xff]  ;;  %v1222_v11 = vld [vmem:[#allocation9 + $0x968] sm:$0xff] }
 0x380   :  { %5042 = vmatprep.subr.bf16.mxu0 %v5041_v25  ;;  %v1024_v25 = vld [vmem:[#allocation9 + $0x338] sm:$0xff]  ;;  %v5055_v32 = vpack.c.bf16 %v1015_v22, %v1007_v19  ;;  %v1063_v14 = vld [vmem:[#allocation9 + $0x470] sm:$0xff] }
 0x381   :  { %4824 = vmatpush1.bf16.msra.mxu1 %v4823_v30  ;;  %v1165_v30 = vld [vmem:[#allocation9 + $0x7a0] sm:$0xff]  ;;  %v5057_v39 = vpack.c.bf16 %v1032_v27, %v1024_v25  ;;  %v1080_v19 = vld [vmem:[#allocation9 + $0x4f8] sm:$0xff] }
 0x382   :  { %4826 = vmatprep.subr.bf16.mxu1 %v4825_v36  ;;  %v1182_v36 = vld [vmem:[#allocation9 + $0x828] sm:$0xff]  ;;  %v4839_v47 = vpack.c.bf16 %v1173_v31, %v1165_v30  ;;  %v1221_v25 = vld [vmem:[#allocation9 + $0x960] sm:$0xff] }
 0x383   :  { %5044 = vmatpush1.bf16.msra.mxu0 %v5043_v42  ;;  %v1023_v42 = vld [vmem:[#allocation9 + $0x330] sm:$0xff]  ;;  %v4841_v53 = vpack.c.bf16 %v1190_v38, %v1182_v36  ;;  %v1238_v30 = vld [vmem:[#allocation9 + $0x9e8] sm:$0xff] }
 0x384   :  { %5046 = vmatprep.subr.bf16.mxu0 %v5045_v49  ;;  %v1040_v49 = vld [vmem:[#allocation9 + $0x3b8] sm:$0xff]  ;;  %v5059_v50 = vpack.c.bf16 %v1031_v43, %v1023_v42  ;;  %v1079_v36 = vld [vmem:[#allocation9 + $0x4f0] sm:$0xff] }
 0x385   :  { %4828 = vmatpush1.bf16.msra.mxu1 %v4827_v54  ;;  %v1181_v54 = vld [vmem:[#allocation9 + $0x820] sm:$0xff]  ;;  %v5061_v60 = vpack.c.bf16 %v1048_v51, %v1040_v49  ;;  %v1096_v42 = vld [vmem:[#allocation9 + $0x578] sm:$0xff] }
 0x386   :  { %4830 = vmatprep.subr.bf16.mxu1 %v4829_v56  ;;  %v1198_v56 = vld [vmem:[#allocation9 + $0x8a8] sm:$0xff]  ;;  %v4843_v2 = vpack.c.bf16 %v1189_v55, %v1181_v54  ;;  %v1237_v49 = vld [vmem:[#allocation9 + $0x9e0] sm:$0xff] }
 0x387   :  { %5048 = vmatpush1.bf16.msra.mxu0 %v5047_v61  ;;  %v1039_v61 = vld [vmem:[#allocation9 + $0x3b0] sm:$0xff]  ;;  %v4845_v62 = vpack.c.bf16 %v1206_v58, %v1198_v56  ;;  %v1254_v54 = vld [vmem:[#allocation9 + $0xa68] sm:$0xff] }
 0x388   :  { %5050 = vmatprep.subr.bf16.mxu0 %v5049_v35  ;;  %v1056_v35 = vld [vmem:[#allocation9 + $0x438] sm:$0xff]  ;;  %v5063_v9 = vpack.c.bf16 %v1047_v1, %v1039_v61  ;;  %v1095_v56 = vld [vmem:[#allocation9 + $0x570] sm:$0xff] }
 0x389   :  { %4832 = vmatpush1.bf16.msra.mxu1 %v4831_v8  ;;  %v1197_v8 = vld [vmem:[#allocation9 + $0x8a0] sm:$0xff]  ;;  %v5065_v7 = vpack.c.bf16 %v1064_v3, %v1056_v35  ;;  %v1112_v61 = vld [vmem:[#allocation9 + $0x5f8] sm:$0xff] }
 0x38a   :  { %4834 = vmatprep.subr.bf16.mxu1 %v4833_v12  ;;  %v1214_v12 = vld [vmem:[#allocation9 + $0x928] sm:$0xff]  ;;  %v4847_v16 = vpack.c.bf16 %v1205_v6, %v1197_v8  ;;  %v1253_v35 = vld [vmem:[#allocation9 + $0xa60] sm:$0xff] }
 0x38b   :  { %5052 = vmatpush1.bf16.msra.mxu0 %v5051_v13  ;;  %v1055_v13 = vld [vmem:[#allocation9 + $0x430] sm:$0xff]  ;;  %v4849_v22 = vpack.c.bf16 %v1222_v11, %v1214_v12  ;;  %v1270_v8 = vld [vmem:[#allocation9 + $0xae8] sm:$0xff] }
 0x38c   :  { %5054 = vmatprep.subr.bf16.mxu0 %v5053_v18  ;;  %v1072_v18 = vld [vmem:[#allocation9 + $0x4b8] sm:$0xff]  ;;  %v5067_v27 = vpack.c.bf16 %v1063_v14, %v1055_v13  ;;  %v1111_v12 = vld [vmem:[#allocation9 + $0x5f0] sm:$0xff] }
 0x38d   :  { %4836 = vmatpush1.bf16.msra.mxu1 %v4835_v23  ;;  %v1213_v23 = vld [vmem:[#allocation9 + $0x920] sm:$0xff]  ;;  %v5069_v31 = vpack.c.bf16 %v1080_v19, %v1072_v18  ;;  %v1128_v13 = vld [vmem:[#allocation9 + $0x678] sm:$0xff] }
 0x38e   :  { %4838 = vmatprep.subr.bf16.mxu1 %v4837_v26  ;;  %v1230_v26 = vld [vmem:[#allocation9 + $0x9a8] sm:$0xff]  ;;  %v4851_v38 = vpack.c.bf16 %v1221_v25, %v1213_v23  ;;  %v1269_v18 = vld [vmem:[#allocation9 + $0xae0] sm:$0xff] }
 0x38f   :  { %5056 = vmatpush1.bf16.msra.mxu0 %v5055_v32  ;;  %v1071_v32 = vld [vmem:[#allocation9 + $0x4b0] sm:$0xff]  ;;  %v4853_v43 = vpack.c.bf16 %v1238_v30, %v1230_v26  ;;  %v1286_v23 = vld [vmem:[#allocation9 + $0xb68] sm:$0xff] }
 0x390   :  { %5058 = vmatprep.subr.bf16.mxu0 %v5057_v39  ;;  %v1088_v39 = vld [vmem:[#allocation9 + $0x538] sm:$0xff]  ;;  %v5071_v51 = vpack.c.bf16 %v1079_v36, %v1071_v32  ;;  %v1127_v26 = vld [vmem:[#allocation9 + $0x670] sm:$0xff] }
 0x391   :  { %4840 = vmatpush1.bf16.msra.mxu1 %v4839_v47  ;;  %v1229_v47 = vld [vmem:[#allocation9 + $0x9a0] sm:$0xff]  ;;  %v5073_v55 = vpack.c.bf16 %v1096_v42, %v1088_v39  ;;  %v1144_v32 = vld [vmem:[#allocation9 + $0x6f8] sm:$0xff] }
 0x392   :  { %4842 = vmatprep.subr.bf16.mxu1 %v4841_v53  ;;  %v1246_v53 = vld [vmem:[#allocation9 + $0xa28] sm:$0xff]  ;;  %v4855_v58 = vpack.c.bf16 %v1237_v49, %v1229_v47  ;;  %v1285_v39 = vld [vmem:[#allocation9 + $0xb60] sm:$0xff] }
 0x393   :  { %5060 = vmatpush1.bf16.msra.mxu0 %v5059_v50  ;;  %v1087_v50 = vld [vmem:[#allocation9 + $0x530] sm:$0xff]  ;;  %v4857_v1 = vpack.c.bf16 %v1254_v54, %v1246_v53  ;;  %v1302_v47 = vld [vmem:[#allocation9 + $0xbe8] sm:$0xff] }
 0x394   :  { %2668 = vmatmul.mubr.f32.vlgmr.msra.gmra.mrb[8].mxu1 %v6256_v41  ;;  %5062 = vmatprep.subr.bf16.mxu0 %v5061_v60  ;;  %v1104_v60 = vld [vmem:[#allocation9 + $0x5b8] sm:$0xff]  ;;  %v5075_v3 = vpack.c.bf16 %v1095_v56, %v1087_v50  ;;  %v1143_v53 = vld [vmem:[#allocation9 + $0x6f0] sm:$0xff] }
 0x395   :  { %2673 = vmatprep.mubr.f32.mxu1 %v6263_v63  ;;  %4844 = vmatpush1.bf16.msra.mxu1 %v4843_v2  ;;  %v1245_v2 = vld [vmem:[#allocation9 + $0xa20] sm:$0xff]  ;;  %v5077_v6 = vpack.c.bf16 %v1112_v61, %v1104_v60  ;;  %v1160_v50 = vld [vmem:[#allocation9 + $0x778] sm:$0xff] }
 0x396   :  { %4846 = vmatprep.subr.bf16.mxu1 %v4845_v62  ;;  %v1262_v62 = vld [vmem:[#allocation9 + $0xaa8] sm:$0xff]  ;;  %v4859_v11 = vpack.c.bf16 %v1253_v35, %v1245_v2  ;;  %v1301_v60 = vld [vmem:[#allocation9 + $0xbe0] sm:$0xff] }
 0x397   :  { %5064 = vmatpush1.bf16.msra.mxu0 %v5063_v9  ;;  %v1103_v9 = vld [vmem:[#allocation9 + $0x5b0] sm:$0xff]  ;;  %v4861_v14 = vpack.c.bf16 %v1270_v8, %v1262_v62  ;;  %v1318_v2 = vld [vmem:[#allocation9 + $0xc68] sm:$0xff] }
 0x398   :  { %2674 = vmatmul.mubr.f32.gmra.mrb[10].mxu1 %v6261_v57  ;;  %5066 = vmatprep.subr.bf16.mxu0 %v5065_v7  ;;  %v1120_v7 = vld [vmem:[#allocation9 + $0x638] sm:$0xff]  ;;  %v5079_v19 = vpack.c.bf16 %v1111_v12, %v1103_v9  ;;  %v1159_v62 = vld [vmem:[#allocation9 + $0x770] sm:$0xff] }
 0x399   :  { %4848 = vmatpush1.bf16.msra.mxu1 %v4847_v16  ;;  %2744 = vmatprep.mubr.f32.mxu1 %v6278_v15  ;;  %v1261_v16 = vld [vmem:[#allocation9 + $0xaa0] sm:$0xff]  ;;  %v5081_v25 = vpack.c.bf16 %v1128_v13, %v1120_v7  ;;  %v1176_v9 = vld [vmem:[#allocation9 + $0x7f8] sm:$0xff] }
 0x39a   :  { %4850 = vmatprep.subr.bf16.mxu1 %v4849_v22  ;;  %v1278_v22 = vld [vmem:[#allocation9 + $0xb28] sm:$0xff]  ;;  %v4863_v30 = vpack.c.bf16 %v1269_v18, %v1261_v16  ;;  %v1317_v7 = vld [vmem:[#allocation9 + $0xc60] sm:$0xff] }
 0x39b   :  { %5068 = vmatpush1.bf16.msra.mxu0 %v5067_v27  ;;  %v1119_v27 = vld [vmem:[#allocation9 + $0x630] sm:$0xff]  ;;  %v4865_v36 = vpack.c.bf16 %v1286_v23, %v1278_v22  ;;  %v1334_v16 = vld [vmem:[#allocation9 + $0xce8] sm:$0xff] }
 0x39c   :  { %5070 = vmatprep.subr.bf16.mxu0 %v5069_v31  ;;  %v1136_v31 = vld [vmem:[#allocation9 + $0x6b8] sm:$0xff]  ;;  %v5083_v42 = vpack.c.bf16 %v1127_v26, %v1119_v27  ;;  %v1175_v22 = vld [vmem:[#allocation9 + $0x7f0] sm:$0xff] }
 0x39d   :  { %4852 = vmatpush1.bf16.msra.mxu1 %v4851_v38  ;;  %v1277_v38 = vld [vmem:[#allocation9 + $0xb20] sm:$0xff]  ;;  %v5085_v49 = vpack.c.bf16 %v1144_v32, %v1136_v31  ;;  %v1192_v27 = vld [vmem:[#allocation9 + $0x878] sm:$0xff] }
 0x39e   :  { %4854 = vmatprep.subr.bf16.mxu1 %v4853_v43  ;;  %v1294_v43 = vld [vmem:[#allocation9 + $0xba8] sm:$0xff]  ;;  %v4867_v54 = vpack.c.bf16 %v1285_v39, %v1277_v38  ;;  %v1333_v31 = vld [vmem:[#allocation9 + $0xce0] sm:$0xff] }
 0x39f   :  { %5072 = vmatpush1.bf16.msra.mxu0 %v5071_v51  ;;  %v1135_v51 = vld [vmem:[#allocation9 + $0x6b0] sm:$0xff]  ;;  %v4869_v56 = vpack.c.bf16 %v1302_v47, %v1294_v43  ;;  %v1350_v38 = vld [vmem:[#allocation9 + $0xd68] sm:$0xff] }
 0x3a0   :  { %5074 = vmatprep.subr.bf16.mxu0 %v5073_v55  ;;  %v1152_v55 = vld [vmem:[#allocation9 + $0x738] sm:$0xff]  ;;  %v5087_v61 = vpack.c.bf16 %v1143_v53, %v1135_v51  ;;  %v1191_v43 = vld [vmem:[#allocation9 + $0x870] sm:$0xff] }
 0x3a1   :  { %4856 = vmatpush1.bf16.msra.mxu1 %v4855_v58  ;;  %v1293_v58 = vld [vmem:[#allocation9 + $0xba0] sm:$0xff]  ;;  %v5089_v35 = vpack.c.bf16 %v1160_v50, %v1152_v55  ;;  %v1208_v51 = vld [vmem:[#allocation9 + $0x8f8] sm:$0xff] }
 0x3a2   :  { %4858 = vmatprep.subr.bf16.mxu1 %v4857_v1  ;;  %v1310_v1 = vld [vmem:[#allocation9 + $0xc28] sm:$0xff]  ;;  %v4871_v8 = vpack.c.bf16 %v1301_v60, %v1293_v58  ;;  %v1349_v55 = vld [vmem:[#allocation9 + $0xd60] sm:$0xff] }
 0x3a3   :  { %5076 = vmatpush1.bf16.msra.mxu0 %v5075_v3  ;;  %v1151_v3 = vld [vmem:[#allocation9 + $0x730] sm:$0xff]  ;;  %v4873_v12 = vpack.c.bf16 %v1318_v2, %v1310_v1  ;;  %v1366_v58 = vld [vmem:[#allocation9 + $0xde8] sm:$0xff] }
 0x3a4   :  { %5078 = vmatprep.subr.bf16.mxu0 %v5077_v6  ;;  %v1168_v6 = vld [vmem:[#allocation9 + $0x7b8] sm:$0xff]  ;;  %v5091_v13 = vpack.c.bf16 %v1159_v62, %v1151_v3  ;;  %v1207_v1 = vld [vmem:[#allocation9 + $0x8f0] sm:$0xff] }
 0x3a5   :  { %4860 = vmatpush1.bf16.msra.mxu1 %v4859_v11  ;;  %v1309_v11 = vld [vmem:[#allocation9 + $0xc20] sm:$0xff]  ;;  %v5093_v18 = vpack.c.bf16 %v1176_v9, %v1168_v6  ;;  %v1224_v3 = vld [vmem:[#allocation9 + $0x978] sm:$0xff] }
 0x3a6   :  { %4862 = vmatprep.subr.bf16.mxu1 %v4861_v14  ;;  %v1326_v14 = vld [vmem:[#allocation9 + $0xca8] sm:$0xff]  ;;  %v4875_v23 = vpack.c.bf16 %v1317_v7, %v1309_v11  ;;  %v1365_v6 = vld [vmem:[#allocation9 + $0xde0] sm:$0xff] }
 0x3a7   :  { %5080 = vmatpush1.bf16.msra.mxu0 %v5079_v19  ;;  %v1167_v19 = vld [vmem:[#allocation9 + $0x7b0] sm:$0xff]  ;;  %v4877_v26 = vpack.c.bf16 %v1334_v16, %v1326_v14  ;;  %v1382_v11 = vld [vmem:[#allocation9 + $0xe68] sm:$0xff] }
 0x3a8   :  { %5082 = vmatprep.subr.bf16.mxu0 %v5081_v25  ;;  %v1184_v25 = vld [vmem:[#allocation9 + $0x838] sm:$0xff]  ;;  %v5095_v32 = vpack.c.bf16 %v1175_v22, %v1167_v19  ;;  %v1223_v14 = vld [vmem:[#allocation9 + $0x970] sm:$0xff]  ;;  %v1373_v22 = vld [vmem:[#allocation9 + $0xe20] sm:$0xff] }
 0x3a9   :  { %4864 = vmatpush1.bf16.msra.mxu1 %v4863_v30  ;;  %v1325_v30 = vld [vmem:[#allocation9 + $0xca0] sm:$0xff]  ;;  %v5097_v39 = vpack.c.bf16 %v1192_v27, %v1184_v25  ;;  %v1240_v19 = vld [vmem:[#allocation9 + $0x9f8] sm:$0xff]  ;;  %v1390_v25 = vld [vmem:[#allocation9 + $0xea8] sm:$0xff] }
 0x3aa   :  { %4866 = vmatprep.subr.bf16.mxu1 %v4865_v36  ;;  %v1342_v36 = vld [vmem:[#allocation9 + $0xd28] sm:$0xff]  ;;  %v4879_v47 = vpack.c.bf16 %v1333_v31, %v1325_v30  ;;  %v1231_v30 = vld [vmem:[#allocation9 + $0x9b0] sm:$0xff] }
 0x3ab   :  { %5084 = vmatpush1.bf16.msra.mxu0 %v5083_v42  ;;  %v1183_v42 = vld [vmem:[#allocation9 + $0x830] sm:$0xff]  ;;  %v4881_v53 = vpack.c.bf16 %v1350_v38, %v1342_v36  ;;  %v1398_v27 = vld [vmem:[#allocation9 + $0xee8] sm:$0xff]  ;;  %v1248_v36 = vld [vmem:[#allocation9 + $0xa38] sm:$0xff] }
 0x3ac   :  { %5086 = vmatprep.subr.bf16.mxu0 %v5085_v49  ;;  %v1200_v49 = vld [vmem:[#allocation9 + $0x8b8] sm:$0xff]  ;;  %v5099_v50 = vpack.c.bf16 %v1191_v43, %v1183_v42  ;;  %v1239_v31 = vld [vmem:[#allocation9 + $0x9f0] sm:$0xff]  ;;  %v1397_v42 = vld [vmem:[#allocation9 + $0xee0] sm:$0xff] }
 0x3ad   :  { %4868 = vmatpush1.bf16.msra.mxu1 %v4867_v54  ;;  %v1341_v54 = vld [vmem:[#allocation9 + $0xd20] sm:$0xff]  ;;  %v5101_v60 = vpack.c.bf16 %v1208_v51, %v1200_v49  ;;  %v1256_v38 = vld [vmem:[#allocation9 + $0xa78] sm:$0xff]  ;;  %v5111_v43 = vpack.c.bf16 %v1239_v31, %v1231_v30  ;;  %v1414_v49 = vld [vmem:[#allocation9 + $0xf68] sm:$0xff] }
 0x3ae   :  { %4870 = vmatprep.subr.bf16.mxu1 %v4869_v56  ;;  %v1358_v56 = vld [vmem:[#allocation9 + $0xda8] sm:$0xff]  ;;  %v4883_v2 = vpack.c.bf16 %v1349_v55, %v1341_v54  ;;  %v1247_v51 = vld [vmem:[#allocation9 + $0xa30] sm:$0xff]  ;;  %v1264_v55 = vld [vmem:[#allocation9 + $0xab8] sm:$0xff] }
 0x3af   :  { %5088 = vmatpush1.bf16.msra.mxu0 %v5087_v61  ;;  %v1199_v61 = vld [vmem:[#allocation9 + $0x8b0] sm:$0xff]  ;;  %v4885_v62 = vpack.c.bf16 %v1366_v58, %v1358_v56  ;;  %v1405_v58 = vld [vmem:[#allocation9 + $0xf20] sm:$0xff]  ;;  %v1454_v31 = vld [vmem:[#allocation9 + $0x10a8] sm:$0xff] }
 0x3b0   :  { %5090 = vmatprep.subr.bf16.mxu0 %v5089_v35  ;;  %v1216_v35 = vld [vmem:[#allocation9 + $0x938] sm:$0xff]  ;;  %v5103_v9 = vpack.c.bf16 %v1207_v1, %v1199_v61  ;;  %v1422_v1 = vld [vmem:[#allocation9 + $0xfa8] sm:$0xff] }
 0x3b1   :  { %4872 = vmatpush1.bf16.msra.mxu1 %v4871_v8  ;;  %v1357_v8 = vld [vmem:[#allocation9 + $0xda0] sm:$0xff]  ;;  %v5105_v7 = vpack.c.bf16 %v1224_v3, %v1216_v35  ;;  %v1263_v3 = vld [vmem:[#allocation9 + $0xab0] sm:$0xff] }
 0x3b2   :  { %4874 = vmatprep.subr.bf16.mxu1 %v4873_v12  ;;  %v1374_v12 = vld [vmem:[#allocation9 + $0xe28] sm:$0xff]  ;;  %v4887_v16 = vpack.c.bf16 %v1365_v6, %v1357_v8  ;;  %v1280_v6 = vld [vmem:[#allocation9 + $0xb38] sm:$0xff] }
 0x3b3   :  { %5092 = vmatpush1.bf16.msra.mxu0 %v5091_v13  ;;  %v1215_v13 = vld [vmem:[#allocation9 + $0x930] sm:$0xff] }
 0x3b4   :  { %5094 = vmatprep.subr.bf16.mxu0 %v5093_v18  ;;  %v1232_v18 = vld [vmem:[#allocation9 + $0x9b8] sm:$0xff] }
 0x3b5   :  { %4876 = vmatpush1.bf16.msra.mxu1 %v4875_v23  ;;  %v1381_v23 = vld [vmem:[#allocation9 + $0xe60] sm:$0xff] }
 0x3b6   :  { %4878 = vmatprep.subr.bf16.mxu1 %v4877_v26  ;;  %v5109_v26 = vpack.c.bf16 %v1240_v19, %v1232_v18  ;;  %v1279_v19 = vld [vmem:[#allocation9 + $0xb30] sm:$0xff] }
 0x3b7   :  { %5096 = vmatpush1.bf16.msra.mxu0 %v5095_v32  ;;  %v4891_v32 = vpack.c.bf16 %v1381_v23, %v1373_v22  ;;  %v1296_v23 = vld [vmem:[#allocation9 + $0xbb8] sm:$0xff] }
 0x3b8   :  { %5098 = vmatprep.subr.bf16.mxu0 %v5097_v39  ;;  %v1389_v39 = vld [vmem:[#allocation9 + $0xea0] sm:$0xff] }
 0x3b9   :  { %4880 = vmatpush1.bf16.msra.mxu1 %v4879_v47  ;;  %v1406_v47 = vld [vmem:[#allocation9 + $0xf28] sm:$0xff]  ;;  %v4895_v54 = vpack.c.bf16 %v1397_v42, %v1389_v39  ;;  %v1312_v42 = vld [vmem:[#allocation9 + $0xc38] sm:$0xff] }
 0x3ba   :  { %2976 = vmatmul.mubr.f32.vlgmr.msra.gmra.mrb[20].mxu0 %v6256_v41  ;;  %4882 = vmatprep.subr.bf16.mxu1 %v4881_v53  ;;  %v4889_v41 = vpack.c.bf16 %v1382_v11, %v1374_v12  ;;  %v1255_v53 = vld [vmem:[#allocation9 + $0xa70] sm:$0xff]  ;;  %v4897_v56 = vpack.c.bf16 %v1414_v49, %v1406_v47  ;;  %v1421_v11 = vld [vmem:[#allocation9 + $0xfa0] sm:$0xff] }
 0x3bb   :  { %2981 = vmatprep.mubr.f32.mxu0 %v6263_v63  ;;  %5100 = vmatpush1.bf16.msra.mxu0 %v5099_v50  ;;  %v5107_v63 = vpack.c.bf16 %v1223_v14, %v1215_v13  ;;  %v1272_v50 = vld [vmem:[#allocation9 + $0xaf8] sm:$0xff]  ;;  %v5115_v61 = vpack.c.bf16 %v1255_v53, %v1247_v51  ;;  %v1438_v14 = vld [vmem:[#allocation9 + $0x1028] sm:$0xff]  ;;  %v1453_v49 = vld [vmem:[#allocation9 + $0x10a0] sm:$0xff] }
 0x3bc   :  { %5102 = vmatprep.subr.bf16.mxu0 %v5101_v60  ;;  %v1413_v60 = vld [vmem:[#allocation9 + $0xf60] sm:$0xff]  ;;  %v5117_v35 = vpack.c.bf16 %v1272_v50, %v1264_v55  ;;  %v1470_v53 = vld [vmem:[#allocation9 + $0x1128] sm:$0xff]  ;;  %v1311_v50 = vld [vmem:[#allocation9 + $0xc30] sm:$0xff] }
 0x3bd   :  { %4884 = vmatpush1.bf16.msra.mxu1 %v4883_v2  ;;  %v1430_v2 = vld [vmem:[#allocation9 + $0xfe8] sm:$0xff]  ;;  %v4899_v8 = vpack.c.bf16 %v1413_v60, %v1405_v58  ;;  %v1328_v60 = vld [vmem:[#allocation9 + $0xcb8] sm:$0xff] }
 0x3be   :  { %2982 = vmatmul.mubr.f32.gmra.mrb[22].mxu0 %v6261_v57  ;;  %4886 = vmatprep.subr.bf16.mxu1 %v4885_v62  ;;  %v4893_v57 = vpack.c.bf16 %v1398_v27, %v1390_v25  ;;  %v1271_v62 = vld [vmem:[#allocation9 + $0xaf0] sm:$0xff]  ;;  %v4901_v12 = vpack.c.bf16 %v1430_v2, %v1422_v1  ;;  %v1437_v27 = vld [vmem:[#allocation9 + $0x1020] sm:$0xff] }
 0x3bf   :  { %5104 = vmatpush1.bf16.msra.mxu0 %v5103_v9  ;;  %3052 = vmatprep.mubr.f32.mxu0 %v6278_v15  ;;  %v5113_v15 = vpack.c.bf16 %v1256_v38, %v1248_v36  ;;  %v1288_v9 = vld [vmem:[#allocation9 + $0xb78] sm:$0xff]  ;;  %v5119_v13 = vpack.c.bf16 %v1271_v62, %v1263_v3  ;;  %v1295_v38 = vld [vmem:[#allocation9 + $0xbb0] sm:$0xff]  ;;  %v1469_v2 = vld [vmem:[#allocation9 + $0x1120] sm:$0xff] }
 0x3c0   :  { %5106 = vmatprep.subr.bf16.mxu0 %v5105_v7  ;;  %v1429_v7 = vld [vmem:[#allocation9 + $0xfe0] sm:$0xff]  ;;  %v5121_v18 = vpack.c.bf16 %v1288_v9, %v1280_v6  ;;  %v1486_v62 = vld [vmem:[#allocation9 + $0x11a8] sm:$0xff]  ;;  %v1327_v9 = vld [vmem:[#allocation9 + $0xcb0] sm:$0xff] }
 0x3c1   :  { %4888 = vmatpush1.bf16.msra.mxu1 %v4887_v16  ;;  %v1446_v16 = vld [vmem:[#allocation9 + $0x1068] sm:$0xff]  ;;  %v4903_v22 = vpack.c.bf16 %v1429_v7, %v1421_v11  ;;  %v1344_v7 = vld [vmem:[#allocation9 + $0xd38] sm:$0xff] }
 0x3c2   :  { %4890 = vmatprep.subr.bf16.mxu1 %v4889_v41  ;;  %v1287_v41 = vld [vmem:[#allocation9 + $0xb70] sm:$0xff]  ;;  %v4905_v25 = vpack.c.bf16 %v1446_v16, %v1438_v14  ;;  %v1485_v16 = vld [vmem:[#allocation9 + $0x11a0] sm:$0xff] }
 0x3c3   :  { %5108 = vmatpush1.bf16.msra.mxu0 %v5107_v63  ;;  %v1304_v63 = vld [vmem:[#allocation9 + $0xbf8] sm:$0xff]  ;;  %v5123_v30 = vpack.c.bf16 %v1287_v41, %v1279_v19  ;;  %v1502_v41 = vld [vmem:[#allocation9 + $0x1228] sm:$0xff] }
 0x3c4   :  { %5110 = vmatprep.subr.bf16.mxu0 %v5109_v26  ;;  %v1445_v26 = vld [vmem:[#allocation9 + $0x1060] sm:$0xff]  ;;  %v5125_v36 = vpack.c.bf16 %v1304_v63, %v1296_v23  ;;  %v1343_v63 = vld [vmem:[#allocation9 + $0xd30] sm:$0xff] }
 0x3c5   :  { %4892 = vmatpush1.bf16.msra.mxu1 %v4891_v32  ;;  %v1462_v32 = vld [vmem:[#allocation9 + $0x10e8] sm:$0xff]  ;;  %v4907_v39 = vpack.c.bf16 %v1445_v26, %v1437_v27  ;;  %v1360_v26 = vld [vmem:[#allocation9 + $0xdb8] sm:$0xff] }
 0x3c6   :  { %4894 = vmatprep.subr.bf16.mxu1 %v4893_v57  ;;  %v1303_v57 = vld [vmem:[#allocation9 + $0xbf0] sm:$0xff]  ;;  %v4909_v47 = vpack.c.bf16 %v1462_v32, %v1454_v31  ;;  %v1501_v32 = vld [vmem:[#allocation9 + $0x1220] sm:$0xff] }
 0x3c7   :  { %5112 = vmatpush1.bf16.msra.mxu0 %v5111_v43  ;;  %v1320_v43 = vld [vmem:[#allocation9 + $0xc78] sm:$0xff]  ;;  %v5127_v51 = vpack.c.bf16 %v1303_v57, %v1295_v38  ;;  %v1518_v57 = vld [vmem:[#allocation9 + $0x12a8] sm:$0xff] }
 0x3c8   :  { %5114 = vmatprep.subr.bf16.mxu0 %v5113_v15  ;;  %v1461_v15 = vld [vmem:[#allocation9 + $0x10e0] sm:$0xff]  ;;  %v5129_v55 = vpack.c.bf16 %v1320_v43, %v1312_v42  ;;  %v1359_v43 = vld [vmem:[#allocation9 + $0xdb0] sm:$0xff] }
 0x3c9   :  { %4896 = vmatpush1.bf16.msra.mxu1 %v4895_v54  ;;  %v1478_v54 = vld [vmem:[#allocation9 + $0x1168] sm:$0xff]  ;;  %v4911_v58 = vpack.c.bf16 %v1461_v15, %v1453_v49  ;;  %v1376_v15 = vld [vmem:[#allocation9 + $0xe38] sm:$0xff] }
 0x3ca   :  { %4898 = vmatprep.subr.bf16.mxu1 %v4897_v56  ;;  %v1319_v56 = vld [vmem:[#allocation9 + $0xc70] sm:$0xff]  ;;  %v4913_v1 = vpack.c.bf16 %v1478_v54, %v1470_v53  ;;  %v1517_v54 = vld [vmem:[#allocation9 + $0x12a0] sm:$0xff] }
 0x3cb   :  { %5116 = vmatpush1.bf16.msra.mxu0 %v5115_v61  ;;  %v1336_v61 = vld [vmem:[#allocation9 + $0xcf8] sm:$0xff]  ;;  %v5131_v3 = vpack.c.bf16 %v1319_v56, %v1311_v50  ;;  %v1534_v56 = vld [vmem:[#allocation9 + $0x1328] sm:$0xff] }
 0x3cc   :  { %5118 = vmatprep.subr.bf16.mxu0 %v5117_v35  ;;  %v1477_v35 = vld [vmem:[#allocation9 + $0x1160] sm:$0xff]  ;;  %v5133_v6 = vpack.c.bf16 %v1336_v61, %v1328_v60  ;;  %v1375_v61 = vld [vmem:[#allocation9 + $0xe30] sm:$0xff] }
 0x3cd   :  { %4900 = vmatpush1.bf16.msra.mxu1 %v4899_v8  ;;  %v1494_v8 = vld [vmem:[#allocation9 + $0x11e8] sm:$0xff]  ;;  %v4915_v11 = vpack.c.bf16 %v1477_v35, %v1469_v2  ;;  %v1392_v35 = vld [vmem:[#allocation9 + $0xeb8] sm:$0xff] }
 0x3ce   :  { %4902 = vmatprep.subr.bf16.mxu1 %v4901_v12  ;;  %v1335_v12 = vld [vmem:[#allocation9 + $0xcf0] sm:$0xff]  ;;  %v4917_v14 = vpack.c.bf16 %v1494_v8, %v1486_v62  ;;  %v1533_v8 = vld [vmem:[#allocation9 + $0x1320] sm:$0xff] }
 0x3cf   :  { %5120 = vmatpush1.bf16.msra.mxu0 %v5119_v13  ;;  %v1352_v13 = vld [vmem:[#allocation9 + $0xd78] sm:$0xff]  ;;  %v5135_v19 = vpack.c.bf16 %v1335_v12, %v1327_v9  ;;  %v1550_v12 = vld [vmem:[#allocation9 + $0x13a8] sm:$0xff] }
 0x3d0   :  { %5122 = vmatprep.subr.bf16.mxu0 %v5121_v18  ;;  %v1493_v18 = vld [vmem:[#allocation9 + $0x11e0] sm:$0xff]  ;;  %v5137_v23 = vpack.c.bf16 %v1352_v13, %v1344_v7  ;;  %v1391_v13 = vld [vmem:[#allocation9 + $0xeb0] sm:$0xff] }
 0x3d1   :  { %4904 = vmatpush1.bf16.msra.mxu1 %v4903_v22  ;;  %v1510_v22 = vld [vmem:[#allocation9 + $0x1268] sm:$0xff]  ;;  %v4919_v27 = vpack.c.bf16 %v1493_v18, %v1485_v16  ;;  %v1408_v18 = vld [vmem:[#allocation9 + $0xf38] sm:$0xff] }
 0x3d2   :  { %4906 = vmatprep.subr.bf16.mxu1 %v4905_v25  ;;  %v1351_v25 = vld [vmem:[#allocation9 + $0xd70] sm:$0xff]  ;;  %v4921_v31 = vpack.c.bf16 %v1510_v22, %v1502_v41  ;;  %v1549_v22 = vld [vmem:[#allocation9 + $0x13a0] sm:$0xff] }
 0x3d3   :  { %5124 = vmatpush1.bf16.msra.mxu0 %v5123_v30  ;;  %v1368_v30 = vld [vmem:[#allocation9 + $0xdf8] sm:$0xff]  ;;  %v5139_v38 = vpack.c.bf16 %v1351_v25, %v1343_v63  ;;  %v1566_v25 = vld [vmem:[#allocation9 + $0x1428] sm:$0xff] }
 0x3d4   :  { %2745 = vmatmul.mubr.f32.vlgmr.msra.gmra.mrb[8].mxu1 %v6280_v21  ;;  %5126 = vmatprep.subr.bf16.mxu0 %v5125_v36  ;;  %v1509_v36 = vld [vmem:[#allocation9 + $0x1260] sm:$0xff]  ;;  %v5141_v42 = vpack.c.bf16 %v1368_v30, %v1360_v26  ;;  %v1407_v30 = vld [vmem:[#allocation9 + $0xf30] sm:$0xff] }
 0x3d5   :  { %2750 = vmatprep.mubr.f32.mxu1 %v6285_v59  ;;  %4908 = vmatpush1.bf16.msra.mxu1 %v4907_v39  ;;  %v1526_v39 = vld [vmem:[#allocation9 + $0x12e8] sm:$0xff]  ;;  %v4923_v49 = vpack.c.bf16 %v1509_v36, %v1501_v32  ;;  %v1424_v36 = vld [vmem:[#allocation9 + $0xfb8] sm:$0xff] }
 0x3d6   :  { %4910 = vmatprep.subr.bf16.mxu1 %v4909_v47  ;;  %v1367_v47 = vld [vmem:[#allocation9 + $0xdf0] sm:$0xff]  ;;  %v4925_v53 = vpack.c.bf16 %v1526_v39, %v1518_v57  ;;  %v1565_v39 = vld [vmem:[#allocation9 + $0x1420] sm:$0xff] }
 0x3d7   :  { %5128 = vmatpush1.bf16.msra.mxu0 %v5127_v51  ;;  %v1384_v51 = vld [vmem:[#allocation9 + $0xe78] sm:$0xff]  ;;  %v5143_v50 = vpack.c.bf16 %v1367_v47, %v1359_v43  ;;  %v1582_v47 = vld [vmem:[#allocation9 + $0x14a8] sm:$0xff] }
 0x3d8   :  { %2751 = vmatmul.mubr.f32.gmra.mrb[10].mxu1 %v6287_v40  ;;  %5130 = vmatprep.subr.bf16.mxu0 %v5129_v55  ;;  %v1525_v55 = vld [vmem:[#allocation9 + $0x12e0] sm:$0xff]  ;;  %v5145_v60 = vpack.c.bf16 %v1384_v51, %v1376_v15  ;;  %v1423_v51 = vld [vmem:[#allocation9 + $0xfb0] sm:$0xff] }
 0x3d9   :  { %4912 = vmatpush1.bf16.msra.mxu1 %v4911_v58  ;;  %2821 = vmatprep.mubr.f32.mxu1 %v6304_v17  ;;  %v1542_v58 = vld [vmem:[#allocation9 + $0x1368] sm:$0xff]  ;;  %v4927_v2 = vpack.c.bf16 %v1525_v55, %v1517_v54  ;;  %v1440_v55 = vld [vmem:[#allocation9 + $0x1038] sm:$0xff] }
 0x3da   :  { %4914 = vmatprep.subr.bf16.mxu1 %v4913_v1  ;;  %v1383_v1 = vld [vmem:[#allocation9 + $0xe70] sm:$0xff]  ;;  %v4929_v62 = vpack.c.bf16 %v1542_v58, %v1534_v56  ;;  %v1581_v58 = vld [vmem:[#allocation9 + $0x14a0] sm:$0xff] }
 0x3db   :  { %5132 = vmatpush1.bf16.msra.mxu0 %v5131_v3  ;;  %v1400_v3 = vld [vmem:[#allocation9 + $0xef8] sm:$0xff]  ;;  %v5147_v9 = vpack.c.bf16 %v1383_v1, %v1375_v61  ;;  %v1598_v1 = vld [vmem:[#allocation9 + $0x1528] sm:$0xff] }
 0x3dc   :  { %5134 = vmatprep.subr.bf16.mxu0 %v5133_v6  ;;  %v1541_v6 = vld [vmem:[#allocation9 + $0x1360] sm:$0xff]  ;;  %v5149_v7 = vpack.c.bf16 %v1400_v3, %v1392_v35  ;;  %v1439_v3 = vld [vmem:[#allocation9 + $0x1030] sm:$0xff] }
 0x3dd   :  { %4916 = vmatpush1.bf16.msra.mxu1 %v4915_v11  ;;  %v1558_v11 = vld [vmem:[#allocation9 + $0x13e8] sm:$0xff]  ;;  %v4931_v16 = vpack.c.bf16 %v1541_v6, %v1533_v8  ;;  %v1456_v6 = vld [vmem:[#allocation9 + $0x10b8] sm:$0xff] }
 0x3de   :  { %4918 = vmatprep.subr.bf16.mxu1 %v4917_v14  ;;  %v1399_v14 = vld [vmem:[#allocation9 + $0xef0] sm:$0xff]  ;;  %v4933_v41 = vpack.c.bf16 %v1558_v11, %v1550_v12  ;;  %v1597_v11 = vld [vmem:[#allocation9 + $0x1520] sm:$0xff] }
 0x3df   :  { %5136 = vmatpush1.bf16.msra.mxu0 %v5135_v19  ;;  %v1416_v19 = vld [vmem:[#allocation9 + $0xf78] sm:$0xff]  ;;  %v5151_v63 = vpack.c.bf16 %v1399_v14, %v1391_v13  ;;  %v1614_v14 = vld [vmem:[#allocation9 + $0x15a8] sm:$0xff] }
 0x3e0   :  { %5138 = vmatprep.subr.bf16.mxu0 %v5137_v23  ;;  %v1557_v23 = vld [vmem:[#allocation9 + $0x13e0] sm:$0xff]  ;;  %v5153_v26 = vpack.c.bf16 %v1416_v19, %v1408_v18  ;;  %v1455_v19 = vld [vmem:[#allocation9 + $0x10b0] sm:$0xff] }
 0x3e1   :  { %4920 = vmatpush1.bf16.msra.mxu1 %v4919_v27  ;;  %v1574_v27 = vld [vmem:[#allocation9 + $0x1468] sm:$0xff]  ;;  %v4935_v32 = vpack.c.bf16 %v1557_v23, %v1549_v22  ;;  %v1472_v23 = vld [vmem:[#allocation9 + $0x1138] sm:$0xff] }
 0x3e2   :  { %4922 = vmatprep.subr.bf16.mxu1 %v4921_v31  ;;  %v1415_v31 = vld [vmem:[#allocation9 + $0xf70] sm:$0xff]  ;;  %v4937_v57 = vpack.c.bf16 %v1574_v27, %v1566_v25  ;;  %v1613_v27 = vld [vmem:[#allocation9 + $0x15a0] sm:$0xff] }
 0x3e3   :  { %5140 = vmatpush1.bf16.msra.mxu0 %v5139_v38  ;;  %v1432_v38 = vld [vmem:[#allocation9 + $0xff8] sm:$0xff]  ;;  %v5155_v43 = vpack.c.bf16 %v1415_v31, %v1407_v30  ;;  %v1630_v31 = vld [vmem:[#allocation9 + $0x1628] sm:$0xff] }
 0x3e4   :  { %5142 = vmatprep.subr.bf16.mxu0 %v5141_v42  ;;  %v1573_v42 = vld [vmem:[#allocation9 + $0x1460] sm:$0xff]  ;;  %v5157_v15 = vpack.c.bf16 %v1432_v38, %v1424_v36  ;;  %v1471_v38 = vld [vmem:[#allocation9 + $0x1130] sm:$0xff] }
 0x3e5   :  { %4924 = vmatpush1.bf16.msra.mxu1 %v4923_v49  ;;  %v1590_v49 = vld [vmem:[#allocation9 + $0x14e8] sm:$0xff]  ;;  %v4939_v54 = vpack.c.bf16 %v1573_v42, %v1565_v39  ;;  %v1488_v42 = vld [vmem:[#allocation9 + $0x11b8] sm:$0xff] }
 0x3e6   :  { %4926 = vmatprep.subr.bf16.mxu1 %v4925_v53  ;;  %v1431_v53 = vld [vmem:[#allocation9 + $0xff0] sm:$0xff]  ;;  %v4941_v56 = vpack.c.bf16 %v1590_v49, %v1582_v47  ;;  %v1629_v47 = vld [vmem:[#allocation9 + $0x1620] sm:$0xff] }
 0x3e7   :  { %5144 = vmatpush1.bf16.msra.mxu0 %v5143_v50  ;;  %v1448_v50 = vld [vmem:[#allocation9 + $0x1078] sm:$0xff]  ;;  %v5159_v61 = vpack.c.bf16 %v1431_v53, %v1423_v51  ;;  %v1637_v49 = vld [vmem:[#allocation9 + $0x1660] sm:$0xff]  ;;  %v1654_v51 = vld [vmem:[#allocation9 + $0x16e8] sm:$0xff] }
 0x3e8   :  { %5146 = vmatprep.subr.bf16.mxu0 %v5145_v60  ;;  %v1589_v60 = vld [vmem:[#allocation9 + $0x14e0] sm:$0xff]  ;;  %v5161_v35 = vpack.c.bf16 %v1448_v50, %v1440_v55  ;;  %v1495_v55 = vld [vmem:[#allocation9 + $0x11f0] sm:$0xff]  ;;  %v4955_v50 = vpack.c.bf16 %v1637_v49, %v1629_v47 }
 0x3e9   :  { %4928 = vmatpush1.bf16.msra.mxu1 %v4927_v2  ;;  %v1606_v2 = vld [vmem:[#allocation9 + $0x1568] sm:$0xff]  ;;  %v4943_v8 = vpack.c.bf16 %v1589_v60, %v1581_v58  ;;  %v1512_v58 = vld [vmem:[#allocation9 + $0x1278] sm:$0xff]  ;;  %v1645_v60 = vld [vmem:[#allocation9 + $0x16a0] sm:$0xff] }
 0x3ea   :  { %4930 = vmatprep.subr.bf16.mxu1 %v4929_v62  ;;  %v1447_v62 = vld [vmem:[#allocation9 + $0x1070] sm:$0xff]  ;;  %v4945_v12 = vpack.c.bf16 %v1606_v2, %v1598_v1  ;;  %v1662_v2 = vld [vmem:[#allocation9 + $0x1728] sm:$0xff]  ;;  %v1693_v47 = vld [vmem:[#allocation9 + $0x1820] sm:$0xff] }
 0x3eb   :  { %5148 = vmatpush1.bf16.msra.mxu0 %v5147_v9  ;;  %v1464_v9 = vld [vmem:[#allocation9 + $0x10f8] sm:$0xff]  ;;  %v5163_v13 = vpack.c.bf16 %v1447_v62, %v1439_v3  ;;  %v1503_v3 = vld [vmem:[#allocation9 + $0x1230] sm:$0xff]  ;;  %v1701_v49 = vld [vmem:[#allocation9 + $0x1860] sm:$0xff] }
 0x3ec   :  { %5150 = vmatprep.subr.bf16.mxu0 %v5149_v7  ;;  %v1605_v7 = vld [vmem:[#allocation9 + $0x1560] sm:$0xff]  ;;  %v5165_v18 = vpack.c.bf16 %v1464_v9, %v1456_v6  ;;  %v1511_v62 = vld [vmem:[#allocation9 + $0x1270] sm:$0xff]  ;;  %v1520_v6 = vld [vmem:[#allocation9 + $0x12b8] sm:$0xff] }
 0x3ed   :  { %4932 = vmatpush1.bf16.msra.mxu1 %v4931_v16  ;;  %v1622_v16 = vld [vmem:[#allocation9 + $0x15e8] sm:$0xff]  ;;  %v4947_v22 = vpack.c.bf16 %v1605_v7, %v1597_v11  ;;  %v1528_v9 = vld [vmem:[#allocation9 + $0x12f8] sm:$0xff]  ;;  %v1661_v11 = vld [vmem:[#allocation9 + $0x1720] sm:$0xff] }
 0x3ee   :  { %4934 = vmatprep.subr.bf16.mxu1 %v4933_v41  ;;  %v1463_v41 = vld [vmem:[#allocation9 + $0x10f0] sm:$0xff]  ;;  %v4949_v25 = vpack.c.bf16 %v1622_v16, %v1614_v14  ;;  %v1669_v7 = vld [vmem:[#allocation9 + $0x1760] sm:$0xff]  ;;  %v1678_v14 = vld [vmem:[#allocation9 + $0x17a8] sm:$0xff] }
 0x3ef   :  { %5152 = vmatpush1.bf16.msra.mxu0 %v5151_v63  ;;  %v1480_v63 = vld [vmem:[#allocation9 + $0x1178] sm:$0xff]  ;;  %v5167_v30 = vpack.c.bf16 %v1463_v41, %v1455_v19  ;;  %v1686_v16 = vld [vmem:[#allocation9 + $0x17e8] sm:$0xff]  ;;  %v1519_v19 = vld [vmem:[#allocation9 + $0x12b0] sm:$0xff] }
 0x3f0   :  { %5154 = vmatprep.subr.bf16.mxu0 %v5153_v26  ;;  %v1621_v26 = vld [vmem:[#allocation9 + $0x15e0] sm:$0xff]  ;;  %v5169_v36 = vpack.c.bf16 %v1480_v63, %v1472_v23  ;;  %v1527_v41 = vld [vmem:[#allocation9 + $0x12f0] sm:$0xff]  ;;  %v1536_v23 = vld [vmem:[#allocation9 + $0x1338] sm:$0xff] }
 0x3f1   :  { %4936 = vmatpush1.bf16.msra.mxu1 %v4935_v32  ;;  %v1638_v32 = vld [vmem:[#allocation9 + $0x1668] sm:$0xff]  ;;  %v4951_v39 = vpack.c.bf16 %v1621_v26, %v1613_v27  ;;  %v1544_v63 = vld [vmem:[#allocation9 + $0x1378] sm:$0xff]  ;;  %v1677_v27 = vld [vmem:[#allocation9 + $0x17a0] sm:$0xff] }
 0x3f2   :  { %4938 = vmatprep.subr.bf16.mxu1 %v4937_v57  ;;  %v1479_v57 = vld [vmem:[#allocation9 + $0x1170] sm:$0xff]  ;;  %v1685_v26 = vld [vmem:[#allocation9 + $0x17e0] sm:$0xff] }
 0x3f3   :  { %5156 = vmatpush1.bf16.msra.mxu0 %v5155_v43  ;;  %v1496_v43 = vld [vmem:[#allocation9 + $0x11f8] sm:$0xff] }
 0x3f4   :  { %5158 = vmatprep.subr.bf16.mxu0 %v5157_v15  ;;  %v1646_v15 = vld [vmem:[#allocation9 + $0x16a8] sm:$0xff]  ;;  %v5173_v53 = vpack.c.bf16 %v1496_v43, %v1488_v42  ;;  %v1552_v42 = vld [vmem:[#allocation9 + $0x13b8] sm:$0xff] }
 0x3f5   :  { %4940 = vmatpush1.bf16.msra.mxu1 %v4939_v54  ;;  %v1487_v54 = vld [vmem:[#allocation9 + $0x11b0] sm:$0xff]  ;;  %v1560_v43 = vld [vmem:[#allocation9 + $0x13f8] sm:$0xff] }
 0x3f6   :  { %4942 = vmatprep.subr.bf16.mxu1 %v4941_v56  ;;  %v1504_v56 = vld [vmem:[#allocation9 + $0x1238] sm:$0xff]  ;;  %v5175_v1 = vpack.c.bf16 %v1495_v55, %v1487_v54  ;;  %v1551_v54 = vld [vmem:[#allocation9 + $0x13b0] sm:$0xff] }
 0x3f7   :  { %5160 = vmatpush1.bf16.msra.mxu0 %v5159_v61  ;;  %v1653_v61 = vld [vmem:[#allocation9 + $0x16e0] sm:$0xff]  ;;  %v1559_v55 = vld [vmem:[#allocation9 + $0x13f0] sm:$0xff] }
 0x3f8   :  { %5162 = vmatprep.subr.bf16.mxu0 %v5161_v35  ;;  %v1670_v35 = vld [vmem:[#allocation9 + $0x1768] sm:$0xff] }
 0x3f9   :  { %4944 = vmatpush1.bf16.msra.mxu1 %v4943_v8  ;;  %v4959_v8 = vpack.c.bf16 %v1653_v61, %v1645_v60  ;;  %v1709_v60 = vld [vmem:[#allocation9 + $0x18a0] sm:$0xff] }
 0x3fa   :  { %3053 = vmatmul.mubr.f32.vlgmr.msra.gmra.mrb[20].mxu0 %v6280_v21  ;;  %4946 = vmatprep.subr.bf16.mxu1 %v4945_v12  ;;  %v4953_v21 = vpack.c.bf16 %v1638_v32, %v1630_v31  ;;  %v4961_v12 = vpack.c.bf16 %v1670_v35, %v1662_v2  ;;  %v1694_v31 = vld [vmem:[#allocation9 + $0x1828] sm:$0xff]  ;;  %v1717_v61 = vld [vmem:[#allocation9 + $0x18e0] sm:$0xff] }
 0x3fb   :  { %3058 = vmatprep.mubr.f32.mxu0 %v6285_v59  ;;  %5164 = vmatpush1.bf16.msra.mxu0 %v5163_v13  ;;  %v5171_v59 = vpack.c.bf16 %v1479_v57, %v1471_v38  ;;  %v5179_v13 = vpack.c.bf16 %v1511_v62, %v1503_v3  ;;  %v1702_v32 = vld [vmem:[#allocation9 + $0x1868] sm:$0xff]  ;;  %v1535_v38 = vld [vmem:[#allocation9 + $0x1330] sm:$0xff] }
 0x3fc   :  { %5166 = vmatprep.subr.bf16.mxu0 %v5165_v18  ;;  %v5181_v18 = vpack.c.bf16 %v1528_v9, %v1520_v6  ;;  %v1543_v57 = vld [vmem:[#allocation9 + $0x1370] sm:$0xff]  ;;  %v1726_v2 = vld [vmem:[#allocation9 + $0x1928] sm:$0xff]  ;;  %v1584_v6 = vld [vmem:[#allocation9 + $0x14b8] sm:$0xff] }
 0x3fd   :  { %4948 = vmatpush1.bf16.msra.mxu1 %v4947_v22  ;;  %v4963_v22 = vpack.c.bf16 %v1669_v7, %v1661_v11  ;;  %v1734_v35 = vld [vmem:[#allocation9 + $0x1968] sm:$0xff]  ;;  %v1567_v3 = vld [vmem:[#allocation9 + $0x1430] sm:$0xff]  ;;  %v1592_v9 = vld [vmem:[#allocation9 + $0x14f8] sm:$0xff] }
 0x3fe   :  { %3059 = vmatmul.mubr.f32.gmra.mrb[22].mxu0 %v6287_v40  ;;  %4950 = vmatprep.subr.bf16.mxu1 %v4949_v25  ;;  %v4957_v40 = vpack.c.bf16 %v1654_v51, %v1646_v15  ;;  %v4965_v25 = vpack.c.bf16 %v1686_v16, %v1678_v14  ;;  %v1710_v15 = vld [vmem:[#allocation9 + $0x18a8] sm:$0xff]  ;;  %v1575_v62 = vld [vmem:[#allocation9 + $0x1470] sm:$0xff]  ;;  %v1725_v11 = vld [vmem:[#allocation9 + $0x1920] sm:$0xff] }
 0x3ff   :  { %5168 = vmatpush1.bf16.msra.mxu0 %v5167_v30  ;;  %3129 = vmatprep.mubr.f32.mxu0 %v6304_v17  ;;  %v5177_v17 = vpack.c.bf16 %v1512_v58, %v1504_v56  ;;  %v5183_v30 = vpack.c.bf16 %v1527_v41, %v1519_v19  ;;  %v1718_v51 = vld [vmem:[#allocation9 + $0x18e8] sm:$0xff]  ;;  %v1568_v56 = vld [vmem:[#allocation9 + $0x1438] sm:$0xff]  ;;  %v1733_v7 = vld [vmem:[#allocation9 + $0x1960] sm:$0xff] }
 0x400   :  { %5170 = vmatprep.subr.bf16.mxu0 %v5169_v36  ;;  %v5185_v36 = vpack.c.bf16 %v1544_v63, %v1536_v23  ;;  %v1576_v58 = vld [vmem:[#allocation9 + $0x1478] sm:$0xff]  ;;  %v1742_v14 = vld [vmem:[#allocation9 + $0x19a8] sm:$0xff]  ;;  %v1583_v19 = vld [vmem:[#allocation9 + $0x14b0] sm:$0xff] }
 0x401   :  { %4952 = vmatpush1.bf16.msra.mxu1 %v4951_v39  ;;  %v4967_v39 = vpack.c.bf16 %v1685_v26, %v1677_v27  ;;  %v1750_v16 = vld [vmem:[#allocation9 + $0x19e8] sm:$0xff]  ;;  %v1591_v41 = vld [vmem:[#allocation9 + $0x14f0] sm:$0xff]  ;;  %v1600_v23 = vld [vmem:[#allocation9 + $0x1538] sm:$0xff] }
 0x402   :  { %4954 = vmatprep.subr.bf16.mxu1 %v4953_v21  ;;  %v4969_v21 = vpack.c.bf16 %v1702_v32, %v1694_v31  ;;  %v1608_v63 = vld [vmem:[#allocation9 + $0x1578] sm:$0xff]  ;;  %v1741_v27 = vld [vmem:[#allocation9 + $0x19a0] sm:$0xff]  ;;  %v1758_v31 = vld [vmem:[#allocation9 + $0x1a28] sm:$0xff] }
 0x403   :  { %5172 = vmatpush1.bf16.msra.mxu0 %v5171_v59  ;;  %v5187_v59 = vpack.c.bf16 %v1543_v57, %v1535_v38  ;;  %v1749_v26 = vld [vmem:[#allocation9 + $0x19e0] sm:$0xff]  ;;  %v1766_v32 = vld [vmem:[#allocation9 + $0x1a68] sm:$0xff]  ;;  %v1599_v38 = vld [vmem:[#allocation9 + $0x1530] sm:$0xff] }
 0x404   :  { %5174 = vmatprep.subr.bf16.mxu0 %v5173_v53  ;;  %v5189_v53 = vpack.c.bf16 %v1560_v43, %v1552_v42  ;;  %v1607_v57 = vld [vmem:[#allocation9 + $0x1570] sm:$0xff]  ;;  %v1616_v42 = vld [vmem:[#allocation9 + $0x15b8] sm:$0xff] }
 0x405   :  { %4956 = vmatpush1.bf16.msra.mxu1 %v4955_v50  ;;  %v4971_v50 = vpack.c.bf16 %v1701_v49, %v1693_v47  ;;  %v1624_v43 = vld [vmem:[#allocation9 + $0x15f8] sm:$0xff]  ;;  %v1757_v47 = vld [vmem:[#allocation9 + $0x1a20] sm:$0xff] }
 0x406   :  { %4958 = vmatprep.subr.bf16.mxu1 %v4957_v40  ;;  %v4973_v40 = vpack.c.bf16 %v1718_v51, %v1710_v15  ;;  %v1765_v49 = vld [vmem:[#allocation9 + $0x1a60] sm:$0xff]  ;;  %v1774_v15 = vld [vmem:[#allocation9 + $0x1aa8] sm:$0xff] }
 0x407   :  { %5176 = vmatpush1.bf16.msra.mxu0 %v5175_v1  ;;  %v5191_v1 = vpack.c.bf16 %v1559_v55, %v1551_v54  ;;  %v1782_v51 = vld [vmem:[#allocation9 + $0x1ae8] sm:$0xff]  ;;  %v1615_v54 = vld [vmem:[#allocation9 + $0x15b0] sm:$0xff] }
 0x408   :  { %5178 = vmatprep.subr.bf16.mxu0 %v5177_v17  ;;  %v5193_v17 = vpack.c.bf16 %v1576_v58, %v1568_v56  ;;  %v1623_v55 = vld [vmem:[#allocation9 + $0x15f0] sm:$0xff]  ;;  %v1632_v56 = vld [vmem:[#allocation9 + $0x1638] sm:$0xff] }
 0x409   :  { %4960 = vmatpush1.bf16.msra.mxu1 %v4959_v8  ;;  %v4975_v8 = vpack.c.bf16 %v1717_v61, %v1709_v60  ;;  %v1640_v58 = vld [vmem:[#allocation9 + $0x1678] sm:$0xff]  ;;  %v1773_v60 = vld [vmem:[#allocation9 + $0x1aa0] sm:$0xff] }
 0x40a   :  { %4962 = vmatprep.subr.bf16.mxu1 %v4961_v12  ;;  %v4977_v12 = vpack.c.bf16 %v1734_v35, %v1726_v2  ;;  %v1781_v61 = vld [vmem:[#allocation9 + $0x1ae0] sm:$0xff]  ;;  %v1790_v2 = vld [vmem:[#allocation9 + $0x1b28] sm:$0xff] }
 0x40b   :  { %5180 = vmatpush1.bf16.msra.mxu0 %v5179_v13  ;;  %v5195_v13 = vpack.c.bf16 %v1575_v62, %v1567_v3  ;;  %v1798_v35 = vld [vmem:[#allocation9 + $0x1b68] sm:$0xff]  ;;  %v1631_v3 = vld [vmem:[#allocation9 + $0x1630] sm:$0xff] }
 0x40c   :  { %5182 = vmatprep.subr.bf16.mxu0 %v5181_v18  ;;  %v5197_v18 = vpack.c.bf16 %v1592_v9, %v1584_v6  ;;  %v1639_v62 = vld [vmem:[#allocation9 + $0x1670] sm:$0xff]  ;;  %v1648_v6 = vld [vmem:[#allocation9 + $0x16b8] sm:$0xff] }
 0x40d   :  { %4964 = vmatpush1.bf16.msra.mxu1 %v4963_v22  ;;  %v4979_v22 = vpack.c.bf16 %v1733_v7, %v1725_v11  ;;  %v1656_v9 = vld [vmem:[#allocation9 + $0x16f8] sm:$0xff]  ;;  %v1789_v11 = vld [vmem:[#allocation9 + $0x1b20] sm:$0xff] }
 0x40e   :  { %4966 = vmatprep.subr.bf16.mxu1 %v4965_v25  ;;  %v4981_v25 = vpack.c.bf16 %v1750_v16, %v1742_v14  ;;  %v1797_v7 = vld [vmem:[#allocation9 + $0x1b60] sm:$0xff]  ;;  %v5211_v14 = vpack.c.bf16 %v1639_v62, %v1631_v3  ;;  %v1806_v16 = vld [vmem:[#allocation9 + $0x1ba8] sm:$0xff] }
 0x40f   :  { %5184 = vmatpush1.bf16.msra.mxu0 %v5183_v30  ;;  %v5199_v30 = vpack.c.bf16 %v1591_v41, %v1583_v19  ;;  %v5213_v41 = vpack.c.bf16 %v1656_v9, %v1648_v6  ;;  %v1854_v62 = vld [vmem:[#allocation9 + $0x1d28] sm:$0xff]  ;;  %v1695_v9 = vld [vmem:[#allocation9 + $0x1830] sm:$0xff] }
 0x410   :  { %5186 = vmatprep.subr.bf16.mxu0 %v5185_v36  ;;  %v5201_v36 = vpack.c.bf16 %v1608_v63, %v1600_v23  ;;  %v1655_v23 = vld [vmem:[#allocation9 + $0x16f0] sm:$0xff]  ;;  %v4995_v63 = vpack.c.bf16 %v1797_v7, %v1789_v11  ;;  %v1712_v7 = vld [vmem:[#allocation9 + $0x18b8] sm:$0xff] }
 0x411   :  { %4968 = vmatpush1.bf16.msra.mxu1 %v4967_v39  ;;  %v4983_v39 = vpack.c.bf16 %v1749_v26, %v1741_v27  ;;  %v1672_v27 = vld [vmem:[#allocation9 + $0x1778] sm:$0xff] }
 0x412   :  { %4970 = vmatprep.subr.bf16.mxu1 %v4969_v21  ;;  %v4985_v21 = vpack.c.bf16 %v1766_v32, %v1758_v31  ;;  %v1813_v31 = vld [vmem:[#allocation9 + $0x1be0] sm:$0xff] }
 0x413   :  { %5188 = vmatpush1.bf16.msra.mxu0 %v5187_v59  ;;  %v5203_v59 = vpack.c.bf16 %v1607_v57, %v1599_v38  ;;  %v1822_v38 = vld [vmem:[#allocation9 + $0x1c28] sm:$0xff] }
 0x414   :  { %2822 = vmatmul.mubr.f32.vlgmr.msra.gmra.mrb[8].mxu1 %v6306_v24  ;;  %5190 = vmatprep.subr.bf16.mxu0 %v5189_v53  ;;  %v5205_v53 = vpack.c.bf16 %v1624_v43, %v1616_v42  ;;  %v1830_v57 = vld [vmem:[#allocation9 + $0x1c68] sm:$0xff]  ;;  %v1663_v43 = vld [vmem:[#allocation9 + $0x1730] sm:$0xff] }
 0x415   :  { %2827 = vmatprep.mubr.f32.mxu1 %v6311_v44  ;;  %4972 = vmatpush1.bf16.msra.mxu1 %v4971_v50  ;;  %v4987_v50 = vpack.c.bf16 %v1765_v49, %v1757_v47  ;;  %v1680_v49 = vld [vmem:[#allocation9 + $0x17b8] sm:$0xff] }
 0x416   :  { %4974 = vmatprep.subr.bf16.mxu1 %v4973_v40  ;;  %v4989_v40 = vpack.c.bf16 %v1782_v51, %v1774_v15  ;;  %v5001_v15 = vpack.c.bf16 %v1830_v57, %v1822_v38  ;;  %v1821_v51 = vld [vmem:[#allocation9 + $0x1c20] sm:$0xff] }
 0x417   :  { %5192 = vmatpush1.bf16.msra.mxu0 %v5191_v1  ;;  %v5207_v1 = vpack.c.bf16 %v1623_v55, %v1615_v54  ;;  %v1838_v55 = vld [vmem:[#allocation9 + $0x1ca8] sm:$0xff]  ;;  %v1869_v57 = vld [vmem:[#allocation9 + $0x1da0] sm:$0xff] }
 0x418   :  { %2828 = vmatmul.mubr.f32.gmra.mrb[10].mxu1 %v6313_v52  ;;  %5194 = vmatprep.subr.bf16.mxu0 %v5193_v17  ;;  %v5209_v17 = vpack.c.bf16 %v1640_v58, %v1632_v56  ;;  %v1679_v58 = vld [vmem:[#allocation9 + $0x17b0] sm:$0xff] }
 0x419   :  { %4976 = vmatpush1.bf16.msra.mxu1 %v4975_v8  ;;  %2898 = vmatprep.mubr.f32.mxu1 %v6328_v0  ;;  %v4991_v8 = vpack.c.bf16 %v1781_v61, %v1773_v60  ;;  %v1696_v61 = vld [vmem:[#allocation9 + $0x1838] sm:$0xff] }
 0x41a   :  { %4978 = vmatprep.subr.bf16.mxu1 %v4977_v12  ;;  %v4993_v12 = vpack.c.bf16 %v1798_v35, %v1790_v2  ;;  %v1837_v35 = vld [vmem:[#allocation9 + $0x1ca0] sm:$0xff] }
 0x41b   :  { %5196 = vmatpush1.bf16.msra.mxu0 %v5195_v13 }
 0x41c   :  { %5198 = vmatprep.subr.bf16.mxu0 %v5197_v18  ;;  %v1814_v18 = vld [vmem:[#allocation9 + $0x1be8] sm:$0xff] }
 0x41d   :  { %4980 = vmatpush1.bf16.msra.mxu1 %v4979_v22  ;;  %v1647_v22 = vld [vmem:[#allocation9 + $0x16b0] sm:$0xff]  ;;  %v4997_v26 = vpack.c.bf16 %v1814_v18, %v1806_v16  ;;  %v1853_v18 = vld [vmem:[#allocation9 + $0x1d20] sm:$0xff] }
 0x41e   :  { %4982 = vmatprep.subr.bf16.mxu1 %v4981_v25  ;;  %v1664_v25 = vld [vmem:[#allocation9 + $0x1738] sm:$0xff] }
 0x41f   :  { %5200 = vmatpush1.bf16.msra.mxu0 %v5199_v30  ;;  %v1805_v30 = vld [vmem:[#allocation9 + $0x1ba0] sm:$0xff]  ;;  %v5217_v42 = vpack.c.bf16 %v1672_v27, %v1664_v25  ;;  %v1711_v27 = vld [vmem:[#allocation9 + $0x18b0] sm:$0xff] }
 0x420   :  { %5202 = vmatprep.subr.bf16.mxu0 %v5201_v36  ;;  %v5215_v36 = vpack.c.bf16 %v1655_v23, %v1647_v22  ;;  %v4999_v47 = vpack.c.bf16 %v1813_v31, %v1805_v30  ;;  %v1870_v23 = vld [vmem:[#allocation9 + $0x1da8] sm:$0xff]  ;;  %v1728_v31 = vld [vmem:[#allocation9 + $0x1938] sm:$0xff] }
 0x421   :  { %4984 = vmatpush1.bf16.msra.mxu1 %v4983_v39 }
 0x422   :  { %4986 = vmatprep.subr.bf16.mxu1 %v4985_v21  ;;  %v1671_v21 = vld [vmem:[#allocation9 + $0x1770] sm:$0xff] }
 0x423   :  { %5204 = vmatpush1.bf16.msra.mxu0 %v5203_v59  ;;  %v1688_v59 = vld [vmem:[#allocation9 + $0x17f8] sm:$0xff]  ;;  %v5219_v54 = vpack.c.bf16 %v1671_v21, %v1663_v43  ;;  %v1886_v21 = vld [vmem:[#allocation9 + $0x1e28] sm:$0xff] }
 0x424   :  { %5206 = vmatprep.subr.bf16.mxu0 %v5205_v53  ;;  %v1829_v53 = vld [vmem:[#allocation9 + $0x1c60] sm:$0xff]  ;;  %v5221_v56 = vpack.c.bf16 %v1688_v59, %v1680_v49  ;;  %v1727_v59 = vld [vmem:[#allocation9 + $0x1930] sm:$0xff] }
 0x425   :  { %4988 = vmatpush1.bf16.msra.mxu1 %v4987_v50  ;;  %v1846_v50 = vld [vmem:[#allocation9 + $0x1ce8] sm:$0xff]  ;;  %v5003_v60 = vpack.c.bf16 %v1829_v53, %v1821_v51  ;;  %v1744_v53 = vld [vmem:[#allocation9 + $0x19b8] sm:$0xff] }
 0x426   :  { %4990 = vmatprep.subr.bf16.mxu1 %v4989_v40  ;;  %v1687_v40 = vld [vmem:[#allocation9 + $0x17f0] sm:$0xff]  ;;  %v5005_v2 = vpack.c.bf16 %v1846_v50, %v1838_v55  ;;  %v1885_v55 = vld [vmem:[#allocation9 + $0x1e20] sm:$0xff] }
 0x427   :  { %v6366_v13 = vpop.f32.mrb[4].mxu1  ;;  %5208 = vmatpush1.bf16.msra.mxu0 %v5207_v1  ;;  %v1704_v1 = vld [vmem:[#allocation9 + $0x1878] sm:$0xff]  ;;  %v5223_v3 = vpack.c.bf16 %v1687_v40, %v1679_v58  ;;  %v1893_v50 = vld [vmem:[#allocation9 + $0x1e60] sm:$0xff]  ;;  %v1910_v58 = vld [vmem:[#allocation9 + $0x1ee8] sm:$0xff] }
 0x428   :  { %v6368_v19 = vpop.f32.mrb[5].mxu1  ;;  %5210 = vmatprep.subr.bf16.mxu0 %v5209_v17  ;;  %v1845_v17 = vld [vmem:[#allocation9 + $0x1ce0] sm:$0xff]  ;;  %v5225_v6 = vpack.c.bf16 %v1704_v1, %v1696_v61  ;;  %v1751_v61 = vld [vmem:[#allocation9 + $0x19f0] sm:$0xff]  ;;  %v5019_v1 = vpack.c.bf16 %v1893_v50, %v1885_v55  ;;  %v1816_v55 = vld [vmem:[#allocation9 + $0x1bf8] sm:$0xff] }
 0x429   :  { %4992 = vmatpush1.bf16.msra.mxu1 %v4991_v8  ;;  %v1862_v8 = vld [vmem:[#allocation9 + $0x1d68] sm:$0xff]  ;;  %v5007_v11 = vpack.c.bf16 %v1845_v17, %v1837_v35  ;;  %v1768_v35 = vld [vmem:[#allocation9 + $0x1a78] sm:$0xff]  ;;  %v1901_v17 = vld [vmem:[#allocation9 + $0x1ea0] sm:$0xff] }
 0x42a   :  { %4994 = vmatprep.subr.bf16.mxu1 %v4993_v12  ;;  %v1703_v12 = vld [vmem:[#allocation9 + $0x1870] sm:$0xff]  ;;  %v5009_v16 = vpack.c.bf16 %v1862_v8, %v1854_v62  ;;  %v1918_v8 = vld [vmem:[#allocation9 + $0x1f28] sm:$0xff] }
 0x42b   :  { %v6370_v32 = vpop.f32.mrb[6].mxu1  ;;  %5212 = vmatpush1.bf16.msra.mxu0 %v5211_v14  ;;  %v1720_v14 = vld [vmem:[#allocation9 + $0x18f8] sm:$0xff]  ;;  %v5227_v22 = vpack.c.bf16 %v1703_v12, %v1695_v9  ;;  %v1759_v9 = vld [vmem:[#allocation9 + $0x1a30] sm:$0xff] }
 0x42c   :  { %v6372_v39 = vpop.f32.mrb[7].mxu1  ;;  %5214 = vmatprep.subr.bf16.mxu0 %v5213_v41  ;;  %v1861_v41 = vld [vmem:[#allocation9 + $0x1d60] sm:$0xff]  ;;  %v5229_v25 = vpack.c.bf16 %v1720_v14, %v1712_v7  ;;  %v1767_v12 = vld [vmem:[#allocation9 + $0x1a70] sm:$0xff]  ;;  %v1776_v7 = vld [vmem:[#allocation9 + $0x1ab8] sm:$0xff] }
 0x42d   :  { %4996 = vmatpush1.bf16.msra.mxu1 %v4995_v63  ;;  %v1878_v63 = vld [vmem:[#allocation9 + $0x1de8] sm:$0xff]  ;;  %v5011_v30 = vpack.c.bf16 %v1861_v41, %v1853_v18  ;;  %v1784_v14 = vld [vmem:[#allocation9 + $0x1af8] sm:$0xff]  ;;  %v1917_v18 = vld [vmem:[#allocation9 + $0x1f20] sm:$0xff] }
 0x42e   :  { %4998 = vmatprep.subr.bf16.mxu1 %v4997_v26  ;;  %v1719_v26 = vld [vmem:[#allocation9 + $0x18f0] sm:$0xff]  ;;  %v5013_v38 = vpack.c.bf16 %v1878_v63, %v1870_v23  ;;  %v1925_v41 = vld [vmem:[#allocation9 + $0x1f60] sm:$0xff]  ;;  %v1934_v23 = vld [vmem:[#allocation9 + $0x1fa8] sm:$0xff] }
 0x42f   :  { %5216 = vmatpush1.bf16.msra.mxu0 %v5215_v36  ;;  %v1736_v36 = vld [vmem:[#allocation9 + $0x1978] sm:$0xff]  ;;  %v5231_v43 = vpack.c.bf16 %v1719_v26, %v1711_v27  ;;  %v1942_v63 = vld [vmem:[#allocation9 + $0x1fe8] sm:$0xff]  ;;  %v1775_v27 = vld [vmem:[#allocation9 + $0x1ab0] sm:$0xff] }
 0x430   :  { %5218 = vmatprep.subr.bf16.mxu0 %v5217_v42  ;;  %v1877_v42 = vld [vmem:[#allocation9 + $0x1de0] sm:$0xff]  ;;  %v5233_v49 = vpack.c.bf16 %v1736_v36, %v1728_v31  ;;  %v1783_v26 = vld [vmem:[#allocation9 + $0x1af0] sm:$0xff]  ;;  %v1792_v31 = vld [vmem:[#allocation9 + $0x1b38] sm:$0xff] }
 0x431   :  { %5000 = vmatpush1.bf16.msra.mxu1 %v4999_v47  ;;  %v1894_v47 = vld [vmem:[#allocation9 + $0x1e68] sm:$0xff]  ;;  %v5015_v51 = vpack.c.bf16 %v1877_v42, %v1869_v57  ;;  %v1800_v36 = vld [vmem:[#allocation9 + $0x1b78] sm:$0xff]  ;;  %v1933_v57 = vld [vmem:[#allocation9 + $0x1fa0] sm:$0xff] }
 0x432   :  { %5002 = vmatprep.subr.bf16.mxu1 %v5001_v15  ;;  %v1735_v15 = vld [vmem:[#allocation9 + $0x1970] sm:$0xff]  ;;  %v1941_v42 = vld [vmem:[#allocation9 + $0x1fe0] sm:$0xff] }
 0x433   :  { %5220 = vmatpush1.bf16.msra.mxu0 %v5219_v54  ;;  %v1752_v54 = vld [vmem:[#allocation9 + $0x19f8] sm:$0xff] }
 0x434   :  { %5222 = vmatprep.subr.bf16.mxu0 %v5221_v56  ;;  %v1902_v56 = vld [vmem:[#allocation9 + $0x1ea8] sm:$0xff]  ;;  %v5237_v40 = vpack.c.bf16 %v1752_v54, %v1744_v53  ;;  %v5031_v54 = vpack.c.bf16 %v1941_v42, %v1933_v57  ;;  %v1839_v42 = vld [vmem:[#allocation9 + $0x1cb0] sm:$0xff] }
 0x435   :  { %5004 = vmatpush1.bf16.msra.mxu1 %v5003_v60  ;;  %v1743_v60 = vld [vmem:[#allocation9 + $0x19b0] sm:$0xff] }
 0x436   :  { %5006 = vmatprep.subr.bf16.mxu1 %v5005_v2  ;;  %v1760_v2 = vld [vmem:[#allocation9 + $0x1a38] sm:$0xff]  ;;  %v5239_v62 = vpack.c.bf16 %v1751_v61, %v1743_v60  ;;  %v3240_v61 = vld [vmem:[#allocation12 + $0x28] sm:$0xff] }
 0x437   :  { %5224 = vmatpush1.bf16.msra.mxu0 %v5223_v3  ;;  %v1909_v3 = vld [vmem:[#allocation9 + $0x1ee0] sm:$0xff] }
 0x438   :  { %5226 = vmatprep.subr.bf16.mxu0 %v5225_v6  ;;  %v1926_v6 = vld [vmem:[#allocation9 + $0x1f68] sm:$0xff] }
 0x439   :  { %5008 = vmatpush1.bf16.msra.mxu1 %v5007_v11  ;;  %v5023_v11 = vpack.c.bf16 %v1909_v3, %v1901_v17 }
 0x43a   :  { %3130 = vmatmul.mubr.f32.vlgmr.msra.gmra.mrb[20].mxu0 %v6306_v24  ;;  %5010 = vmatprep.subr.bf16.mxu1 %v5009_v16  ;;  %v5017_v24 = vpack.c.bf16 %v1894_v47, %v1886_v21  ;;  %v5025_v16 = vpack.c.bf16 %v1926_v6, %v1918_v8  ;;  %v3236_v21 = vld [vmem:[#allocation12 + $0x8] sm:$0xff]  ;;  %v3238_v47 = vld [vmem:[#allocation12 + $0x18] sm:$0xff]  ;;  %v1832_v8 = vld [vmem:[#allocation9 + $0x1c78] sm:$0xff] }
 0x43b   :  { %3135 = vmatprep.mubr.f32.mxu0 %v6311_v44  ;;  %5228 = vmatpush1.bf16.msra.mxu0 %v5227_v22  ;;  %v5235_v44 = vpack.c.bf16 %v1735_v15, %v1727_v59  ;;  %v5243_v22 = vpack.c.bf16 %v1767_v12, %v1759_v9  ;;  %v5249_v59 = vpack.c.bf16 %v1800_v36, %v1792_v31  ;;  %v1791_v15 = vld [vmem:[#allocation9 + $0x1b30] sm:$0xff]  ;;  %v3239_v9 = vld [vmem:[#allocation12 + $0x20] sm:$0xff]  ;;  %v3241_v12 = vld [vmem:[#allocation12 + $0x30] sm:$0xff] }
 0x43c   :  { %5230 = vmatprep.subr.bf16.mxu0 %v5229_v25  ;;  %v5245_v25 = vpack.c.bf16 %v1784_v14, %v1776_v7  ;;  %v3244_v14 = vld [vmem:[#allocation12 + $0x48] sm:$0xff] }
 0x43d   :  { %5012 = vmatpush1.bf16.msra.mxu1 %v5011_v30  ;;  %v5027_v30 = vpack.c.bf16 %v1925_v41, %v1917_v18  ;;  %v1823_v41 = vld [vmem:[#allocation9 + $0x1c30] sm:$0xff] }
 0x43e   :  { %3136 = vmatmul.mubr.f32.gmra.mrb[22].mxu0 %v6313_v52  ;;  %5014 = vmatprep.subr.bf16.mxu1 %v5013_v38  ;;  %v5021_v52 = vpack.c.bf16 %v1910_v58, %v1902_v56  ;;  %v5029_v38 = vpack.c.bf16 %v1942_v63, %v1934_v23  ;;  %v3235_v56 = vld [vmem:[#allocation12] sm:$0xff]  ;;  %v3237_v58 = vld [vmem:[#allocation12 + $0x10] sm:$0xff]  ;;  %v5295_v23 = vpack.c.bf16 %v3241_v12, %v3239_v9  ;;  %v3248_v36 = vld [vmem:[#allocation12 + $0x68] sm:$0xff] }
 0x43f   :  { %5232 = vmatpush1.bf16.msra.mxu0 %v5231_v43  ;;  %3206 = vmatprep.mubr.f32.mxu0 %v6328_v0  ;;  %v5241_v0 = vpack.c.bf16 %v1768_v35, %v1760_v2  ;;  %v5247_v43 = vpack.c.bf16 %v1783_v26, %v1775_v27  ;;  %v1807_v35 = vld [vmem:[#allocation9 + $0x1bb0] sm:$0xff]  ;;  %v5291_v3 = vpack.c.bf16 %v3237_v58, %v3235_v56  ;;  %v1840_v63 = vld [vmem:[#allocation9 + $0x1cb8] sm:$0xff]  ;;  %v3243_v26 = vld [vmem:[#allocation12 + $0x40] sm:$0xff] }
 0x440   :  { %5234 = vmatprep.subr.bf16.mxu0 %v5233_v49  ;;  %v6378_v49 = vld [vmem:[#allocation10] sm:$0xff]  ;;  %v1855_v58 = vld [vmem:[#allocation9 + $0x1d30] sm:$0xff] }
 0x441   :  { %5016 = vmatpush1.bf16.msra.mxu1 %v5015_v51  ;;  %v1799_v51 = vld [vmem:[#allocation9 + $0x1b70] sm:$0xff] }
 0x442   :  { %5018 = vmatprep.subr.bf16.mxu1 %v5017_v24  ;;  %v1808_v24 = vld [vmem:[#allocation9 + $0x1bb8] sm:$0xff]  ;;  %v5251_v60 = vpack.c.bf16 %v1799_v51, %v1791_v15  ;;  %v3247_v51 = vld [vmem:[#allocation12 + $0x60] sm:$0xff]  ;;  %v1871_v12 = vld [vmem:[#allocation9 + $0x1db0] sm:$0xff] }
 0x443   :  { %5236 = vmatpush1.bf16.msra.mxu0 %v5235_v44  ;;  %v5289_v44 = vpack.c.bf16 %v3238_v47, %v3236_v21  ;;  %v5253_v2 = vpack.c.bf16 %v1816_v55, %v1808_v24  ;;  %v1856_v47 = vld [vmem:[#allocation9 + $0x1d38] sm:$0xff]  ;;  %v3252_v55 = vld [vmem:[#allocation12 + $0x88] sm:$0xff] }
 0x444   :  { %5238 = vmatprep.subr.bf16.mxu0 %v5237_v40  ;;  %v6386_v40 = vrot.slane %v6378_v49, %v6220_v48 }
 0x445   :  { %5020 = vmatpush1.bf16.msra.mxu1 %v5019_v1  ;;  %v3242_v1 = vld [vmem:[#allocation12 + $0x38] sm:$0xff] }
 0x446   :  { %5022 = vmatprep.subr.bf16.mxu1 %v5021_v52  ;;  %v1815_v52 = vld [vmem:[#allocation9 + $0x1bf0] sm:$0xff] }
 0x447   :  { %5240 = vmatpush1.bf16.msra.mxu0 %v5239_v62  ;;  %v1824_v62 = vld [vmem:[#allocation9 + $0x1c38] sm:$0xff]  ;;  %v5255_v7 = vpack.c.bf16 %v1815_v52, %v1807_v35  ;;  %v3251_v52 = vld [vmem:[#allocation12 + $0x80] sm:$0xff] }
 0x448   :  { %5242 = vmatprep.subr.bf16.mxu0 %v5241_v0  ;;  %v5293_v0 = vpack.c.bf16 %v3242_v1, %v3240_v61  ;;  %v5257_v18 = vpack.c.bf16 %v1832_v8, %v1824_v62  ;;  %v1872_v1 = vld [vmem:[#allocation9 + $0x1db8] sm:$0xff]  ;;  %v3256_v8 = vld [vmem:[#allocation12 + $0xa8] sm:$0xff] }
 0x449   :  { %5024 = vmatpush1.bf16.msra.mxu1 %v5023_v11  ;;  %v5578_v11 = vadd.f32 %v6368_v19, %v6386_v40  ;;  %v3245_v19 = vld [vmem:[#allocation12 + $0x50] sm:$0xff] }
 0x44a   :  { %5026 = vmatprep.subr.bf16.mxu1 %v5025_v16  ;;  %v3246_v16 = vld [vmem:[#allocation12 + $0x58] sm:$0xff]  ;;  %v5299_v21 = vpack.c.bf16 %v3245_v19, %v3243_v26  ;;  %v1887_v26 = vld [vmem:[#allocation9 + $0x1e30] sm:$0xff] }
 0x44b   :  { %5244 = vmatpush1.bf16.msra.mxu0 %v5243_v22  ;;  %v1831_v22 = vld [vmem:[#allocation9 + $0x1c70] sm:$0xff]  ;;  %v5297_v27 = vpack.c.bf16 %v3246_v16, %v3244_v14  ;;  %v1888_v14 = vld [vmem:[#allocation9 + $0x1e38] sm:$0xff] }
 0x44c   :  { %5246 = vmatprep.subr.bf16.mxu0 %v5245_v25  ;;  %v1848_v25 = vld [vmem:[#allocation9 + $0x1cf8] sm:$0xff]  ;;  %v5259_v31 = vpack.c.bf16 %v1831_v22, %v1823_v41  ;;  %v3255_v41 = vld [vmem:[#allocation12 + $0xa0] sm:$0xff]  ;;  %v1895_v19 = vld [vmem:[#allocation9 + $0x1e70] sm:$0xff] }
 0x44d   :  { %v6380_v53 = vpop.f32.mrb[16].mxu0  ;;  %5028 = vmatpush1.bf16.msra.mxu1 %v5027_v30  ;;  %v3220_v30 = vmax.f32 %v5578_v11, 0.0  ;;  %v5261_v57 = vpack.c.bf16 %v1848_v25, %v1840_v63  ;;  %v1879_v11 = vld [vmem:[#allocation9 + $0x1df0] sm:$0xff]  ;;  %v1896_v16 = vld [vmem:[#allocation9 + $0x1e78] sm:$0xff]  ;;  %v3262_v25 = vld [vmem:[#allocation12 + $0xd8] sm:$0xff] }
 0x44e   :  { %v6382_v50 = vpop.f32.mrb[17].mxu0  ;;  %5030 = vmatprep.subr.bf16.mxu1 %v5029_v38  ;;  %v3250_v38 = vld [vmem:[#allocation12 + $0x78] sm:$0xff]  ;;  %v3257_v22 = vld [vmem:[#allocation12 + $0xb0] sm:$0xff]  ;;  %v3260_v63 = vld [vmem:[#allocation12 + $0xc8] sm:$0xff] }
 0x44f   :  { %5248 = vmatpush1.bf16.msra.mxu0 %v5247_v43  ;;  %v1847_v43 = vld [vmem:[#allocation9 + $0x1cf0] sm:$0xff]  ;;  %v5301_v15 = vpack.c.bf16 %v3250_v38, %v3248_v36  ;;  %v1912_v36 = vld [vmem:[#allocation9 + $0x1ef8] sm:$0xff]  ;;  %v5313_v38 = vpack.c.bf16 %v3262_v25, %v3260_v63  ;;  %v3271_v63 = vld [vmem:[#allocation12 + $0x120] sm:$0xff] }
 0x450   :  { %5250 = vmatprep.subr.bf16.mxu0 %v5249_v59  ;;  %v1864_v59 = vld [vmem:[#allocation9 + $0x1d78] sm:$0xff]  ;;  %v5263_v24 = vpack.c.bf16 %v1847_v43, %v1839_v42  ;;  %v5275_v43 = vpack.c.bf16 %v1895_v19, %v1887_v26  ;;  %v3276_v26 = vld [vmem:[#allocation12 + $0x148] sm:$0xff]  ;;  %v3278_v19 = vld [vmem:[#allocation12 + $0x158] sm:$0xff] }
 0x451   :  { %v6388_v17 = vpop.f32.mrb[18].mxu0  ;;  %5032 = vmatpush1.bf16.msra.mxu1 %v5031_v54  ;;  %v3249_v54 = vld [vmem:[#allocation12 + $0x70] sm:$0xff]  ;;  %v5265_v56 = vpack.c.bf16 %v1864_v59, %v1856_v47  ;;  %v3266_v47 = vld [vmem:[#allocation12 + $0xf8] sm:$0xff] }
 0x452   :  { %v6390_v6 = vpop.f32.mrb[19].mxu0  ;;  %5290 = vmatprep.subr.bf16.mxu1 %v5289_v44  ;;  %v3254_v44 = vld [vmem:[#allocation12 + $0x98] sm:$0xff]  ;;  %v5303_v61 = vpack.c.bf16 %v3249_v54, %v3247_v51  ;;  %v3261_v42 = vld [vmem:[#allocation12 + $0xd0] sm:$0xff]  ;;  %v1911_v51 = vld [vmem:[#allocation9 + $0x1ef0] sm:$0xff] }
 0x453   :  { %5252 = vmatpush1.bf16.msra.mxu0 %v5251_v60  ;;  %v1863_v60 = vld [vmem:[#allocation9 + $0x1d70] sm:$0xff]  ;;  %v5305_v35 = vpack.c.bf16 %v3254_v44, %v3252_v55  ;;  %v1928_v55 = vld [vmem:[#allocation9 + $0x1f78] sm:$0xff] }
 0x454   :  { %2899 = vmatmul.mubr.f32.vlgmr.msra.gmra.mrb[8].mxu1 %v6330_v5  ;;  %5254 = vmatprep.subr.bf16.mxu0 %v5253_v2  ;;  %v1880_v2 = vld [vmem:[#allocation9 + $0x1df8] sm:$0xff]  ;;  %v5267_v62 = vpack.c.bf16 %v1863_v60, %v1855_v58 }
 0x455   :  { %2904 = vmatprep.mubr.f32.mxu1 %v6335_v20  ;;  %5292 = vmatpush1.bf16.msra.mxu1 %v5291_v3  ;;  %v3253_v3 = vld [vmem:[#allocation12 + $0x90] sm:$0xff]  ;;  %v5269_v9 = vpack.c.bf16 %v1880_v2, %v1872_v1  ;;  %v3270_v1 = vld [vmem:[#allocation12 + $0x118] sm:$0xff] }
 0x456   :  { %5294 = vmatprep.subr.bf16.mxu1 %v5293_v0  ;;  %v3258_v0 = vld [vmem:[#allocation12 + $0xb8] sm:$0xff]  ;;  %v3265_v58 = vld [vmem:[#allocation12 + $0xf0] sm:$0xff] }
 0x457   :  { %5256 = vmatpush1.bf16.msra.mxu0 %v5255_v7  ;;  %v5307_v7 = vpack.c.bf16 %v3253_v3, %v3251_v52  ;;  %v1927_v52 = vld [vmem:[#allocation9 + $0x1f70] sm:$0xff]  ;;  %v3273_v25 = vld [vmem:[#allocation12 + $0x130] sm:$0xff] }
 0x458   :  { %2905 = vmatmul.mubr.f32.gmra.mrb[10].mxu1 %v6337_v28  ;;  %5258 = vmatprep.subr.bf16.mxu0 %v5257_v18  ;;  %v5309_v18 = vpack.c.bf16 %v3258_v0, %v3256_v8  ;;  %v1944_v8 = vld [vmem:[#allocation9 + $0x1ff8] sm:$0xff] }
 0x459   :  { %5296 = vmatpush1.bf16.msra.mxu1 %v5295_v23  ;;  %3567 = vmatprep.mubr.f32.mxu1 %v3220_v30  ;;  %v5271_v23 = vpack.c.bf16 %v1879_v11, %v1871_v12  ;;  %v5311_v30 = vpack.c.bf16 %v3257_v22, %v3255_v41  ;;  %v3269_v12 = vld [vmem:[#allocation12 + $0x110] sm:$0xff]  ;;  %v1943_v41 = vld [vmem:[#allocation9 + $0x1ff0] sm:$0xff] }
 0x45a   :  { %5298 = vmatprep.subr.bf16.mxu1 %v5297_v27  ;;  %v5273_v27 = vpack.c.bf16 %v1896_v16, %v1888_v14  ;;  %v3274_v14 = vld [vmem:[#allocation12 + $0x138] sm:$0xff] }
 0x45b   :  { %5260 = vmatpush1.bf16.msra.mxu0 %v5259_v31  ;;  %v1904_v31 = vld [vmem:[#allocation9 + $0x1eb8] sm:$0xff] }
 0x45c   :  { %5262 = vmatprep.subr.bf16.mxu0 %v5261_v57  ;;  %v3259_v57 = vld [vmem:[#allocation12 + $0xc0] sm:$0xff]  ;;  %v5277_v59 = vpack.c.bf16 %v1912_v36, %v1904_v31  ;;  %v5329_v31 = vpack.c.bf16 %v3278_v19, %v3276_v26  ;;  %v3304_v26 = vld [vmem:[#allocation12 + $0x228] sm:$0xff]  ;;  %v3306_v19 = vld [vmem:[#allocation12 + $0x238] sm:$0xff] }
 0x45d   :  { %5300 = vmatpush1.bf16.msra.mxu1 %v5299_v21  ;;  %v3264_v21 = vld [vmem:[#allocation12 + $0xe8] sm:$0xff]  ;;  %v5315_v54 = vpack.c.bf16 %v3261_v42, %v3259_v57  ;;  %v3275_v36 = vld [vmem:[#allocation12 + $0x140] sm:$0xff]  ;;  %v3282_v42 = vld [vmem:[#allocation12 + $0x178] sm:$0xff] }
 0x45e   :  { %5302 = vmatprep.subr.bf16.mxu1 %v5301_v15  ;;  %v1903_v15 = vld [vmem:[#allocation9 + $0x1eb0] sm:$0xff]  ;;  %v5317_v44 = vpack.c.bf16 %v3266_v47, %v3264_v21  ;;  %v3279_v47 = vld [vmem:[#allocation12 + $0x160] sm:$0xff] }
 0x45f   :  { %5264 = vmatpush1.bf16.msra.mxu0 %v5263_v24  ;;  %v1920_v24 = vld [vmem:[#allocation9 + $0x1f38] sm:$0xff]  ;;  %v5279_v60 = vpack.c.bf16 %v1911_v51, %v1903_v15  ;;  %v3280_v57 = vld [vmem:[#allocation12 + $0x168] sm:$0xff]  ;;  %v3286_v51 = vld [vmem:[#allocation12 + $0x198] sm:$0xff] }
 0x460   :  { %5266 = vmatprep.subr.bf16.mxu0 %v5265_v56  ;;  %v3263_v56 = vld [vmem:[#allocation12 + $0xe0] sm:$0xff]  ;;  %v5281_v2 = vpack.c.bf16 %v1928_v55, %v1920_v24  ;;  %v5333_v21 = vpack.c.bf16 %v3282_v42, %v3280_v57  ;;  %v3284_v15 = vld [vmem:[#allocation12 + $0x188] sm:$0xff]  ;;  %v3305_v57 = vld [vmem:[#allocation12 + $0x230] sm:$0xff] }
 0x461   :  { %5304 = vmatpush1.bf16.msra.mxu1 %v5303_v61  ;;  %v3268_v61 = vld [vmem:[#allocation12 + $0x108] sm:$0xff]  ;;  %v5319_v3 = vpack.c.bf16 %v3265_v58, %v3263_v56  ;;  %v5337_v24 = vpack.c.bf16 %v3286_v51, %v3284_v15  ;;  %v3283_v55 = vld [vmem:[#allocation12 + $0x180] sm:$0xff]  ;;  %v3290_v58 = vld [vmem:[#allocation12 + $0x1b8] sm:$0xff] }
 0x462   :  { %5306 = vmatprep.subr.bf16.mxu1 %v5305_v35  ;;  %v1919_v35 = vld [vmem:[#allocation9 + $0x1f30] sm:$0xff]  ;;  %v5321_v0 = vpack.c.bf16 %v3270_v1, %v3268_v61  ;;  %v3287_v61 = vld [vmem:[#allocation12 + $0x1a0] sm:$0xff]  ;;  %v3289_v1 = vld [vmem:[#allocation12 + $0x1b0] sm:$0xff] }
 0x463   :  { %5268 = vmatpush1.bf16.msra.mxu0 %v5267_v62  ;;  %v1936_v62 = vld [vmem:[#allocation9 + $0x1fb8] sm:$0xff]  ;;  %v5283_v11 = vpack.c.bf16 %v1927_v52, %v1919_v35  ;;  %v3288_v56 = vld [vmem:[#allocation12 + $0x1a8] sm:$0xff]  ;;  %v5343_v35 = vpack.c.bf16 %v3289_v1, %v3287_v61  ;;  %v3315_v61 = vld [vmem:[#allocation12 + $0x280] sm:$0xff] }
 0x464   :  { %5270 = vmatprep.subr.bf16.mxu0 %v5269_v9  ;;  %v3267_v9 = vld [vmem:[#allocation12 + $0x100] sm:$0xff]  ;;  %v5285_v16 = vpack.c.bf16 %v1944_v8, %v1936_v62  ;;  %v3296_v62 = vld [vmem:[#allocation12 + $0x1e8] sm:$0xff]  ;;  %v3298_v8 = vld [vmem:[#allocation12 + $0x1f8] sm:$0xff] }
 0x465   :  { %5308 = vmatpush1.bf16.msra.mxu1 %v5307_v7  ;;  %v3272_v7 = vld [vmem:[#allocation12 + $0x128] sm:$0xff]  ;;  %v5323_v22 = vpack.c.bf16 %v3269_v12, %v3267_v9  ;;  %v1950_v9 = vrot.slane %v6378_v49, %v6217_v46  ;;  %v5349_v12 = vpack.c.bf16 %v3298_v8, %v3296_v62  ;;  %v3309_v15 = vld [vmem:[#allocation12 + $0x250] sm:$0xff]  ;;  %v3326_v8 = vld [vmem:[#allocation12 + $0x2d8] sm:$0xff] }
 0x466   :  { %5310 = vmatprep.subr.bf16.mxu1 %v5309_v18  ;;  %v1935_v18 = vld [vmem:[#allocation9 + $0x1fb0] sm:$0xff]  ;;  %v3317_v1 = vld [vmem:[#allocation12 + $0x290] sm:$0xff] }
 0x467   :  { %5272 = vmatpush1.bf16.msra.mxu0 %v5271_v23  ;;  %v5325_v23 = vpack.c.bf16 %v3274_v14, %v3272_v7  ;;  %v3297_v7 = vld [vmem:[#allocation12 + $0x1f0] sm:$0xff]  ;;  %v3300_v14 = vld [vmem:[#allocation12 + $0x208] sm:$0xff] }
 0x468   :  { %5274 = vmatprep.subr.bf16.mxu0 %v5273_v27  ;;  %v5287_v27 = vpack.c.bf16 %v1943_v41, %v1935_v18  ;;  %v5577_v41 = vadd.f32 %v6366_v13, %v1950_v9  ;;  %v5357_v13 = vpack.c.bf16 %v3306_v19, %v3304_v26  ;;  %v3312_v51 = vld [vmem:[#allocation12 + $0x268] sm:$0xff]  ;;  %v3331_v19 = vld [vmem:[#allocation12 + $0x300] sm:$0xff] }
 0x469   :  { %5312 = vmatpush1.bf16.msra.mxu1 %v5311_v30  ;;  %v5327_v30 = vpack.c.bf16 %v3273_v25, %v3271_v63  ;;  %v3301_v63 = vld [vmem:[#allocation12 + $0x210] sm:$0xff]  ;;  %v5580_v25 = vadd.f32 %v6372_v39, %v6386_v40  ;;  %v3308_v40 = vld [vmem:[#allocation12 + $0x248] sm:$0xff] }
 0x46a   :  { %5314 = vmatprep.subr.bf16.mxu1 %v5313_v38  ;;  %v3277_v38 = vld [vmem:[#allocation12 + $0x150] sm:$0xff]  ;;  %v3324_v62 = vld [vmem:[#allocation12 + $0x2c8] sm:$0xff] }
 0x46b   :  { %5276 = vmatpush1.bf16.msra.mxu0 %v5275_v43  ;;  %v5331_v43 = vpack.c.bf16 %v3277_v38, %v3275_v36  ;;  %v5579_v36 = vadd.f32 %v6370_v32, %v1950_v9  ;;  %v3303_v38 = vld [vmem:[#allocation12 + $0x220] sm:$0xff]  ;;  %v3228_v42 = vmax.f32 %v5580_v25, 0.0  ;;  %v5377_v9 = vpack.c.bf16 %v3326_v8, %v3324_v62 }
 0x46c   :  { %5278 = vmatprep.subr.bf16.mxu0 %v5277_v59  ;;  %v3281_v59 = vld [vmem:[#allocation12 + $0x170] sm:$0xff]  ;;  %v3355_v8 = vld [vmem:[#allocation12 + $0x3c0] sm:$0xff] }
 0x46d   :  { %5316 = vmatpush1.bf16.msra.mxu1 %v5315_v54  ;;  %v5335_v54 = vpack.c.bf16 %v3281_v59, %v3279_v47  ;;  %v3307_v59 = vld [vmem:[#allocation12 + $0x240] sm:$0xff] }
 0x46e   :  { %5318 = vmatprep.subr.bf16.mxu1 %v5317_v44  ;;  %v3285_v44 = vld [vmem:[#allocation12 + $0x190] sm:$0xff] }
 0x46f   :  { %5280 = vmatpush1.bf16.msra.mxu0 %v5279_v60  ;;  %v5341_v60 = vpack.c.bf16 %v3290_v58, %v3288_v56  ;;  %v3316_v56 = vld [vmem:[#allocation12 + $0x288] sm:$0xff]  ;;  %v3318_v58 = vld [vmem:[#allocation12 + $0x298] sm:$0xff] }
 0x470   :  { %5282 = vmatprep.subr.bf16.mxu0 %v5281_v2  ;;  %v3292_v2 = vld [vmem:[#allocation12 + $0x1c8] sm:$0xff] }
 0x471   :  { %5320 = vmatpush1.bf16.msra.mxu1 %v5319_v3  ;;  %v3291_v3 = vld [vmem:[#allocation12 + $0x1c0] sm:$0xff] }
 0x472   :  { %5322 = vmatprep.subr.bf16.mxu1 %v5321_v0 }
 0x473   :  { %5284 = vmatpush1.bf16.msra.mxu0 %v5283_v11  ;;  %v3295_v11 = vld [vmem:[#allocation12 + $0x1e0] sm:$0xff] }
 0x474   :  { %5286 = vmatprep.subr.bf16.mxu0 %v5285_v16  ;;  %v3302_v16 = vld [vmem:[#allocation12 + $0x218] sm:$0xff]  ;;  %v5351_v18 = vpack.c.bf16 %v3297_v7, %v3295_v11  ;;  %v3325_v11 = vld [vmem:[#allocation12 + $0x2d0] sm:$0xff]  ;;  %v3328_v7 = vld [vmem:[#allocation12 + $0x2e8] sm:$0xff] }
 0x475   :  { %5324 = vmatpush1.bf16.msra.mxu1 %v5323_v22  ;;  %v5353_v22 = vpack.c.bf16 %v3302_v16, %v3300_v14  ;;  %v3330_v14 = vld [vmem:[#allocation12 + $0x2f8] sm:$0xff] }
 0x476   :  { %5326 = vmatprep.subr.bf16.mxu1 %v5325_v23  ;;  %v3299_v23 = vld [vmem:[#allocation12 + $0x200] sm:$0xff] }
 0x477   :  { %5288 = vmatpush1.bf16.msra.mxu0 %v5287_v27  ;;  %v6408_v27 = vrot.slane %v6378_v49, %v571_v37  ;;  %v5359_v37 = vpack.c.bf16 %v3305_v57, %v3303_v38  ;;  %v3335_v57 = vld [vmem:[#allocation12 + $0x320] sm:$0xff] }
 0x479   :  { %5328 = vmatpush1.bf16.msra.mxu1 %v5327_v30  ;;  %v5355_v30 = vpack.c.bf16 %v3301_v63, %v3299_v23  ;;  %v5582_v39 = vadd.f32 %v6382_v50, %v6408_v27  ;;  %v3332_v23 = vld [vmem:[#allocation12 + $0x308] sm:$0xff]  ;;  %v3334_v63 = vld [vmem:[#allocation12 + $0x318] sm:$0xff] }
 0x47a   :  { %3207 = vmatmul.mubr.f32.vlgmr.msra.gmra.mrb[20].mxu0 %v6330_v5  ;;  %5330 = vmatprep.subr.bf16.mxu1 %v5329_v31  ;;  %v5339_v5 = vpack.c.bf16 %v3285_v44, %v3283_v55  ;;  %v3219_v31 = vmax.f32 %v5577_v41, 0.0  ;;  %v3311_v55 = vld [vmem:[#allocation12 + $0x260] sm:$0xff]  ;;  %v3313_v44 = vld [vmem:[#allocation12 + $0x270] sm:$0xff]  ;;  %v5385_v26 = vpack.c.bf16 %v3334_v63, %v3332_v23 }
 0x47b   :  { %3212 = vmatprep.mubr.f32.mxu0 %v6335_v20  ;;  %v3294_v20 = vld [vmem:[#allocation12 + $0x1d8] sm:$0xff]  ;;  %v3222_v32 = vmax.f32 %v5582_v39, 0.0  ;;  %v3327_v41 = vld [vmem:[#allocation12 + $0x2e0] sm:$0xff]  ;;  %v3340_v39 = vld [vmem:[#allocation12 + $0x348] sm:$0xff] }
 0x47c   :  { %v5345_v52 = vpack.c.bf16 %v3294_v20, %v3292_v2  ;;  %v3320_v2 = vld [vmem:[#allocation12 + $0x2a8] sm:$0xff]  ;;  %v3322_v20 = vld [vmem:[#allocation12 + $0x2b8] sm:$0xff] }
 0x47d   :  { %5332 = vmatpush1.bf16.msra.mxu1 %v5331_v43  ;;  %v3310_v43 = vld [vmem:[#allocation12 + $0x258] sm:$0xff] }
 0x47e   :  { %3213 = vmatmul.mubr.f32.gmra.mrb[22].mxu0 %v6337_v28  ;;  %5334 = vmatprep.subr.bf16.mxu1 %v5333_v21  ;;  %v3293_v28 = vld [vmem:[#allocation12 + $0x1d0] sm:$0xff]  ;;  %v3227_v21 = vmax.f32 %v5579_v36, 0.0  ;;  %v5361_v47 = vpack.c.bf16 %v3310_v43, %v3308_v40  ;;  %v3338_v36 = vld [vmem:[#allocation12 + $0x338] sm:$0xff] }
 0x47f   :  { %v5347_v0 = vpack.c.bf16 %v3293_v28, %v3291_v3  ;;  %v3319_v3 = vld [vmem:[#allocation12 + $0x2a0] sm:$0xff]  ;;  %v3321_v28 = vld [vmem:[#allocation12 + $0x2b0] sm:$0xff]  ;;  %v3342_v40 = vld [vmem:[#allocation12 + $0x358] sm:$0xff] }
 0x481   :  { %5336 = vmatpush1.bf16.msra.mxu1 %v5335_v54  ;;  %v3314_v54 = vld [vmem:[#allocation12 + $0x278] sm:$0xff] }
 0x482   :  { %5338 = vmatprep.subr.bf16.mxu1 %v5337_v24  ;;  %v5363_v24 = vpack.c.bf16 %v3309_v15, %v3307_v59  ;;  %v5365_v50 = vpack.c.bf16 %v3314_v54, %v3312_v51  ;;  %v3344_v59 = vld [vmem:[#allocation12 + $0x368] sm:$0xff]  ;;  %v3346_v15 = vld [vmem:[#allocation12 + $0x378] sm:$0xff]  ;;  %v3343_v54 = vld [vmem:[#allocation12 + $0x360] sm:$0xff] }
 0x483   :  { %v5397_v51 = vpack.c.bf16 %v3346_v15, %v3344_v59  ;;  %v3378_v59 = vld [vmem:[#allocation12 + $0x478] sm:$0xff] }
 0x485   :  { %5340 = vmatpush1.bf16.msra.mxu1 %v5339_v5  ;;  %v5367_v5 = vpack.c.bf16 %v3313_v44, %v3311_v55  ;;  %v3350_v55 = vld [vmem:[#allocation12 + $0x398] sm:$0xff] }
 0x486   :  { %5342 = vmatprep.subr.bf16.mxu1 %v5341_v60  ;;  %v5369_v60 = vpack.c.bf16 %v3318_v58, %v3316_v56  ;;  %v3347_v58 = vld [vmem:[#allocation12 + $0x380] sm:$0xff] }
 0x489   :  { %5344 = vmatpush1.bf16.msra.mxu1 %v5343_v35  ;;  %v5371_v35 = vpack.c.bf16 %v3317_v1, %v3315_v61  ;;  %v3354_v61 = vld [vmem:[#allocation12 + $0x3b8] sm:$0xff] }
 0x48a   :  { %5346 = vmatprep.subr.bf16.mxu1 %v5345_v52  ;;  %v5373_v52 = vpack.c.bf16 %v3322_v20, %v3320_v2  ;;  %v3351_v20 = vld [vmem:[#allocation12 + $0x3a0] sm:$0xff] }
 0x48d   :  { %5348 = vmatpush1.bf16.msra.mxu1 %v5347_v0  ;;  %v5375_v0 = vpack.c.bf16 %v3321_v28, %v3319_v3  ;;  %v3358_v3 = vld [vmem:[#allocation12 + $0x3d8] sm:$0xff] }
 0x48e   :  { %5350 = vmatprep.subr.bf16.mxu1 %v5349_v12  ;;  %v3323_v12 = vld [vmem:[#allocation12 + $0x2c0] sm:$0xff] }
 0x48f   :  { %v5379_v16 = vpack.c.bf16 %v3325_v11, %v3323_v12  ;;  %v3362_v12 = vld [vmem:[#allocation12 + $0x3f8] sm:$0xff] }
 0x491   :  { %5352 = vmatpush1.bf16.msra.mxu1 %v5351_v18  ;;  %v5381_v18 = vpack.c.bf16 %v3330_v14, %v3328_v7  ;;  %v1958_v7 = vrot.slane %v6378_v49, %v567_v33 }
 0x492   :  { %5354 = vmatprep.subr.bf16.mxu1 %v5353_v22  ;;  %v3329_v22 = vld [vmem:[#allocation12 + $0x2f0] sm:$0xff] }
 0x493   :  { %v5383_v25 = vpack.c.bf16 %v3329_v22, %v3327_v41  ;;  %v3364_v41 = vld [vmem:[#allocation12 + $0x408] sm:$0xff]  ;;  %v3366_v22 = vld [vmem:[#allocation12 + $0x418] sm:$0xff]  ;;  %v5581_v63 = vadd.f32 %v6380_v53, %v1958_v7 }
 0x494   :  { %3568 = vmatmul.mubr.f32.vlgmr.msra.gmra.mrb[12].mxu1 %v3219_v31  ;;  %v3336_v31 = vld [vmem:[#allocation12 + $0x328] sm:$0xff] }
 0x495   :  { %3573 = vmatprep.mubr.f32.mxu1 %v3228_v42  ;;  %5356 = vmatpush1.bf16.msra.mxu1 %v5355_v30  ;;  %v3333_v30 = vld [vmem:[#allocation12 + $0x310] sm:$0xff]  ;;  %v5389_v38 = vpack.c.bf16 %v3338_v36, %v3336_v31  ;;  %v3368_v31 = vld [vmem:[#allocation12 + $0x428] sm:$0xff]  ;;  %v3370_v36 = vld [vmem:[#allocation12 + $0x438] sm:$0xff]  ;;  %v3221_v49 = vmax.f32 %v5581_v63, 0.0 }
 0x496   :  { %5358 = vmatprep.subr.bf16.mxu1 %v5357_v13  ;;  %v5387_v13 = vpack.c.bf16 %v3333_v30, %v3331_v19  ;;  %v3337_v42 = vld [vmem:[#allocation12 + $0x330] sm:$0xff]  ;;  %v5584_v30 = vadd.f32 %v6390_v6, %v6408_v27  ;;  %v3372_v53 = vld [vmem:[#allocation12 + $0x448] sm:$0xff]  ;;  %v3371_v27 = vld [vmem:[#allocation12 + $0x440] sm:$0xff] }
 0x497   :  { %v5391_v43 = vpack.c.bf16 %v3337_v42, %v3335_v57  ;;  %v3365_v19 = vld [vmem:[#allocation12 + $0x410] sm:$0xff]  ;;  %v3367_v57 = vld [vmem:[#allocation12 + $0x420] sm:$0xff]  ;;  %v3400_v63 = vld [vmem:[#allocation12 + $0x528] sm:$0xff] }
 0x498   :  { %3574 = vmatmul.mubr.f32.gmra.mrb[14].mxu1 %v3227_v21  ;;  %v3339_v21 = vld [vmem:[#allocation12 + $0x340] sm:$0xff]  ;;  %v3369_v42 = vld [vmem:[#allocation12 + $0x430] sm:$0xff] }
 0x499   :  { %5360 = vmatpush1.bf16.msra.mxu1 %v5359_v37  ;;  %3644 = vmatprep.mubr.f32.mxu1 %v3222_v32  ;;  %v5393_v37 = vpack.c.bf16 %v3342_v40, %v3340_v39  ;;  %v3230_v39 = vmax.f32 %v5584_v30, 0.0  ;;  %v3374_v40 = vld [vmem:[#allocation12 + $0x458] sm:$0xff]  ;;  %v3401_v30 = vld [vmem:[#allocation12 + $0x530] sm:$0xff] }
 0x49a   :  { %5362 = vmatprep.subr.bf16.mxu1 %v5361_v47  ;;  %v3341_v47 = vld [vmem:[#allocation12 + $0x350] sm:$0xff]  ;;  %v5425_v6 = vpack.c.bf16 %v3374_v40, %v3372_v53  ;;  %v3834_v53 = vld [vmem:[#allocation15 + $0x98] sm:$0xff] }
 0x49b   :  { %v5395_v32 = vpack.c.bf16 %v3341_v47, %v3339_v21  ;;  %v3373_v21 = vld [vmem:[#allocation12 + $0x450] sm:$0xff]  ;;  %v3376_v47 = vld [vmem:[#allocation12 + $0x468] sm:$0xff] }
 0x49c   :  { %v5429_v15 = vpack.c.bf16 %v3378_v59, %v3376_v47  ;;  %v3836_v47 = vld [vmem:[#allocation15 + $0xa8] sm:$0xff] }
 0x49d   :  { %5364 = vmatpush1.bf16.msra.mxu1 %v5363_v24  ;;  %v3345_v24 = vld [vmem:[#allocation12 + $0x370] sm:$0xff] }
 0x49e   :  { %5366 = vmatprep.subr.bf16.mxu1 %v5365_v50  ;;  %v3348_v50 = vld [vmem:[#allocation12 + $0x388] sm:$0xff]  ;;  %v5399_v44 = vpack.c.bf16 %v3345_v24, %v3343_v54  ;;  %v3382_v24 = vld [vmem:[#allocation12 + $0x498] sm:$0xff] }
 0x49f   :  { %v5401_v56 = vpack.c.bf16 %v3350_v55, %v3348_v50  ;;  %v3380_v54 = vld [vmem:[#allocation12 + $0x488] sm:$0xff] }
 0x4a0   :  { %v5433_v55 = vpack.c.bf16 %v3382_v24, %v3380_v54  ;;  %v3410_v54 = vld [vmem:[#allocation12 + $0x578] sm:$0xff] }
 0x4a1   :  { %5368 = vmatpush1.bf16.msra.mxu1 %v5367_v5  ;;  %v3349_v5 = vld [vmem:[#allocation12 + $0x390] sm:$0xff] }
 0x4a2   :  { %5370 = vmatprep.subr.bf16.mxu1 %v5369_v60  ;;  %v3352_v60 = vld [vmem:[#allocation12 + $0x3a8] sm:$0xff]  ;;  %v5403_v1 = vpack.c.bf16 %v3349_v5, %v3347_v58  ;;  %v3386_v5 = vld [vmem:[#allocation12 + $0x4b8] sm:$0xff] }
 0x4a3   :  { %v5405_v2 = vpack.c.bf16 %v3354_v61, %v3352_v60  ;;  %v3384_v58 = vld [vmem:[#allocation12 + $0x4a8] sm:$0xff] }
 0x4a4   :  { %v5437_v61 = vpack.c.bf16 %v3386_v5, %v3384_v58 }
 0x4a5   :  { %5372 = vmatpush1.bf16.msra.mxu1 %v5371_v35  ;;  %v3353_v35 = vld [vmem:[#allocation12 + $0x3b0] sm:$0xff] }
 0x4a6   :  { %5374 = vmatprep.subr.bf16.mxu1 %v5373_v52  ;;  %v3356_v52 = vld [vmem:[#allocation12 + $0x3c8] sm:$0xff]  ;;  %v5407_v28 = vpack.c.bf16 %v3353_v35, %v3351_v20  ;;  %v3390_v35 = vld [vmem:[#allocation12 + $0x4d8] sm:$0xff] }
 0x4a7   :  { %v5409_v62 = vpack.c.bf16 %v3358_v3, %v3356_v52  ;;  %v3388_v20 = vld [vmem:[#allocation12 + $0x4c8] sm:$0xff] }
 0x4a8   :  { %v5441_v3 = vpack.c.bf16 %v3390_v35, %v3388_v20  ;;  %v3414_v20 = vld [vmem:[#allocation12 + $0x598] sm:$0xff] }
 0x4a9   :  { %5376 = vmatpush1.bf16.msra.mxu1 %v5375_v0  ;;  %v3357_v0 = vld [vmem:[#allocation12 + $0x3d0] sm:$0xff] }
 0x4aa   :  { %5378 = vmatprep.subr.bf16.mxu1 %v5377_v9  ;;  %v3360_v9 = vld [vmem:[#allocation12 + $0x3e8] sm:$0xff]  ;;  %v5411_v11 = vpack.c.bf16 %v3357_v0, %v3355_v8  ;;  %v3394_v0 = vld [vmem:[#allocation12 + $0x4f8] sm:$0xff] }
 0x4ab   :  { %v5413_v14 = vpack.c.bf16 %v3362_v12, %v3360_v9  ;;  %v3392_v8 = vld [vmem:[#allocation12 + $0x4e8] sm:$0xff] }
 0x4ac   :  { %v5445_v12 = vpack.c.bf16 %v3394_v0, %v3392_v8 }
 0x4ad   :  { %5380 = vmatpush1.bf16.msra.mxu1 %v5379_v16  ;;  %v3359_v16 = vld [vmem:[#allocation12 + $0x3e0] sm:$0xff] }
 0x4ae   :  { %5382 = vmatprep.subr.bf16.mxu1 %v5381_v18  ;;  %v3361_v18 = vld [vmem:[#allocation12 + $0x3f0] sm:$0xff] }
 0x4af   :  { %v5415_v23 = vpack.c.bf16 %v3361_v18, %v3359_v16  ;;  %v3398_v16 = vld [vmem:[#allocation12 + $0x518] sm:$0xff] }
 0x4b1   :  { %5384 = vmatpush1.bf16.msra.mxu1 %v5383_v25  ;;  %v5417_v25 = vpack.c.bf16 %v3366_v22, %v3364_v41  ;;  %v3395_v22 = vld [vmem:[#allocation12 + $0x500] sm:$0xff] }
 0x4b2   :  { %5386 = vmatprep.subr.bf16.mxu1 %v5385_v26  ;;  %v3363_v26 = vld [vmem:[#allocation12 + $0x400] sm:$0xff] }
 0x4b3   :  { %v5419_v33 = vpack.c.bf16 %v3365_v19, %v3363_v26  ;;  %v3399_v26 = vld [vmem:[#allocation12 + $0x520] sm:$0xff] }
 0x4b5   :  { %5388 = vmatpush1.bf16.msra.mxu1 %v5387_v13  ;;  %v5583_v13 = vadd.f32 %v6388_v17, %v1958_v7  ;;  %v5427_v17 = vpack.c.bf16 %v3373_v21, %v3371_v27  ;;  %v3393_v7 = vld [vmem:[#allocation12 + $0x4f0] sm:$0xff]  ;;  %v3835_v27 = vld [vmem:[#allocation15 + $0xa0] sm:$0xff]  ;;  %v5455_v21 = vpack.c.bf16 %v3401_v30, %v3399_v26 }
 0x4b6   :  { %5390 = vmatprep.subr.bf16.mxu1 %v5389_v38  ;;  %v5421_v38 = vpack.c.bf16 %v3370_v36, %v3368_v31  ;;  %v3404_v31 = vld [vmem:[#allocation12 + $0x548] sm:$0xff]  ;;  %v3406_v36 = vld [vmem:[#allocation12 + $0x558] sm:$0xff]  ;;  %v5553_v24 = vpack.c.bf16 %v3836_v47, %v3835_v27  ;;  %v3415_v26 = vld [vmem:[#allocation12 + $0x5a0] sm:$0xff] }
 0x4b7   :  { %v5457_v59 = vpack.c.bf16 %v3406_v36, %v3404_v31  ;;  %v3420_v30 = vld [vmem:[#allocation12 + $0x5c8] sm:$0xff]  ;;  %v3422_v36 = vld [vmem:[#allocation12 + $0x5d8] sm:$0xff] }
 0x4b9   :  { %5392 = vmatpush1.bf16.msra.mxu1 %v5391_v43  ;;  %v5423_v43 = vpack.c.bf16 %v3369_v42, %v3367_v57  ;;  %v3816_v42 = vld [vmem:[#allocation15 + $0x8] sm:$0xff] }
 0x4ba   :  { %5394 = vmatprep.subr.bf16.mxu1 %v5393_v37  ;;  %v3229_v37 = vmax.f32 %v5583_v13, 0.0  ;;  %v3832_v13 = vld [vmem:[#allocation15 + $0x88] sm:$0xff] }
 0x4bd   :  { %5396 = vmatpush1.bf16.msra.mxu1 %v5395_v32  ;;  %v3375_v32 = vld [vmem:[#allocation12 + $0x460] sm:$0xff] }
 0x4be   :  { %5398 = vmatprep.subr.bf16.mxu1 %v5397_v51  ;;  %v3377_v51 = vld [vmem:[#allocation12 + $0x470] sm:$0xff] }
 0x4bf   :  { %v5431_v50 = vpack.c.bf16 %v3377_v51, %v3375_v32  ;;  %v3408_v32 = vld [vmem:[#allocation12 + $0x568] sm:$0xff] }
 0x4c0   :  { %v5461_v5 = vpack.c.bf16 %v3410_v54, %v3408_v32  ;;  %v3430_v32 = vld [vmem:[#allocation12 + $0x618] sm:$0xff] }
 0x4c1   :  { %5400 = vmatpush1.bf16.msra.mxu1 %v5399_v44  ;;  %v3379_v44 = vld [vmem:[#allocation12 + $0x480] sm:$0xff] }
 0x4c2   :  { %5402 = vmatprep.subr.bf16.mxu1 %v5401_v56  ;;  %v3381_v56 = vld [vmem:[#allocation12 + $0x490] sm:$0xff] }
 0x4c3   :  { %v5435_v60 = vpack.c.bf16 %v3381_v56, %v3379_v44  ;;  %v3837_v44 = vld [vmem:[#allocation15 + $0xb0] sm:$0xff]  ;;  %v3838_v56 = vld [vmem:[#allocation15 + $0xb8] sm:$0xff] }
 0x4c4   :  { %v5557_v35 = vpack.c.bf16 %v3838_v56, %v3837_v44 }
 0x4c5   :  { %5404 = vmatpush1.bf16.msra.mxu1 %v5403_v1  ;;  %v3383_v1 = vld [vmem:[#allocation12 + $0x4a0] sm:$0xff] }
 0x4c6   :  { %5406 = vmatprep.subr.bf16.mxu1 %v5405_v2  ;;  %v3385_v2 = vld [vmem:[#allocation12 + $0x4b0] sm:$0xff] }
 0x4c7   :  { %v5439_v52 = vpack.c.bf16 %v3385_v2, %v3383_v1  ;;  %v3412_v1 = vld [vmem:[#allocation12 + $0x588] sm:$0xff] }
 0x4c8   :  { %v5465_v0 = vpack.c.bf16 %v3414_v20, %v3412_v1  ;;  %v3432_v1 = vld [vmem:[#allocation12 + $0x628] sm:$0xff] }
 0x4c9   :  { %5408 = vmatpush1.bf16.msra.mxu1 %v5407_v28  ;;  %v3387_v28 = vld [vmem:[#allocation12 + $0x4c0] sm:$0xff] }
 0x4ca   :  { %5410 = vmatprep.subr.bf16.mxu1 %v5409_v62  ;;  %v3389_v62 = vld [vmem:[#allocation12 + $0x4d0] sm:$0xff] }
 0x4cb   :  { %v5443_v9 = vpack.c.bf16 %v3389_v62, %v3387_v28  ;;  %v3839_v28 = vld [vmem:[#allocation15 + $0xc0] sm:$0xff]  ;;  %v3840_v62 = vld [vmem:[#allocation15 + $0xc8] sm:$0xff] }
 0x4cd   :  { %5412 = vmatpush1.bf16.msra.mxu1 %v5411_v11  ;;  %v3391_v11 = vld [vmem:[#allocation12 + $0x4e0] sm:$0xff] }
 0x4ce   :  { %5414 = vmatprep.subr.bf16.mxu1 %v5413_v14  ;;  %v3396_v14 = vld [vmem:[#allocation12 + $0x508] sm:$0xff]  ;;  %v5447_v18 = vpack.c.bf16 %v3393_v7, %v3391_v11 }
 0x4cf   :  { %v5449_v41 = vpack.c.bf16 %v3398_v16, %v3396_v14  ;;  %v3416_v11 = vld [vmem:[#allocation12 + $0x5a8] sm:$0xff]  ;;  %v3418_v14 = vld [vmem:[#allocation12 + $0x5b8] sm:$0xff]  ;;  %v5561_v16 = vpack.c.bf16 %v3840_v62, %v3839_v28 }
 0x4d1   :  { %5416 = vmatpush1.bf16.msra.mxu1 %v5415_v23  ;;  %v3397_v23 = vld [vmem:[#allocation12 + $0x510] sm:$0xff] }
 0x4d2   :  { %5418 = vmatprep.subr.bf16.mxu1 %v5417_v25  ;;  %v3402_v25 = vld [vmem:[#allocation12 + $0x538] sm:$0xff]  ;;  %v5451_v19 = vpack.c.bf16 %v3397_v23, %v3395_v22 }
 0x4d3   :  { %v3841_v22 = vld [vmem:[#allocation15 + $0xd0] sm:$0xff]  ;;  %v3842_v23 = vld [vmem:[#allocation15 + $0xd8] sm:$0xff] }
 0x4d4   :  { %3645 = vmatmul.mubr.f32.vlgmr.msra.gmra.mrb[12].mxu1 %v3221_v49  ;;  %v3831_v49 = vld [vmem:[#allocation15 + $0x80] sm:$0xff] }
 0x4d5   :  { %3650 = vmatprep.mubr.f32.mxu1 %v3230_v39  ;;  %5420 = vmatpush1.bf16.msra.mxu1 %v5419_v33  ;;  %v5453_v33 = vpack.c.bf16 %v3402_v25, %v3400_v63  ;;  %v5545_v57 = vpack.c.bf16 %v3832_v13, %v3831_v49  ;;  %v3833_v39 = vld [vmem:[#allocation15 + $0x90] sm:$0xff]  ;;  %v5469_v25 = vpack.c.bf16 %v3418_v14, %v3416_v11  ;;  %v3826_v13 = vld [vmem:[#allocation15 + $0x58] sm:$0xff] }
 0x4d6   :  { %5422 = vmatprep.subr.bf16.mxu1 %v5421_v38  ;;  %v3815_v38 = vld [vmem:[#allocation15] sm:$0xff]  ;;  %v3825_v49 = vld [vmem:[#allocation15 + $0x50] sm:$0xff] }
 0x4d7   :  { %v5547_v40 = vpack.c.bf16 %v3816_v42, %v3815_v38  ;;  %5546 = vmatprep.subr.bf16.mxu0 %v5545_v57  ;;  %v3843_v38 = vld [vmem:[#allocation15 + $0xe0] sm:$0xff]  ;;  %v3844_v57 = vld [vmem:[#allocation15 + $0xe8] sm:$0xff] }
 0x4d8   :  { %3651 = vmatmul.mubr.f32.gmra.mrb[14].mxu1 %v3229_v37  ;;  %v3817_v37 = vld [vmem:[#allocation15 + $0x10] sm:$0xff]  ;;  %v5569_v27 = vpack.c.bf16 %v3844_v57, %v3843_v38  ;;  %v3448_v38 = vld [vmem:[#allocation12 + $0x6a8] sm:$0xff] }
 0x4d9   :  { %5424 = vmatpush1.bf16.msra.mxu1 %v5423_v43  ;;  %v5549_v43 = vpack.c.bf16 %v3834_v53, %v3833_v39  ;;  %5548 = vmatpush3.bf16.msra.mxu0 %v5547_v40  ;;  %v5473_v39 = vpack.c.bf16 %v3422_v36, %v3420_v30  ;;  %v3419_v53 = vld [vmem:[#allocation12 + $0x5c0] sm:$0xff]  ;;  %v3421_v40 = vld [vmem:[#allocation12 + $0x5d0] sm:$0xff]  ;;  %v3444_v30 = vld [vmem:[#allocation12 + $0x688] sm:$0xff] }
 0x4da   :  { %5426 = vmatprep.subr.bf16.mxu1 %v5425_v6  ;;  %v3818_v6 = vld [vmem:[#allocation15 + $0x18] sm:$0xff] }
 0x4db   :  { %v5551_v51 = vpack.c.bf16 %v3818_v6, %v3817_v37  ;;  %5550 = vmatprep.subr.bf16.mxu0 %v5549_v43  ;;  %v5567_v43 = vpack.c.bf16 %v3826_v13, %v3825_v49  ;;  %v3424_v37 = vld [vmem:[#allocation12 + $0x5e8] sm:$0xff]  ;;  %v3426_v6 = vld [vmem:[#allocation12 + $0x5f8] sm:$0xff]  ;;  %v3443_v49 = vld [vmem:[#allocation12 + $0x680] sm:$0xff] }
 0x4dc   :  { %v5477_v47 = vpack.c.bf16 %v3426_v6, %v3424_v37  ;;  %v3445_v13 = vld [vmem:[#allocation12 + $0x690] sm:$0xff]  ;;  %v3450_v57 = vld [vmem:[#allocation12 + $0x6b8] sm:$0xff] }
 0x4dd   :  { %5428 = vmatpush1.bf16.msra.mxu1 %v5427_v17  ;;  %v3403_v17 = vld [vmem:[#allocation12 + $0x540] sm:$0xff]  ;;  %5552 = vmatpush3.bf16.msra.mxu0 %v5551_v51  ;;  %v3454_v37 = vld [vmem:[#allocation12 + $0x6d8] sm:$0xff] }
 0x4de   :  { %5430 = vmatprep.subr.bf16.mxu1 %v5429_v15  ;;  %v3405_v15 = vld [vmem:[#allocation12 + $0x550] sm:$0xff]  ;;  %5554 = vmatprep.subr.bf16.mxu0 %v5553_v24  ;;  %v6420_v24 = vld [vmem:[#allocation10] sm:$0xff] }
 0x4df   :  { %v5459_v58 = vpack.c.bf16 %v3405_v15, %v3403_v17  ;;  %v3425_v17 = vld [vmem:[#allocation12 + $0x5f0] sm:$0xff]  ;;  %v3428_v15 = vld [vmem:[#allocation12 + $0x608] sm:$0xff] }
 0x4e0   :  { %v5481_v54 = vpack.c.bf16 %v3430_v32, %v3428_v15 }
 0x4e1   :  { %5432 = vmatpush1.bf16.msra.mxu1 %v5431_v50  ;;  %v3819_v50 = vld [vmem:[#allocation15 + $0x20] sm:$0xff] }
 0x4e2   :  { %5434 = vmatprep.subr.bf16.mxu1 %v5433_v55  ;;  %v3820_v55 = vld [vmem:[#allocation15 + $0x28] sm:$0xff] }
 0x4e3   :  { %v5555_v2 = vpack.c.bf16 %v3820_v55, %v3819_v50  ;;  %v1966_v50 = vrot.slane %v6420_v24, %v575_v29  ;;  %v1970_v55 = vrot.slane %v6420_v24, %v579_v34  ;;  %v3431_v29 = vld [vmem:[#allocation12 + $0x620] sm:$0xff]  ;;  %v3436_v34 = vld [vmem:[#allocation12 + $0x648] sm:$0xff] }
 0x4e5   :  { %5436 = vmatpush1.bf16.msra.mxu1 %v5435_v60  ;;  %v3407_v60 = vld [vmem:[#allocation12 + $0x560] sm:$0xff]  ;;  %5556 = vmatpush3.bf16.msra.mxu0 %v5555_v2  ;;  %v3434_v2 = vld [vmem:[#allocation12 + $0x638] sm:$0xff] }
 0x4e6   :  { %5438 = vmatprep.subr.bf16.mxu1 %v5437_v61  ;;  %v3409_v61 = vld [vmem:[#allocation12 + $0x570] sm:$0xff]  ;;  %5558 = vmatprep.subr.bf16.mxu0 %v5557_v35 }
 0x4e7   :  { %v5463_v8 = vpack.c.bf16 %v3409_v61, %v3407_v60  ;;  %v3429_v60 = vld [vmem:[#allocation12 + $0x610] sm:$0xff] }
 0x4e9   :  { %5440 = vmatpush1.bf16.msra.mxu1 %v5439_v52  ;;  %v3821_v52 = vld [vmem:[#allocation15 + $0x30] sm:$0xff] }
 0x4ea   :  { %5442 = vmatprep.subr.bf16.mxu1 %v5441_v3  ;;  %v3822_v3 = vld [vmem:[#allocation15 + $0x38] sm:$0xff] }
 0x4eb   :  { %v5559_v7 = vpack.c.bf16 %v3822_v3, %v3821_v52 }
 0x4ed   :  { %5444 = vmatpush1.bf16.msra.mxu1 %v5443_v9  ;;  %v3411_v9 = vld [vmem:[#allocation12 + $0x580] sm:$0xff]  ;;  %5560 = vmatpush3.bf16.msra.mxu0 %v5559_v7 }
 0x4ee   :  { %5446 = vmatprep.subr.bf16.mxu1 %v5445_v12  ;;  %v3413_v12 = vld [vmem:[#allocation12 + $0x590] sm:$0xff]  ;;  %5562 = vmatprep.subr.bf16.mxu0 %v5561_v16 }
 0x4ef   :  { %v5467_v63 = vpack.c.bf16 %v3413_v12, %v3411_v9  ;;  %v3438_v12 = vld [vmem:[#allocation12 + $0x658] sm:$0xff] }
 0x4f0   :  { %v5489_v16 = vpack.c.bf16 %v3438_v12, %v3436_v34  ;;  %v3467_v34 = vld [vmem:[#allocation12 + $0x740] sm:$0xff]  ;;  %v3469_v12 = vld [vmem:[#allocation12 + $0x750] sm:$0xff] }
 0x4f1   :  { %5448 = vmatpush1.bf16.msra.mxu1 %v5447_v18  ;;  %v3823_v18 = vld [vmem:[#allocation15 + $0x40] sm:$0xff] }
 0x4f2   :  { %5450 = vmatprep.subr.bf16.mxu1 %v5449_v41  ;;  %v3824_v41 = vld [vmem:[#allocation15 + $0x48] sm:$0xff] }
 0x4f3   :  { %v5563_v31 = vpack.c.bf16 %v3824_v41, %v3823_v18  ;;  %v3435_v18 = vld [vmem:[#allocation12 + $0x640] sm:$0xff]  ;;  %v3437_v41 = vld [vmem:[#allocation12 + $0x650] sm:$0xff] }
 0x4f5   :  { %5452 = vmatpush1.bf16.msra.mxu1 %v5451_v19  ;;  %v3417_v19 = vld [vmem:[#allocation12 + $0x5b0] sm:$0xff]  ;;  %5564 = vmatpush3.bf16.msra.mxu0 %v5563_v31  ;;  %v3446_v31 = vld [vmem:[#allocation12 + $0x698] sm:$0xff] }
 0x4f6   :  { %5454 = vmatprep.subr.bf16.mxu1 %v5453_v33  ;;  %v5565_v33 = vpack.c.bf16 %v3842_v23, %v3841_v22  ;;  %v5471_v42 = vpack.c.bf16 %v3417_v19, %v3415_v26  ;;  %v3440_v22 = vld [vmem:[#allocation12 + $0x668] sm:$0xff]  ;;  %v3442_v23 = vld [vmem:[#allocation12 + $0x678] sm:$0xff]  ;;  %v3439_v26 = vld [vmem:[#allocation12 + $0x660] sm:$0xff] }
 0x4f7   :  { %v3441_v19 = vld [vmem:[#allocation12 + $0x670] sm:$0xff] }
 0x4f8   :  { %5566 = vmatprep.subr.bf16.mxu0 %v5565_v33  ;;  %v5495_v36 = vpack.c.bf16 %v3441_v19, %v3439_v26  ;;  %v5497_v33 = vpack.c.bf16 %v3446_v31, %v3444_v30  ;;  %v3475_v30 = vld [vmem:[#allocation12 + $0x780] sm:$0xff]  ;;  %v3477_v31 = vld [vmem:[#allocation12 + $0x790] sm:$0xff] }
 0x4f9   :  { %5456 = vmatpush1.bf16.msra.mxu1 %v5455_v21  ;;  %v5475_v21 = vpack.c.bf16 %v3421_v40, %v3419_v53  ;;  %5568 = vmatpush3.bf16.msra.mxu0 %v5567_v43  ;;  %v3447_v53 = vld [vmem:[#allocation12 + $0x6a0] sm:$0xff]  ;;  %v3449_v40 = vld [vmem:[#allocation12 + $0x6b0] sm:$0xff]  ;;  %v3452_v43 = vld [vmem:[#allocation12 + $0x6c8] sm:$0xff] }
 0x4fa   :  { %5458 = vmatprep.subr.bf16.mxu1 %v5457_v59  ;;  %v3423_v59 = vld [vmem:[#allocation12 + $0x5e0] sm:$0xff]  ;;  %5570 = vmatprep.subr.bf16.mxu0 %v5569_v27  ;;  %v5503_v6 = vpack.c.bf16 %v3449_v40, %v3447_v53  ;;  %v5505_v27 = vpack.c.bf16 %v3454_v37, %v3452_v43  ;;  %v3485_v37 = vld [vmem:[#allocation12 + $0x7d0] sm:$0xff] }
 0x4fb   :  { %v5479_v51 = vpack.c.bf16 %v3425_v17, %v3423_v59  ;;  %v3456_v59 = vld [vmem:[#allocation12 + $0x6e8] sm:$0xff]  ;;  %v3458_v17 = vld [vmem:[#allocation12 + $0x6f8] sm:$0xff]  ;;  %v3483_v43 = vld [vmem:[#allocation12 + $0x7c0] sm:$0xff] }
 0x4fc   :  { %v5509_v32 = vpack.c.bf16 %v3458_v17, %v3456_v59  ;;  %v3487_v17 = vld [vmem:[#allocation12 + $0x7e0] sm:$0xff] }
 0x4fd   :  { %5460 = vmatpush1.bf16.msra.mxu1 %v5459_v58 }
 0x4fe   :  { %5462 = vmatprep.subr.bf16.mxu1 %v5461_v5  ;;  %v3427_v5 = vld [vmem:[#allocation12 + $0x600] sm:$0xff] }
 0x4ff   :  { %v5483_v52 = vpack.c.bf16 %v3429_v60, %v3427_v5  ;;  %v3461_v5 = vld [vmem:[#allocation12 + $0x710] sm:$0xff]  ;;  %v3464_v60 = vld [vmem:[#allocation12 + $0x728] sm:$0xff] }
 0x501   :  { %5464 = vmatpush1.bf16.msra.mxu1 %v5463_v8  ;;  %v5485_v8 = vpack.c.bf16 %v3434_v2, %v3432_v1  ;;  %v6431_v1 = vrot.slane %v6420_v24, %v587_v10 }
 0x502   :  { %5466 = vmatprep.subr.bf16.mxu1 %v5465_v0  ;;  %v3433_v0 = vld [vmem:[#allocation12 + $0x630] sm:$0xff] }
 0x503   :  { %v5487_v7 = vpack.c.bf16 %v3433_v0, %v3431_v29 }
 0x505   :  { %5468 = vmatpush1.bf16.msra.mxu1 %v5467_v63  ;;  %v5491_v63 = vpack.c.bf16 %v3437_v41, %v3435_v18  ;;  %v5523_v18 = vpack.c.bf16 %v3469_v12, %v3467_v34 }
 0x506   :  { %5470 = vmatprep.subr.bf16.mxu1 %v5469_v25  ;;  %v5493_v25 = vpack.c.bf16 %v3442_v23, %v3440_v22  ;;  %v3471_v22 = vld [vmem:[#allocation12 + $0x760] sm:$0xff]  ;;  %v3473_v23 = vld [vmem:[#allocation12 + $0x770] sm:$0xff] }
 0x507   :  { %v5527_v26 = vpack.c.bf16 %v3473_v23, %v3471_v22 }
 0x509   :  { %5472 = vmatpush1.bf16.msra.mxu1 %v5471_v42  ;;  %v5499_v42 = vpack.c.bf16 %v3445_v13, %v3443_v49  ;;  %v5531_v49 = vpack.c.bf16 %v3477_v31, %v3475_v30 }
 0x50a   :  { %5474 = vmatprep.subr.bf16.mxu1 %v5473_v39  ;;  %v5501_v39 = vpack.c.bf16 %v3450_v57, %v3448_v38  ;;  %v3479_v38 = vld [vmem:[#allocation12 + $0x7a0] sm:$0xff]  ;;  %v3481_v57 = vld [vmem:[#allocation12 + $0x7b0] sm:$0xff] }
 0x50b   :  { %v5535_v53 = vpack.c.bf16 %v3481_v57, %v3479_v38 }
 0x50d   :  { %5476 = vmatpush1.bf16.msra.mxu1 %v5475_v21  ;;  %v3451_v21 = vld [vmem:[#allocation12 + $0x6c0] sm:$0xff] }
 0x50e   :  { %5478 = vmatprep.subr.bf16.mxu1 %v5477_v47  ;;  %v3453_v47 = vld [vmem:[#allocation12 + $0x6d0] sm:$0xff] }
 0x50f   :  { %v5507_v15 = vpack.c.bf16 %v3453_v47, %v3451_v21  ;;  %v5539_v21 = vpack.c.bf16 %v3485_v37, %v3483_v43  ;;  %v1974_v47 = vrot.slane %v6420_v24, %v583_v4  ;;  %v3828_v4 = vld [vmem:[#allocation15 + $0x68] sm:$0xff] }
 0x510   :  { %v5571_v24 = vpack.c.bf16 %v3828_v4, %v3827_v45 }
 0x511   :  { %5480 = vmatpush1.bf16.msra.mxu1 %v5479_v51  ;;  %v3455_v51 = vld [vmem:[#allocation12 + $0x6e0] sm:$0xff] }
 0x512   :  { %5482 = vmatprep.subr.bf16.mxu1 %v5481_v54  ;;  %v3457_v54 = vld [vmem:[#allocation12 + $0x6f0] sm:$0xff]  ;;  %5572 = vmatpush3.bf16.msra.mxu0 %v5571_v24 }
 0x527   :  { %v2900_v44 = vpop.f32.mrb[8].mxu1 }
 0x528   :  { %v5585_v56 = vadd.f32 %v2900_v44, %v1966_v50  ;;  %v2902_v58 = vpop.f32.mrb[9].mxu1  ;;  %v5511_v44 = vpack.c.bf16 %v3457_v54, %v3455_v51 }
 0x529   :  { %v5586_v61 = vadd.f32 %v2902_v58, %v1970_v55  ;;  %v3459_v58 = vld [vmem:[#allocation12 + $0x700] sm:$0xff] }
 0x52a   :  { %v3223_v3 = vmax.f32 %v5585_v56, 0.0  ;;  %v5515_v2 = vpack.c.bf16 %v3461_v5, %v3459_v58  ;;  %v3845_v58 = vld [vmem:[#allocation15 + $0xf0] sm:$0xff]  ;;  %v3846_v5 = vld [vmem:[#allocation15 + $0xf8] sm:$0xff] }
 0x52b   :  { %v3224_v20 = vmax.f32 %v5586_v61, 0.0  ;;  %v2906_v35 = vpop.f32.mrb[10].mxu1  ;;  %v3466_v61 = vld [vmem:[#allocation12 + $0x738] sm:$0xff] }
 0x52c   :  { %v5587_v28 = vadd.f32 %v2906_v35, %v1966_v50  ;;  %v2908_v62 = vpop.f32.mrb[11].mxu1  ;;  %v3460_v50 = vld [vmem:[#allocation12 + $0x708] sm:$0xff]  ;;  %v3463_v35 = vld [vmem:[#allocation12 + $0x720] sm:$0xff] }
 0x52d   :  { %v5588_v9 = vadd.f32 %v2908_v62, %v1970_v55  ;;  %3721 = vmatprep.mubr.f32.mxu1 %v3224_v20  ;;  %v3462_v55 = vld [vmem:[#allocation12 + $0x718] sm:$0xff]  ;;  %v5517_v20 = vpack.c.bf16 %v3466_v61, %v3464_v60  ;;  %v5573_v60 = vpack.c.bf16 %v3846_v5, %v3845_v58 }
 0x52e   :  { %3722 = vmatmul.mubr.f32.vlgmr.msra.gmra.mrb[12].mxu1 %v3223_v3  ;;  %v3231_v14 = vmax.f32 %v5587_v28, 0.0  ;;  %v5513_v56 = vpack.c.bf16 %v3462_v55, %v3460_v50  ;;  %v3468_v28 = vld [vmem:[#allocation12 + $0x748] sm:$0xff]  ;;  %v3470_v62 = vld [vmem:[#allocation12 + $0x758] sm:$0xff] }
 0x52f   :  { %v3232_v11 = vmax.f32 %v5588_v9, 0.0  ;;  %5484 = vmatpush1.bf16.msra.mxu1 %v5483_v52  ;;  %v3465_v52 = vld [vmem:[#allocation12 + $0x730] sm:$0xff]  ;;  %v5521_v9 = vpack.c.bf16 %v3470_v62, %v3468_v28  ;;  %5574 = vmatprep.subr.bf16.mxu0 %v5573_v60 }
 0x530   :  { %5486 = vmatprep.subr.bf16.mxu1 %v5485_v8  ;;  %v5519_v0 = vpack.c.bf16 %v3465_v52, %v3463_v35  ;;  %v3829_v61 = vld [vmem:[#allocation15 + $0x70] sm:$0xff] }
 0x531   :  { %3727 = vmatprep.mubr.f32.mxu1 %v3232_v11 }
 0x532   :  { %3728 = vmatmul.mubr.f32.gmra.mrb[14].mxu1 %v3231_v14  ;;  %v3474_v14 = vld [vmem:[#allocation12 + $0x778] sm:$0xff] }
 0x533   :  { %5488 = vmatpush1.bf16.msra.mxu1 %v5487_v7  ;;  %v3472_v7 = vld [vmem:[#allocation12 + $0x768] sm:$0xff] }
 0x534   :  { %5490 = vmatprep.subr.bf16.mxu1 %v5489_v16  ;;  %v5525_v41 = vpack.c.bf16 %v3474_v14, %v3472_v7 }
 0x537   :  { %5492 = vmatpush1.bf16.msra.mxu1 %v5491_v63  ;;  %v3476_v63 = vld [vmem:[#allocation12 + $0x788] sm:$0xff] }
 0x538   :  { %5494 = vmatprep.subr.bf16.mxu1 %v5493_v25  ;;  %v3478_v25 = vld [vmem:[#allocation12 + $0x798] sm:$0xff] }
 0x539   :  { %v5529_v19 = vpack.c.bf16 %v3478_v25, %v3476_v63  ;;  %v3965_v25 = vld [vmem:[#allocation18] ss:$0 sm:$0xff] }
 0x53b   :  { %5496 = vmatpush1.bf16.msra.mxu1 %v5495_v36  ;;  %v3480_v36 = vld [vmem:[#allocation12 + $0x7a8] sm:$0xff] }
 0x53c   :  { %5498 = vmatprep.subr.bf16.mxu1 %v5497_v33  ;;  %v3482_v33 = vld [vmem:[#allocation12 + $0x7b8] sm:$0xff] }
 0x53d   :  { %v5533_v13 = vpack.c.bf16 %v3482_v33, %v3480_v36 }
 0x53f   :  { %5500 = vmatpush1.bf16.msra.mxu1 %v5499_v42  ;;  %v3484_v42 = vld [vmem:[#allocation12 + $0x7c8] sm:$0xff] }
 0x540   :  { %5502 = vmatprep.subr.bf16.mxu1 %v5501_v39  ;;  %v3486_v39 = vld [vmem:[#allocation12 + $0x7d8] sm:$0xff] }
 0x541   :  { %v5537_v40 = vpack.c.bf16 %v3486_v39, %v3484_v42 }
 0x543   :  { %5504 = vmatpush1.bf16.msra.mxu1 %v5503_v6  ;;  %v3488_v6 = vld [vmem:[#allocation12 + $0x7e8] sm:$0xff] }
 0x544   :  { %5506 = vmatprep.subr.bf16.mxu1 %v5505_v27  ;;  %v3490_v27 = vld [vmem:[#allocation12 + $0x7f8] sm:$0xff] }
 0x545   :  { %v5541_v59 = vpack.c.bf16 %v3490_v27, %v3488_v6 }
 0x547   :  { %5508 = vmatpush1.bf16.msra.mxu1 %v5507_v15  ;;  %v3489_v15 = vld [vmem:[#allocation12 + $0x7f0] sm:$0xff] }
 0x548   :  { %5510 = vmatprep.subr.bf16.mxu1 %v5509_v32  ;;  %v5543_v32 = vpack.c.bf16 %v3489_v15, %v3487_v17 }
 0x54b   :  { %5512 = vmatpush1.bf16.msra.mxu1 %v5511_v44 }
 0x54c   :  { %5514 = vmatprep.subr.bf16.mxu1 %v5513_v56 }
 0x54d   :  { %v3208_v3 = vpop.f32.mrb[20].mxu0 }
 0x54e   :  { %v3210_v8 = vpop.f32.mrb[21].mxu0  ;;  %v5589_v51 = vadd.f32 %v3208_v3, %v1974_v47 }
 0x54f   :  { %v5590_v29 = vadd.f32 %v3210_v8, %v6431_v1  ;;  %5516 = vmatpush1.bf16.msra.mxu1 %v5515_v2  ;;  %v3830_v2 = vld [vmem:[#allocation15 + $0x78] sm:$0xff] }
 0x550   :  { %5518 = vmatprep.subr.bf16.mxu1 %v5517_v20  ;;  %v3225_v50 = vmax.f32 %v5589_v51, 0.0  ;;  %v5575_v20 = vpack.c.bf16 %v3830_v2, %v3829_v61 }
 0x551   :  { %v3226_v11 = vmax.f32 %v5590_v29, 0.0  ;;  %v3214_v10 = vpop.f32.mrb[22].mxu0 }
 0x552   :  { %v3216_v16 = vpop.f32.mrb[23].mxu0  ;;  %v5591_v55 = vadd.f32 %v3214_v10, %v1974_v47  ;;  %5576 = vmatpush3.bf16.msra.mxu0 %v5575_v20 }
 0x553   :  { %5520 = vmatpush1.bf16.msra.mxu1 %v5519_v0  ;;  %3798 = vmatprep.mubr.f32.mxu1 %v3226_v11  ;;  %v5592_v54 = vadd.f32 %v3216_v16, %v6431_v1  ;;  %v3491_v1 = vld [vmem:[#allocation13] sm:$0x3] }
 0x554   :  { %5522 = vmatprep.subr.bf16.mxu1 %v5521_v9  ;;  %v3233_v56 = vmax.f32 %v5591_v55, 0.0  ;;  %v3496_v35 = vrot.slane %v3491_v1, %v6217_v46  ;;  %v3500_v52 = vrot.slane %v3491_v1, %v6220_v48  ;;  %v3964_v46 = vld [vmem:[#allocation16] ss:$0 sm:$0xff] }
 0x555   :  { %v3234_v44 = vmax.f32 %v5592_v54, 0.0 }
 0x557   :  { %5524 = vmatpush1.bf16.msra.mxu1 %v5523_v18 }
 0x558   :  { %5526 = vmatprep.subr.bf16.mxu1 %v5525_v41 }
 0x55b   :  { %5528 = vmatpush1.bf16.msra.mxu1 %v5527_v26 }
 0x55c   :  { %5530 = vmatprep.subr.bf16.mxu1 %v5529_v19  ;;  %v3966_v19 = vld [vmem:[#allocation19] ss:$0 sm:$0xff] }
 0x55f   :  { %5532 = vmatpush1.bf16.msra.mxu1 %v5531_v49 }
 0x560   :  { %5534 = vmatprep.subr.bf16.mxu1 %v5533_v13 }
 0x563   :  { %5536 = vmatpush1.bf16.msra.mxu1 %v5535_v53 }
 0x564   :  { %5538 = vmatprep.subr.bf16.mxu1 %v5537_v40 }
 0x567   :  { %5540 = vmatpush1.bf16.msra.mxu1 %v5539_v21 }
 0x568   :  { %5542 = vmatprep.subr.bf16.mxu1 %v5541_v59 }
 0x56b   :  { %5544 = vmatpush1.bf16.msra.mxu1 %v5543_v32 }
 0x56e   :  { %3799 = vmatmul.mubr.f32.vlgmr.msra.gmra.mrb[12].mxu1 %v3225_v50 }
 0x56f   :  { %3804 = vmatprep.mubr.f32.mxu1 %v3234_v44 }
 0x572   :  { %3805 = vmatmul.mubr.f32.gmra.mrb[14].mxu1 %v3233_v56 }
 0x641   :  { %v3800_v3 = vpop.f32.mrb[12].mxu1 }
 0x642   :  { %v5593_v28 = vadd.f32 %v3800_v3, %v3496_v35  ;;  %v3802_v62 = vpop.f32.mrb[13].mxu1 }
 0x643   :  { %v5594_v8 = vadd.f32 %v3802_v62, %v3500_v52 }
 0x644   :  { %v3811_v9 = vmax.f32 %v5593_v28, 0.0 }
 0x645   :  { %v3812_v29 = vmax.f32 %v5594_v8, 0.0  ;;  %v3806_v0 = vpop.f32.mrb[14].mxu1 }
 0x646   :  { %v5595_v34 = vadd.f32 %v3806_v0, %v3496_v35  ;;  %v3808_v12 = vpop.f32.mrb[15].mxu1 }
 0x647   :  { %v5596_v11 = vadd.f32 %v3808_v12, %v3500_v52  ;;  %3918 = vmatprep.mubr.f32.mxu0 %v3812_v29 }
 0x648   :  { %3919 = vmatmul.mubr.f32.vlgmr.msra.gmra.mrb[24].mxu0 %v3811_v9  ;;  %v3813_v7 = vmax.f32 %v5595_v34, 0.0 }
 0x649   :  { %v3814_v10 = vmax.f32 %v5596_v11, 0.0 }
 0x64b   :  { %3923 = vmatprep.mubr.f32.mxu0 %v3814_v10 }
 0x64c   :  { %3924 = vmatmul.mubr.f32.gmra.mrb[26].mxu0 %v3813_v7 }
 0x71b   :  { %v3999_v14 = vpop.f32.mrb[24].mxu0 }
 0x71c   :  { %v4000_v16 = vpop.f32.mrb[25].mxu0 }
 0x71d   :  { %v4001_v48 = vadd.f32 %v4000_v16, %v3999_v14 }
 0x71f   :  { %v3921_v18 = vadd.f32 %v4001_v48, %v3964_v46  ;;  %v4002_v41 = vpop.f32.mrb[26].mxu0 }
 0x720   :  { %v4003_v22 = vpop.f32.mrb[27].mxu0 }
 0x721   :  { %5676 = vtanh.f32 %v3921_v18  ;;  %v4004_v23 = vadd.f32 %v4003_v22, %v4002_v41 }
 0x723   :  { %v3926_v63 = vadd.f32 %v4004_v23, %v3964_v46 }
 0x725   :  { %5678 = vtanh.f32 %v3926_v63 }
 0x72b   :  { %v5677_v26 = vpop.eup %5676 }
 0x72c   :  { %v3938_v30 = vmul.f32 %v5677_v26, %v3965_v25 }
 0x72e   :  { %v3947_v31 = vadd.f32 %v3966_v19, %v3938_v30 }
 0x72f   :  { %v5679_v36 = vpop.eup %5678 }
 0x730   :  { %3949 = vst [vmem:[%s6459_s13] sm:$0xff] %v3947_v31  ;;  %v3939_v33 = vmul.f32 %v5679_v36, %v3965_v25 }
 0x732   :  { %v3948_v49 = vadd.f32 %v3966_v19, %v3939_v33 }
 0x734   :  { %3950 = vst [vmem:[%s6459_s13 + $0x8] sm:$0xff] %v3948_v49 }
 0x735   :  { %3955 = vsyncpa [#allocation3], 1 }
 0x736   :  { %3956 = vsyncpa [#allocation5], 1 }
 0x737   :  { %3957 = vsyncpa [#allocation8], 1 }
 0x738   :  { %3958 = vsyncpa [#allocation11], 1 }
 0x739   :  { %3959 = vsyncpa [#allocation14], 1 }
 0x73a   :  { %3960 = vsyncpa [#allocation17], 1 }
 0x73b   :  { %3961 = vsyncpa [#allocation20], 1 }

</bundles_post_ra>
